<compile_context>
chip_gen: v7x
topology: tpu7x:2x2x1
jax: 0.10.0
libtpu: 0.0.40
codegen_flags: <defaults>
</compile_context>

<pallas_src>
import math

import jax
import jax.numpy as jnp
from jax import lax
from jax.experimental import pallas as pl
from jax.experimental.pallas import tpu as pltpu


NEG_INF = -1e30  # finite mask value; exp underflows to exactly 0 in f32


def _mil_kernel(lens_ref,       # [Bb, 1, 1] int32  true bag sizes (for masking)
                logn_ref,       # [Bb, 1]    f32    log(max(bag size, 1))
                x_ref,          # [Bb, Np, D_in]    bf16 padded bags
                w1_ref,         # [D_in, hidden]    bf16
                wts_ref,        # [hidden, 2*attn]  bf16 (tanh | sigmoid fused)
                ww_ref,         # [attn, branches]  bf16
                wcb_ref,        # [branches, hidden, classes] bf16 classifier
                wcl_ref,        # [1, classes]      f32 classifier log-bag-size row
                bias_ref,       # [4, bias_w]       f32 packed biases: b1 | (bt|bs) | bw | bc
                out_ref,        # [Bb, classes]     f32
                attn_ref):      # [Bb, branches, Np] f32
    Bb, Np, _ = x_ref.shape
    hidden = w1_ref.shape[1]
    attn_dim = ww_ref.shape[0]
    branches = ww_ref.shape[1]
    num_classes = wcl_ref.shape[1]
    cdt = x_ref.dtype                                  # bf16 MXU operand dtype

    # static views into the packed bias slab (zero-cost slices)
    b1 = bias_ref[0:1, :hidden]
    bts = bias_ref[1:2, :2 * attn_dim]
    bw = bias_ref[2:3, :branches]
    bc = bias_ref[3:4, :num_classes]

    # all bags of this block fused into one tall matmul operand
    x = x_ref[...].reshape(Bb * Np, x_ref.shape[2])                        # bf16

    # feature_projection: Linear -> ReLU (-> Dropout, identity at inference)
    # TODO(synk): nn.Dropout(p=0.25) training-mode dropout not implemented.
    H = jnp.maximum(
        jnp.dot(x, w1_ref[...], preferred_element_type=jnp.float32) + b1, 0.0)
    Hb = H.astype(cdt)                                                     # [Bb*Np, hidden]

    # fused gated attention: one matmul covers both tanh and sigmoid branches
    G = jnp.dot(Hb, wts_ref[...], preferred_element_type=jnp.float32) + bts
    gated = (jnp.tanh(G[:, :attn_dim]) * jax.nn.sigmoid(G[:, attn_dim:])).astype(cdt)

    logits = jnp.dot(gated, ww_ref[...],
                     preferred_element_type=jnp.float32) + bw              # [Bb*Np, branches]

    # per-bag masked softmax in the lane-dense [Bb, branches, Np] layout
    logits3 = jnp.transpose(logits.reshape(Bb, Np, branches), (0, 2, 1))   # [Bb, branches, Np]
    pos = lax.broadcasted_iota(jnp.int32, (Bb, branches, Np), 2)
    logits3 = jnp.where(pos < lens_ref[...], logits3, NEG_INF)

    m = jnp.max(logits3, axis=2, keepdims=True)
    e = jnp.exp(logits3 - m)                        # masked entries underflow to exactly 0
    A = e / jnp.sum(e, axis=2, keepdims=True)       # exact divide: attn maps are an output
    attn_ref[...] = A.astype(attn_ref.dtype)

    # attention pooling: per-bag contraction over the instance axis
    H3 = Hb.reshape(Bb, Np, hidden)
    M = jnp.einsum('bkn,bnh->bkh', A.astype(cdt), H3,
                   preferred_element_type=jnp.float32)                     # [Bb, branches, hidden]

    # classifier: log(bag_size) column handled in f32, per-branch weight slabs
    # (branches is static & tiny; each matmul now has Bb rows, not 1).
    cls = logn_ref[...] * wcl_ref[...] + bc                                # [Bb, classes]
    for k in range(branches):
        cls = cls + jnp.dot(M[:, k, :].astype(cdt), wcb_ref[k],
                            preferred_element_type=jnp.float32)
    out_ref[...] = cls


def attention_mil_forward(x_bags, lens, kp, block_bags=8):
    """x_bags: [B, Np, D_in] padded bags (bf16); lens: [B] int32 true bag sizes."""
    B, Np, D_in = x_bags.shape
    hidden = kp["w1"].shape[1]
    attn2 = kp["wts"].shape[1]
    attn_dim = attn2 // 2
    branches = kp["ww"].shape[1]
    num_classes = kp["wcl"].shape[1]
    bias_w = kp["bias"].shape[1]

    Bb = block_bags
    assert B % Bb == 0, "batch must be a multiple of block_bags"
    assert Bb % 8 == 0, "block_bags must be a multiple of 8 (sublane tiling)"
    assert Np % 8 == 0, "padded bag size must be a multiple of 8"

    lens = lens.astype(jnp.int32)
    lens3 = lens.reshape(B, 1, 1)
    logn = jnp.log(jnp.maximum(lens, 1).astype(jnp.float32)).reshape(B, 1)

    grid = (B // Bb,)
    in_specs = [
        pl.BlockSpec((Bb, 1, 1), lambda g: (g, 0, 0)),          # lens
        pl.BlockSpec((Bb, 1), lambda g: (g, 0)),                # log(bag size)
        pl.BlockSpec((Bb, Np, D_in), lambda g: (g, 0, 0)),      # x
        # weights: constant block index -> VMEM-resident across grid steps
        pl.BlockSpec((D_in, hidden), lambda g: (0, 0)),
        pl.BlockSpec((hidden, attn2), lambda g: (0, 0)),
        pl.BlockSpec((attn_dim, branches), lambda g: (0, 0)),
        pl.BlockSpec((branches, hidden, num_classes), lambda g: (0, 0, 0)),
        pl.BlockSpec((1, num_classes), lambda g: (0, 0)),
        pl.BlockSpec((4, bias_w), lambda g: (0, 0)),
    ]
    out_specs = [
        pl.BlockSpec((Bb, num_classes), lambda g: (g, 0)),
        pl.BlockSpec((Bb, branches, Np), lambda g: (g, 0, 0)),
    ]

    flops = (2 * B * Np * (D_in * hidden + hidden * attn2
                           + attn_dim * branches + branches * hidden)
             + 2 * B * branches * hidden * num_classes)
    transcendentals = B * Np * (attn2 + branches)
    weight_bytes = sum(int(v.size) * v.dtype.itemsize for v in kp.values())
    bytes_accessed = (int(x_bags.size) * x_bags.dtype.itemsize + weight_bytes
                      + B * 8 + 4 * B * num_classes + 4 * B * branches * Np)

    out, attn = pl.pallas_call(
        _mil_kernel,
        out_shape=(
            jax.ShapeDtypeStruct((B, num_classes), jnp.float32),
            jax.ShapeDtypeStruct((B, branches, Np), jnp.float32),
        ),
        grid=grid,
        in_specs=in_specs,
        out_specs=out_specs,
        compiler_params=pltpu.CompilerParams(
            dimension_semantics=("parallel",),
            # Safe on every generation (v5e raises its 16 MiB default; v6e/v7x
            # default).  Re-derive for realistic D_in/Np on v7x (64 MiB phys).
            vmem_limit_bytes=32 * 1024 * 1024),
        cost_estimate=pl.CostEstimate(flops=flops,
                                      transcendentals=transcendentals,
                                      bytes_accessed=bytes_accessed),
    )(lens3, logn, x_bags, kp["w1"], kp["wts"], kp["ww"], kp["wcb"],
      kp["wcl"], kp["bias"])
    return out, attn                      # ([B, classes], [B, branches, Np])


def init_params(key, input_dim, hidden_dim, attention_dim, num_classes,
                attention_branches):
    """PyTorch-Linear-style init; weights stored as [in, out], f32."""
    def linear(k, fan_in, fan_out):
        kw, kb = jax.random.split(k)
        bound = 1.0 / math.sqrt(fan_in)
        w = jax.random.uniform(kw, (fan_in, fan_out), jnp.float32, -bound, bound)
        b = jax.random.uniform(kb, (1, fan_out), jnp.float32, -bound, bound)
        return w, b

    k1, k2, k3, k4, k5 = jax.random.split(key, 5)
    raw = {}
    raw["w1"], raw["b1"] = linear(k1, input_dim, hidden_dim)
    raw["wt"], raw["bt"] = linear(k2, hidden_dim, attention_dim)
    raw["ws"], raw["bs"] = linear(k3, hidden_dim, attention_dim)
    raw["ww"], raw["bw"] = linear(k4, attention_dim, attention_branches)
    raw["wc"], raw["bc"] = linear(k5, hidden_dim * attention_branches + 1, num_classes)
    return raw


def pack_params(raw, hidden_dim, attention_dim, num_classes, attention_branches,
                compute_dtype=jnp.bfloat16):
    """Pack the per-tensor params into a few kernel-friendly (bf16) slabs."""
    kp = {}
    kp["w1"] = raw["w1"].astype(compute_dtype)
    kp["wts"] = jnp.concatenate([raw["wt"], raw["ws"]], axis=1).astype(compute_dtype)
    kp["ww"] = raw["ww"].astype(compute_dtype)
    kp["wcb"] = raw["wc"][:-1, :].reshape(
        attention_branches, hidden_dim, num_classes).astype(compute_dtype)
    kp["wcl"] = raw["wc"][-1:, :].astype(jnp.float32)        # log-bag-size row, f32
    bias_w = max(hidden_dim, 2 * attention_dim, attention_branches, num_classes)

    def pad(b):
        return jnp.pad(b, ((0, 0), (0, bias_w - b.shape[1])))

    bts = jnp.concatenate([raw["bt"], raw["bs"]], axis=1)
    kp["bias"] = jnp.concatenate(
        [pad(raw["b1"]), pad(bts), pad(raw["bw"]), pad(raw["bc"])],
        axis=0).astype(jnp.float32)                          # [4, bias_w]
    return kp


def _bdot(a, b):
    """bf16-operand / f32-accumulate matmul, mirroring the kernel's MXU path."""
    return jnp.dot(a.astype(jnp.bfloat16), b.astype(jnp.bfloat16),
                   preferred_element_type=jnp.float32)


def reference_forward(x, raw):
    """Plain-JAX reference mirroring the PyTorch forward (eval mode), one bag."""
    H = jnp.maximum(_bdot(x, raw["w1"]) + raw["b1"], 0.0)
    At = jnp.tanh(_bdot(H, raw["wt"]) + raw["bt"])
    As = jax.nn.sigmoid(_bdot(H, raw["ws"]) + raw["bs"])
    A = (_bdot(At * As, raw["ww"]) + raw["bw"]).T
    A = jax.nn.softmax(A, axis=1)
    M = _bdot(A, H).reshape(-1)
    logn = jnp.log(jnp.asarray(float(x.shape[0]), jnp.float32))
    out = (_bdot(M[None, :], raw["wc"][:-1, :])[0]
           + logn * raw["wc"][-1, :] + raw["bc"][0])
    return out, A


if __name__ == "__main__":
    # Lane-dense small shapes: 16 bags padded to 128 instances of 128 features.
    input_dim, hidden_dim, attention_dim = 128, 128, 128
    num_classes, attention_branches = 3, 2
    B, Np, Bb = 16, 128, 8           # grid = 2 (even -> both v7x TensorCores busy)

    key = jax.random.PRNGKey(0)
    kx, kparam = jax.random.split(key)
    x_f32 = jax.random.normal(kx, (B, Np, input_dim), jnp.float32)
    lens = jnp.array([128, 7, 64, 128, 33, 96, 90, 1,
                      128, 50, 120, 17, 100, 128, 5, 77], jnp.int32)
    valid = (jnp.arange(Np)[None, :] < lens[:, None])[:, :, None]
    x_f32 = jnp.where(valid, x_f32, 0.0)          # zero the padded instances
    x_bags = x_f32.astype(jnp.bfloat16)           # bf16 HBM storage / MXU operands

    raw = init_params(kparam, input_dim, hidden_dim, attention_dim,
                      num_classes, attention_branches)
    kparams = pack_params(raw, hidden_dim, attention_dim, num_classes,
                          attention_branches)

    forward = jax.jit(attention_mil_forward)
    out, attn = forward(x_bags, lens, kparams)
    out = jax.block_until_ready(out)
    attn = jax.block_until_ready(attn)

    # verify each bag against the unbatched, unpadded bf16-matmul reference
    for bi in range(B):
        n = int(lens[bi])
        ref_out, ref_attn = reference_forward(x_f32[bi, :n], raw)
        assert jnp.allclose(out[bi], ref_out, atol=2e-2, rtol=2e-2), (
            bi, out[bi], ref_out)
        assert jnp.allclose(attn[bi, :, :n], ref_attn, atol=3e-3, rtol=3e-3), bi
        assert jnp.allclose(attn[bi, :, n:], 0.0, atol=1e-7), bi

    print("KERNEL_OK")
</pallas_src>

<mosaic_0001>
module attributes {stable_mosaic.version = 11 : i64} {
  func.func @_mil_kernel(%arg0: i32, %arg1: memref<8x1x1xi32, #tpu.memory_space<vmem>>, %arg2: memref<8x1xf32, #tpu.memory_space<vmem>>, %arg3: memref<8x128x128xbf16, #tpu.memory_space<vmem>>, %arg4: memref<128x128xbf16, #tpu.memory_space<vmem>>, %arg5: memref<128x256xbf16, #tpu.memory_space<vmem>>, %arg6: memref<128x2xbf16, #tpu.memory_space<vmem>>, %arg7: memref<2x128x3xbf16, #tpu.memory_space<vmem>>, %arg8: memref<1x3xf32, #tpu.memory_space<vmem>>, %arg9: memref<4x256xf32, #tpu.memory_space<vmem>>, %arg10: memref<8x3xf32, #tpu.memory_space<vmem>>, %arg11: memref<8x2x128xf32, #tpu.memory_space<vmem>>) attributes {dimension_semantics = [#tpu.dimension_semantics<parallel>], iteration_bounds = array<i64: 2>, scalar_prefetch = 0 : i64, scratch_operands = 0 : i64, tpu.core_type = #tpu.core_type<tc>, window_params = [{transform_indices = @transform_0, window_bounds = array<i64: 8, 1, 1>}, {transform_indices = @transform_1, window_bounds = array<i64: 8, 1>}, {transform_indices = @transform_2, window_bounds = array<i64: 8, 128, 128>}, {pipeline_mode = #tpu.pipeline_mode<synchronous>, transform_indices = @transform_3, window_bounds = array<i64: 128, 128>}, {pipeline_mode = #tpu.pipeline_mode<synchronous>, transform_indices = @transform_4, window_bounds = array<i64: 128, 256>}, {pipeline_mode = #tpu.pipeline_mode<synchronous>, transform_indices = @transform_5, window_bounds = array<i64: 128, 2>}, {pipeline_mode = #tpu.pipeline_mode<synchronous>, transform_indices = @transform_6, window_bounds = array<i64: 2, 128, 3>}, {pipeline_mode = #tpu.pipeline_mode<synchronous>, transform_indices = @transform_7, window_bounds = array<i64: 1, 3>}, {pipeline_mode = #tpu.pipeline_mode<synchronous>, transform_indices = @transform_8, window_bounds = array<i64: 4, 256>}, {transform_indices = @transform_9, window_bounds = array<i64: 8, 3>}, {transform_indices = @transform_10, window_bounds = array<i64: 8, 2, 128>}]} {
    %c0 = arith.constant 0 : index
    %c0_0 = arith.constant 0 : index
    %0 = vector.load %arg9[%c0, %c0_0] : memref<4x256xf32, #tpu.memory_space<vmem>>, vector<1x128xf32>
    %c1 = arith.constant 1 : index
    %c0_1 = arith.constant 0 : index
    %1 = vector.load %arg9[%c1, %c0_1] : memref<4x256xf32, #tpu.memory_space<vmem>>, vector<1x256xf32>
    %c2 = arith.constant 2 : index
    %c0_2 = arith.constant 0 : index
    %2 = vector.load %arg9[%c2, %c0_2] : memref<4x256xf32, #tpu.memory_space<vmem>>, vector<1x2xf32>
    %c3 = arith.constant 3 : index
    %c0_3 = arith.constant 0 : index
    %3 = vector.load %arg9[%c3, %c0_3] : memref<4x256xf32, #tpu.memory_space<vmem>>, vector<1x3xf32>
    %c0_4 = arith.constant 0 : index
    %c0_5 = arith.constant 0 : index
    %c0_6 = arith.constant 0 : index
    %4 = vector.load %arg3[%c0_4, %c0_5, %c0_6] : memref<8x128x128xbf16, #tpu.memory_space<vmem>>, vector<8x128x128xbf16>
    %5 = vector.shape_cast %4 : vector<8x128x128xbf16> to vector<1024x128xbf16>
    %c0_7 = arith.constant 0 : index
    %c0_8 = arith.constant 0 : index
    %6 = vector.load %arg4[%c0_7, %c0_8] : memref<128x128xbf16, #tpu.memory_space<vmem>>, vector<128x128xbf16>
    %cst = arith.constant dense<0.000000e+00> : vector<1024x128xf32>
    %7 = tpu.matmul %5, %6, %cst {dimension_numbers = #tpu.dot_dimension_numbers<[1], [0], [0], [1], [0, 0, 1, 1], [], []>} : vector<1024x128xbf16>, vector<128x128xbf16>, vector<1024x128xf32> -> vector<1024x128xf32>
    %8 = vector.broadcast %0 : vector<1x128xf32> to vector<1024x128xf32>
    %9 = arith.addf %7, %8 : vector<1024x128xf32>
    %cst_9 = arith.constant 0.000000e+00 : f32
    %10 = vector.broadcast %cst_9 : f32 to vector<1024x128xf32>
    %11 = arith.maximumf %9, %10 : vector<1024x128xf32>
    %12 = arith.truncf %11 : vector<1024x128xf32> to vector<1024x128xbf16>
    %c0_10 = arith.constant 0 : index
    %c0_11 = arith.constant 0 : index
    %13 = vector.load %arg5[%c0_10, %c0_11] : memref<128x256xbf16, #tpu.memory_space<vmem>>, vector<128x256xbf16>
    %cst_12 = arith.constant dense<0.000000e+00> : vector<1024x256xf32>
    %14 = tpu.matmul %12, %13, %cst_12 {dimension_numbers = #tpu.dot_dimension_numbers<[1], [0], [0], [1], [0, 0, 1, 1], [], []>} : vector<1024x128xbf16>, vector<128x256xbf16>, vector<1024x256xf32> -> vector<1024x256xf32>
    %15 = vector.broadcast %1 : vector<1x256xf32> to vector<1024x256xf32>
    %16 = arith.addf %14, %15 : vector<1024x256xf32>
    %17 = vector.extract_strided_slice %16 {offsets = [0, 0], sizes = [1024, 128], strides = [1, 1]} : vector<1024x256xf32> to vector<1024x128xf32>
    %18 = math.tanh %17 : vector<1024x128xf32>
    %19 = vector.extract_strided_slice %16 {offsets = [0, 128], sizes = [1024, 128], strides = [1, 1]} : vector<1024x256xf32> to vector<1024x128xf32>
    %20 = arith.negf %19 : vector<1024x128xf32>
    %21 = math.exp %20 : vector<1024x128xf32>
    %cst_13 = arith.constant 1.000000e+00 : f32
    %22 = vector.broadcast %cst_13 : f32 to vector<1024x128xf32>
    %23 = arith.addf %22, %21 : vector<1024x128xf32>
    %24 = arith.divf %22, %23 : vector<1024x128xf32>
    %25 = arith.mulf %18, %24 : vector<1024x128xf32>
    %26 = arith.truncf %25 : vector<1024x128xf32> to vector<1024x128xbf16>
    %c0_14 = arith.constant 0 : index
    %c0_15 = arith.constant 0 : index
    %27 = vector.load %arg6[%c0_14, %c0_15] : memref<128x2xbf16, #tpu.memory_space<vmem>>, vector<128x2xbf16>
    %cst_16 = arith.constant dense<0.000000e+00> : vector<1024x2xf32>
    %28 = tpu.matmul %26, %27, %cst_16 {dimension_numbers = #tpu.dot_dimension_numbers<[1], [0], [0], [1], [0, 0, 1, 1], [], []>} : vector<1024x128xbf16>, vector<128x2xbf16>, vector<1024x2xf32> -> vector<1024x2xf32>
    %29 = vector.broadcast %2 : vector<1x2xf32> to vector<1024x2xf32>
    %30 = arith.addf %28, %29 : vector<1024x2xf32>
    %31 = vector.shape_cast %30 : vector<1024x2xf32> to vector<8x128x2xf32>
    %32 = tpu.transpose %31, [0, 2, 1] : vector<8x128x2xf32> -> vector<8x2x128xf32>
    %33 = tpu.iota {dimensions = array<i32: 2>} : vector<8x2x128xi32>
    %c0_17 = arith.constant 0 : index
    %c0_18 = arith.constant 0 : index
    %c0_19 = arith.constant 0 : index
    %34 = vector.load %arg1[%c0_17, %c0_18, %c0_19] : memref<8x1x1xi32, #tpu.memory_space<vmem>>, vector<8x1x1xi32>
    %35 = vector.broadcast %34 : vector<8x1x1xi32> to vector<8x2x128xi32>
    %36 = arith.cmpi slt, %33, %35 : vector<8x2x128xi32>
    %cst_20 = arith.constant -1.000000e+30 : f32
    %37 = vector.broadcast %cst_20 : f32 to vector<8x2x128xf32>
    %38 = arith.select %36, %32, %37 : vector<8x2x128xi1>, vector<8x2x128xf32>
    %cst_21 = arith.constant dense<0xFF800000> : vector<8x2xf32>
    %39 = vector.multi_reduction <maximumf>, %38, %cst_21 [2] : vector<8x2x128xf32> to vector<8x2xf32>
    %40 = vector.shape_cast %39 : vector<8x2xf32> to vector<8x2x1xf32>
    %41 = vector.broadcast %40 : vector<8x2x1xf32> to vector<8x2x128xf32>
    %42 = arith.subf %38, %41 : vector<8x2x128xf32>
    %43 = math.exp %42 : vector<8x2x128xf32>
    %cst_22 = arith.constant dense<0.000000e+00> : vector<8x2xf32>
    %44 = vector.multi_reduction <add>, %43, %cst_22 [2] : vector<8x2x128xf32> to vector<8x2xf32>
    %45 = vector.shape_cast %44 : vector<8x2xf32> to vector<8x2x1xf32>
    %46 = vector.broadcast %45 : vector<8x2x1xf32> to vector<8x2x128xf32>
    %47 = arith.divf %43, %46 : vector<8x2x128xf32>
    %c0_23 = arith.constant 0 : index
    %c0_24 = arith.constant 0 : index
    %c0_25 = arith.constant 0 : index
    %48 = vector.load %arg11[%c0_23, %c0_24, %c0_25] : memref<8x2x128xf32, #tpu.memory_space<vmem>>, vector<8x2x128xf32>
    tpu.vector_store %arg11[%c0_23, %c0_24, %c0_25], %47 {strides = array<i32>} : memref<8x2x128xf32, #tpu.memory_space<vmem>>, vector<8x2x128xf32>,
    %49 = vector.shape_cast %12 : vector<1024x128xbf16> to vector<8x128x128xbf16>
    %50 = arith.truncf %47 : vector<8x2x128xf32> to vector<8x2x128xbf16>
    "tpu.trace_start"() <{level = 10 : i32, message = "bkn,bnh->bkh"}> : () -> ()
    %cst_26 = arith.constant dense<0.000000e+00> : vector<8x2x128xf32>
    %51 = tpu.matmul %50, %49, %cst_26 {dimension_numbers = #tpu.dot_dimension_numbers<[2], [1], [1], [2], [0, 0, 0, 1, 1, 2], [0], [0]>} : vector<8x2x128xbf16>, vector<8x128x128xbf16>, vector<8x2x128xf32> -> vector<8x2x128xf32>
    "tpu.trace_stop"() : () -> ()
    %c0_27 = arith.constant 0 : index
    %c0_28 = arith.constant 0 : index
    %52 = vector.load %arg2[%c0_27, %c0_28] : memref<8x1xf32, #tpu.memory_space<vmem>>, vector<8x1xf32>
    %c0_29 = arith.constant 0 : index
    %c0_30 = arith.constant 0 : index
    %53 = vector.load %arg8[%c0_29, %c0_30] : memref<1x3xf32, #tpu.memory_space<vmem>>, vector<1x3xf32>
    %54 = vector.broadcast %52 : vector<8x1xf32> to vector<8x3xf32>
    %55 = vector.broadcast %53 : vector<1x3xf32> to vector<8x3xf32>
    %56 = arith.mulf %54, %55 : vector<8x3xf32>
    %57 = vector.broadcast %3 : vector<1x3xf32> to vector<8x3xf32>
    %58 = arith.addf %56, %57 : vector<8x3xf32>
    %59 = vector.extract_strided_slice %51 {offsets = [0, 0, 0], sizes = [8, 1, 128], strides = [1, 1, 1]} : vector<8x2x128xf32> to vector<8x1x128xf32>
    %60 = vector.shape_cast %59 : vector<8x1x128xf32> to vector<8x128xf32>
    %61 = arith.truncf %60 : vector<8x128xf32> to vector<8x128xbf16>
    %c0_31 = arith.constant 0 : index
    %c0_32 = arith.constant 0 : index
    %c0_33 = arith.constant 0 : index
    %62 = vector.load %arg7[%c0_31, %c0_32, %c0_33] : memref<2x128x3xbf16, #tpu.memory_space<vmem>>, vector<1x128x3xbf16>
    %63 = vector.shape_cast %62 : vector<1x128x3xbf16> to vector<128x3xbf16>
    %cst_34 = arith.constant dense<0.000000e+00> : vector<8x3xf32>
    %64 = tpu.matmul %61, %63, %cst_34 {dimension_numbers = #tpu.dot_dimension_numbers<[1], [0], [0], [1], [0, 0, 1, 1], [], []>} : vector<8x128xbf16>, vector<128x3xbf16>, vector<8x3xf32> -> vector<8x3xf32>
    %65 = arith.addf %58, %64 : vector<8x3xf32>
    %66 = vector.extract_strided_slice %51 {offsets = [0, 1, 0], sizes = [8, 1, 128], strides = [1, 1, 1]} : vector<8x2x128xf32> to vector<8x1x128xf32>
    %67 = vector.shape_cast %66 : vector<8x1x128xf32> to vector<8x128xf32>
    %68 = arith.truncf %67 : vector<8x128xf32> to vector<8x128xbf16>
    %c1_35 = arith.constant 1 : index
    %c0_36 = arith.constant 0 : index
    %c0_37 = arith.constant 0 : index
    %69 = vector.load %arg7[%c1_35, %c0_36, %c0_37] : memref<2x128x3xbf16, #tpu.memory_space<vmem>>, vector<1x128x3xbf16>
    %70 = vector.shape_cast %69 : vector<1x128x3xbf16> to vector<128x3xbf16>
    %cst_38 = arith.constant dense<0.000000e+00> : vector<8x3xf32>
    %71 = tpu.matmul %68, %70, %cst_38 {dimension_numbers = #tpu.dot_dimension_numbers<[1], [0], [0], [1], [0, 0, 1, 1], [], []>} : vector<8x128xbf16>, vector<128x3xbf16>, vector<8x3xf32> -> vector<8x3xf32>
    %72 = arith.addf %65, %71 : vector<8x3xf32>
    %c0_39 = arith.constant 0 : index
    %c0_40 = arith.constant 0 : index
    %73 = vector.load %arg10[%c0_39, %c0_40] : memref<8x3xf32, #tpu.memory_space<vmem>>, vector<8x3xf32>
    tpu.vector_store %arg10[%c0_39, %c0_40], %72 {strides = array<i32>} : memref<8x3xf32, #tpu.memory_space<vmem>>, vector<8x3xf32>,
    return
  }
  func.func @transform_0(%arg0: i32) -> (i32, i32, i32) {
    %c0_i32 = arith.constant 0 : i32
    %c0_i32_0 = arith.constant 0 : i32
    %c0_i32_1 = arith.constant 0 : i32
    return %arg0, %c0_i32, %c0_i32_0 : i32, i32, i32
  }
  func.func @transform_1(%arg0: i32) -> (i32, i32) {
    %c0_i32 = arith.constant 0 : i32
    %c0_i32_0 = arith.constant 0 : i32
    return %arg0, %c0_i32 : i32, i32
  }
  func.func @transform_2(%arg0: i32) -> (i32, i32, i32) {
    %c0_i32 = arith.constant 0 : i32
    %c0_i32_0 = arith.constant 0 : i32
    %c0_i32_1 = arith.constant 0 : i32
    return %arg0, %c0_i32, %c0_i32_0 : i32, i32, i32
  }
  func.func @transform_3(%arg0: i32) -> (i32, i32) {
    %c0_i32 = arith.constant 0 : i32
    %c0_i32_0 = arith.constant 0 : i32
    %c0_i32_1 = arith.constant 0 : i32
    return %c0_i32, %c0_i32_0 : i32, i32
  }
  func.func @transform_4(%arg0: i32) -> (i32, i32) {
    %c0_i32 = arith.constant 0 : i32
    %c0_i32_0 = arith.constant 0 : i32
    %c0_i32_1 = arith.constant 0 : i32
    return %c0_i32, %c0_i32_0 : i32, i32
  }
  func.func @transform_5(%arg0: i32) -> (i32, i32) {
    %c0_i32 = arith.constant 0 : i32
    %c0_i32_0 = arith.constant 0 : i32
    %c0_i32_1 = arith.constant 0 : i32
    return %c0_i32, %c0_i32_0 : i32, i32
  }
  func.func @transform_6(%arg0: i32) -> (i32, i32, i32) {
    %c0_i32 = arith.constant 0 : i32
    %c0_i32_0 = arith.constant 0 : i32
    %c0_i32_1 = arith.constant 0 : i32
    %c0_i32_2 = arith.constant 0 : i32
    return %c0_i32, %c0_i32_0, %c0_i32_1 : i32, i32, i32
  }
  func.func @transform_7(%arg0: i32) -> (i32, i32) {
    %c0_i32 = arith.constant 0 : i32
    %c0_i32_0 = arith.constant 0 : i32
    %c0_i32_1 = arith.constant 0 : i32
    return %c0_i32, %c0_i32_0 : i32, i32
  }
  func.func @transform_8(%arg0: i32) -> (i32, i32) {
    %c0_i32 = arith.constant 0 : i32
    %c0_i32_0 = arith.constant 0 : i32
    %c0_i32_1 = arith.constant 0 : i32
    return %c0_i32, %c0_i32_0 : i32, i32
  }
  func.func @transform_9(%arg0: i32) -> (i32, i32) {
    %c0_i32 = arith.constant 0 : i32
    %c0_i32_0 = arith.constant 0 : i32
    return %arg0, %c0_i32 : i32, i32
  }
  func.func @transform_10(%arg0: i32) -> (i32, i32, i32) {
    %c0_i32 = arith.constant 0 : i32
    %c0_i32_0 = arith.constant 0 : i32
    %c0_i32_1 = arith.constant 0 : i32
    return %arg0, %c0_i32, %c0_i32_0 : i32, i32, i32
  }
}

</mosaic_0001>

<bundles_post_ra>
// kernel: attention_mil_forward.1
= control target key start
LH: loop header
LB: loop body
LE: loop exit
PB: predicated region body
PF: predicated region fallthrough
CT: control target
= control target key end

     0   :  { %s9456_s0 = inlined_call_operand.vmem [shape: s32[16,1,1], index: 0, kind: input, shape index: {}]   ;;  %s9457_s1 = inlined_call_operand.vmem [shape: f32[16,1], index: 1, kind: input, shape index: {}]   ;;  %s9458_s2 = inlined_call_operand.hbm [shape: bf16[16,128,128], index: 2, kind: input, shape index: {}]   ;;  %s9459_s3 = inlined_call_operand.vmem [shape: bf16[128,128], index: 3, kind: input, shape index: {}]   ;;  %s9460_s4 = inlined_call_operand.vmem [shape: bf16[128,256], index: 4, kind: input, shape index: {}]   ;;  %s9461_s5 = inlined_call_operand.vmem [shape: bf16[128,2], index: 5, kind: input, shape index: {}]   ;;  %s9462_s6 = inlined_call_operand.vmem [shape: bf16[2,128,3], index: 6, kind: input, shape index: {}]   ;;  %s9463_s7 = inlined_call_operand.vmem [shape: f32[1,3], index: 7, kind: input, shape index: {}]   ;;  %s9464_s8 = inlined_call_operand.vmem [shape: f32[4,256], index: 8, kind: input, shape index: {}]   ;;  %s9465_s9 = inlined_call_operand.vmem [shape: f32[16,3], index: 9, kind: output, shape index: {0}]   ;;  %s9466_s10 = inlined_call_operand.hbm [shape: f32[16,2,128], index: 10, kind: output, shape index: {1}]  }
   0x1   :  { %9517 = sst [smem:[#allocation52_spill]] %s9456_s0 }
   0x2   :  { %9518 = sst [smem:[#allocation53_spill]] %s9457_s1 }
   0x3   :  { %16 = vsyncpa [#allocation3], 0 }
   0x4   :  { %18 = vsyncpa [#allocation3 + $0x1], 0 }
   0x5   :  { %19 = vsyncpa [#allocation4], 0 }
   0x6   :  { %21 = vsyncpa [#allocation4 + $0x1], 0  ;;  %s7602_s13 = smov 0   ;;  %s7604_s14 = smov 0  }
   0x7   :  { %s7606_s15 = smov 0   ;;  %s7608_s16 = smov 0  }
   0x8 LB: > { %s7623_s17 = sadd.s32 4294967295, %s7536_s16   ;;  %s5429_s18 = sadd.s32 4294967294, %s7536_s16   ;;  %s7536_s16 = sphi %s7608_s16, %s9624_s16   ;;  %s7532_s15 = sphi %s7606_s15, %s9623_s15   ;;  %s7528_s14 = sphi %s7604_s14, %s9622_s14   ;;  %s7524_s13 = sphi %s7602_s13, %s9621_s13  }
   0x9   : > { %s7627_s19 = sadd.s32 1, %s7536_s16   ;;  %s86_s20 = sadd.s32 1, %s7532_s15 }
   0xa   : > { %s83_s21 = ssub.s32 %s7536_s16, %s7627_s19  ;;  %p93_p0 = scmp.ne.s32.totalorder %s7532_s15, %s7528_s14 }
   0xb   : > { %p84_p1 = scmp.eq.s32.totalorder %s83_s21, 0  ;;  %p94_p2 = scmp.eq.s32.totalorder %s7536_s16, 0 }
   0xc   : > { %p99_p3 = scmp.ne.s32.totalorder %s7528_s14, %s7524_s13  ;;  %p100_p4 = scmp.eq.s32.totalorder %s7623_s17, 0 }
   0xd   : > { %s7639_s22 = scalar_select %p84_p1, %s7532_s15, %s86_s20  }
   0xe   : > { %p7641_p5 = por %p94_p2, %p93_p0  ;;  %p7645_p6 = por %p100_p4, %p99_p3 }
   0xf   : > { %9519 = sst [smem:[#allocation8_spill]] %s7639_s22  ;;  %p275_p7 = scmp.eq.s32.totalorder %s7623_s17, 1 }
  0x10   : > { %p281_p8 = scmp.eq.s32.totalorder %s5429_s18, 1  ;;  %p6474_p10 = scmp.lt.s32.totalorder %s7536_s16, 2 }
  0x11   : > { %p7652_p11 = por %p275_p7, %p93_p0  ;;  %s334_s27 = sand.u32 1, %s7532_s15  }
  0x12   : > { %p7656_p12 = por %p281_p8, %p99_p3  ;;  %s5717_s28 = sshll.u32 %s7536_s16, 13 }
  0x13   : > { %s9522_s25 = scalar_select %p7652_p11, 1, 0 }
  0x14   : > { %s9523_s26 = scalar_select %p7656_p12, 1, 0 }
  0x15   : > { %s5432_s29 = sshll.u32 %s334_s27, 9  ;;  %s7665_s12 = scalar_lea.hbm %s9458_s2, %s5717_s28 }
  0x16   : > { %s338_s18 = scalar_lea.vmem [#allocation2], %s5432_s29  ;;  %p7669_p13 = pnand %p6474_p10, %p7641_p5 }
  0x17   : > { %s346_s20 = sshll.u32 %s338_s18, 4  ;;  %s7675_s22 = scalar_lea.sflag [#allocation3], %s334_s27  ;;  %s7673_s20 = int_to_ptr.vmem [resolvable:$true] %s346_s20 }
  0x18   : > { %s7440_s30 = scalar_lea.hbm %s7665_s12, 8192  ;;  %p7442_p1 = pneg %p7669_p13 }
  0x19   : > { %p7441_p0 = scmp.ne.s32.totalorder %s7665_s12, %s7440_s30  ;;  %s7445_s29 = scalar_lea.hbm %s9458_s2, 16384 }
  0x1a   : > { %p7446_p4 = scmp.lt.u32.totalorder %s7665_s12, %s9458_s2  ;;  %p7447_p5 = scmp.lt.u32.totalorder %s7445_s29, %s7440_s30 }
  0x1b   : > { %p7443_p2 = pnand %p7442_p1, %p7441_p0  ;;  %p7449_p8 = scmp.lt.u32.totalorder %s7440_s30, %s7665_s12 }
  0x1c   : > { %p7448_p7 = por %p7447_p5, %p7446_p4 }
  0x1d   : > { %p7444_p3 = pneg %p7443_p2 }
  0x1e   : > { %p7450_p10 = por %p7449_p8, %p7448_p7 }
  0x20   : > { %p7451_p9 = pnand %p7450_p10, %p7444_p3 }
  0x22   : > { %7454 = shalt.err (!%p7451_p9)
}
  0x23   : > { %s7455_s27 = scalar_lea.vmem %s7673_s20, 8192  ;;  %s7538_s28 = smov [#allocation2]  }
  0x24   : > { %p7456_p0 = scmp.ne.s32.totalorder %s7673_s20, %s7455_s27  ;;  %s7460_s23 = sshll.u32 %s7538_s28, 4  ;;  %s7461_s23 = int_to_ptr.vmem [resolvable:$false] %s7460_s23 }
  0x25   : > { %s7462_s11 = scalar_lea.vmem %s7461_s23, 16384  ;;  %p7463_p11 = scmp.lt.s32.totalorder %s7673_s20, %s7461_s23 }
  0x26   : > { %p7458_p2 = pnand %p7456_p0, %p7442_p1  ;;  %p7464_p4 = scmp.lt.s32.totalorder %s7462_s11, %s7455_s27 }
  0x28   : > { %p7459_p12 = pneg %p7458_p2  ;;  %p7465_p5 = por %p7464_p4, %p7463_p11 }
  0x2a   : > { %p7466_p7 = pnand %p7465_p5, %p7459_p12 }
  0x2c   : > { %7469 = shalt.err (!%p7466_p7)
}
  0x2d   : > { %s7539_s30 = smov 64   ;;  %s7540_s29 = smov 4  }
  0x2e   : > { %6469 = dma.hbm_to_vmem [thread:$0]  (!%p7669_p13), %s7665_s12, 8192, %s7673_s20, %s7675_s22, %s7539_s30, %s7539_s30, %s7540_s29  }
  0x2f   : > { %p5436_p9 = scmp.ge.s32.totalorder %s7536_s16, 1  ;;  %p354_p1 = scmp.lt.s32.totalorder %s7536_s16, 3 }
  0x31   : > { %p355_p3 = pnand %p5436_p9, %p354_p1 }
  0x33   : > { %358 = sbr.rel (%p355_p3) target bundleno = 2312 (0x908), region = 56 }
  0x3a   : > { %s7706_s18 = sand.u32 1, %s7528_s14  }
  0x3b   : > { %s5437_s27 = sshll.u32 %s7706_s18, 9  ;;  %s361_s28 = scalar_lea.sflag [#allocation3], %s7706_s18 }
  0x3c   : > { %s7710_s23 = scalar_lea.vmem [#allocation2], %s5437_s27 }
  0x3d   : > { %7515 = dma.done.wait (%p7645_p6), %s361_s28, 8192  }
  0x3e   : > { %7517 = vsyncadd (%p7645_p6), %s361_s28, 4294959104  ;;  %v6517_v0 = vld [vmem:[%s9459_s3] sm:$0xff]   ;;  %v6518_v1 = vld [vmem:[%s9459_s3 + $0x8] sm:$0xff]   ;;  %v9471_v58 = vmov 0   ;;  %s5439_s28 = sshll.u32 %s7623_s17, 3  ;;  %s9568_s0 = sld [smem:[#allocation52_spill]] }
  0x3f   : > { %5953 = vmatprep.subr.bf16.mxu0 %v6517_v0  ;;  %6441 = vmatprep.subr.bf16.mxu1 %v6517_v0  ;;  %v6519_v2 = vld [vmem:[%s9459_s3 + $0x10] sm:$0xff]   ;;  %v6520_v3 = vld [vmem:[%s9459_s3 + $0x18] sm:$0xff]   ;;  %v6525_v4 = vld [vmem:[%s7710_s23] sm:$0xff]   ;;  %p414_p6 = scmp.lt.s32.totalorder %s5439_s28, 15  ;;  %vm4570_vm5 = vcmask 1041408   ;;  %vm7543_vm7 = vmmov 0  }
  0x40   : > { %5954 = vmatpush3.bf16.msra.mxu0 %v6517_v0  ;;  %6449 = vmatpush3.bf16.msra.mxu1 %v6517_v0  ;;  %v6521_v5 = vld [vmem:[%s9459_s3 + $0x20] sm:$0xff]   ;;  %v6522_v6 = vld [vmem:[%s9459_s3 + $0x28] sm:$0xff]   ;;  %v6523_v7 = vld [vmem:[%s9459_s3 + $0x30] sm:$0xff]   ;;  %s5438_s27 = sshll.u32 %s7706_s18, 4  ;;  %p418_p11 = scmp.lt.s32.totalorder %s7623_s17, 1  ;;  %vm5055_vm10 = vcmask 1041409  }
  0x41   : > { %5955 = vmatprep.subr.bf16.mxu0 %v6518_v1  ;;  %6442 = vmatprep.subr.bf16.mxu1 %v6518_v1  ;;  %v6524_v8 = vld [vmem:[%s9459_s3 + $0x38] sm:$0xff]   ;;  %v6526_v9 = vld [vmem:[%s7710_s23 + $0x8] sm:$0xff]   ;;  %v6527_v10 = vld [vmem:[%s7710_s23 + $0x10] sm:$0xff]   ;;  %s9626_s28 = smov (!%p414_p6, %s5439_s28), 15  ;;  %s9587_s1 = sld [smem:[#allocation53_spill]]  ;;  %vm5058_vm11 = vcmask 1042434  }
  0x42   : > { %5969 = vmatprep.mubr.bf16.mxu0 %v6525_v4  ;;  %v6549_v11 = vld [vmem:[%s7710_s23 + $0x1c0] sm:$0xff]   ;;  %v6550_v12 = vld [vmem:[%s7710_s23 + $0x1c8] sm:$0xff]   ;;  %v6528_v15 = vld [vmem:[%s7710_s23 + $0x18] sm:$0xff]   ;;  %6516 = vset.pattern.permute.xlu1 %v9471_v58  ;;  %s9235_s22 = scalar_select %p418_p11, %s7623_s17, 1  ;;  %vm5061_vm12 = vcmask 1043459   ;;  %vm5064_vm13 = vcmask 1044484  }
  0x43   : > { %6081 = vmatprep.mubr.bf16.mxu1 %v6549_v11  ;;  %v6551_v13 = vld [vmem:[%s9460_s4] ss:$8 sps:$4 sm:$0xff]   ;;  %v6553_v14 = vld [vmem:[%s9460_s4 + $0x4] ss:$8 sps:$4 sm:$0xff]   ;;  %v6556_v17 = vld [vmem:[%s9460_s4 + $0x10] ss:$8 sps:$4 sm:$0xff]   ;;  %6515 = vset.pattern.permute.xlu0 %v9471_v58 }
  0x44   : > { %5956 = vmatpush3.bf16.msra.mxu0 %v6518_v1  ;;  %6450 = vmatpush3.bf16.msra.mxu1 %v6518_v1  ;;  %v6529_v16 = vld [vmem:[%s7710_s23 + $0x20] sm:$0xff]   ;;  %v6558_v18 = vld [vmem:[%s9460_s4 + $0x14] ss:$8 sps:$4 sm:$0xff]   ;;  %v6530_v25 = vld [vmem:[%s7710_s23 + $0x28] sm:$0xff]   ;;  %s9516_s12 = sshll.u32 %s9235_s22, 3  ;;  %vm5067_vm14 = vcmask 1045509  }
  0x45   : > { %5957 = vmatprep.subr.bf16.mxu0 %v6519_v2  ;;  %6443 = vmatprep.subr.bf16.mxu1 %v6519_v2  ;;  %v6559_v19 = vld [vmem:[%s7710_s23 + $0x1d0] sm:$0xff]   ;;  %v6560_v20 = vld [vmem:[%s7710_s23 + $0x1d8] sm:$0xff]   ;;  %v6563_v21 = vld [vmem:[%s9460_s4 + $0x24] ss:$8 sps:$4 sm:$0xff]   ;;  %vm5070_vm15 = vcmask 1046534   ;;  %s5718_s11 = sshll.u32 %s7623_s17, 8 }
  0x46   : > { %v6561_v22 = vld [vmem:[%s9460_s4 + $0x20] ss:$8 sps:$4 sm:$0xff]   ;;  %v6566_v23 = vld [vmem:[%s9460_s4 + $0x34] ss:$8 sps:$4 sm:$0xff]   ;;  %v6564_v27 = vld [vmem:[%s9460_s4 + $0x30] ss:$8 sps:$4 sm:$0xff]  }
  0x47   : > { %v6567_v24 = vld [vmem:[%s7710_s23 + $0x1e0] sm:$0xff]   ;;  %v6531_v26 = vld [vmem:[%s7710_s23 + $0x30] sm:$0xff]   ;;  %v6568_v28 = vld [vmem:[%s7710_s23 + $0x1e8] sm:$0xff]   ;;  %s421_s21 = scalar_lea.vmem %s9587_s1, %s9516_s12  ;;  %p9616_p13 = scmp.ne.s32.totalorder %s9522_s25, 0 }
  0x48   : > { %5958 = vmatpush3.bf16.msra.mxu0 %v6519_v2  ;;  %6451 = vmatpush3.bf16.msra.mxu1 %v6519_v2  ;;  %v6571_v29 = vld [vmem:[%s9460_s4 + $0x44] ss:$8 sps:$4 sm:$0xff]   ;;  %v6569_v30 = vld [vmem:[%s9460_s4 + $0x40] ss:$8 sps:$4 sm:$0xff]   ;;  %v6577_v31 = vld [vmem:[%s7710_s23 + $0x1f0] sm:$0xff]  }
  0x49   : > { %5959 = vmatprep.subr.bf16.mxu0 %v6520_v3  ;;  %6444 = vmatprep.subr.bf16.mxu1 %v6520_v3  ;;  %v6576_v32 = vld [vmem:[%s9460_s4 + $0x54] ss:$8 sps:$4 sm:$0xff]   ;;  %v6574_v34 = vld [vmem:[%s9460_s4 + $0x50] ss:$8 sps:$4 sm:$0xff]   ;;  %v6533_v35 = vld [vmem:[%s7710_s23 + $0x40] sm:$0xff]  }
  0x4a   : > { %v6532_v33 = vld [vmem:[%s7710_s23 + $0x38] sm:$0xff]   ;;  %v6534_v37 = vld [vmem:[%s7710_s23 + $0x48] sm:$0xff]   ;;  %v6535_v38 = vld [vmem:[%s7710_s23 + $0x50] sm:$0xff]  }
  0x4b   : > { %v6578_v36 = vld [vmem:[%s7710_s23 + $0x1f8] sm:$0xff]   ;;  %v6537_v40 = vld [vmem:[%s7710_s23 + $0x60] sm:$0xff]   ;;  %v6538_v41 = vld [vmem:[%s7710_s23 + $0x68] sm:$0xff]  }
  0x4c   : > { %5960 = vmatpush3.bf16.msra.mxu0 %v6520_v3  ;;  %6452 = vmatpush3.bf16.msra.mxu1 %v6520_v3  ;;  %v6536_v39 = vld [vmem:[%s7710_s23 + $0x58] sm:$0xff]   ;;  %v6539_v42 = vld [vmem:[%s7710_s23 + $0x70] sm:$0xff]   ;;  %v6541_v44 = vld [vmem:[%s7710_s23 + $0x80] sm:$0xff]  }
  0x4d   : > { %5961 = vmatprep.subr.bf16.mxu0 %v6521_v5  ;;  %6445 = vmatprep.subr.bf16.mxu1 %v6521_v5  ;;  %v6540_v43 = vld [vmem:[%s7710_s23 + $0x78] sm:$0xff]   ;;  %v6542_v45 = vld [vmem:[%s7710_s23 + $0x88] sm:$0xff]   ;;  %v6543_v46 = vld [vmem:[%s7710_s23 + $0x90] sm:$0xff]  }
  0x4e   : > { %v6544_v47 = vld [vmem:[%s7710_s23 + $0x98] sm:$0xff]   ;;  %v6545_v48 = vld [vmem:[%s7710_s23 + $0xa0] sm:$0xff]   ;;  %v6546_v49 = vld [vmem:[%s7710_s23 + $0xa8] sm:$0xff]  }
  0x4f   : > { %v6547_v50 = vld [vmem:[%s7710_s23 + $0xb0] sm:$0xff]   ;;  %v6581_v51 = vld [vmem:[%s9460_s4 + $0x64] ss:$8 sps:$4 sm:$0xff]   ;;  %v6548_v52 = vld [vmem:[%s7710_s23 + $0xb8] sm:$0xff]  }
  0x50   : > { %5962 = vmatpush3.bf16.msra.mxu0 %v6521_v5  ;;  %6453 = vmatpush3.bf16.msra.mxu1 %v6521_v5  ;;  %v6579_v53 = vld [vmem:[%s9460_s4 + $0x60] ss:$8 sps:$4 sm:$0xff]   ;;  %v6584_v55 = vld [vmem:[%s9460_s4 + $0x74] ss:$8 sps:$4 sm:$0xff]   ;;  %v6582_v56 = vld [vmem:[%s9460_s4 + $0x70] ss:$8 sps:$4 sm:$0xff]  }
  0x51   : > { %5963 = vmatprep.subr.bf16.mxu0 %v6522_v6  ;;  %6446 = vmatprep.subr.bf16.mxu1 %v6522_v6  ;;  %v6554_v54 = vld [vmem:[%s7710_s23 + $0xc0] sm:$0xff]   ;;  %v6555_v57 = vld [vmem:[%s7710_s23 + $0xc8] sm:$0xff]   ;;  %v6572_v59 = vld [vmem:[%s7710_s23 + $0xd0] sm:$0xff]   ;;  %v9469_v5 = vmov 0.0  }
  0x52   : > { %v6573_v60 = vld [vmem:[%s7710_s23 + $0xd8] sm:$0xff]   ;;  %v6585_v61 = vld [vmem:[%s7710_s23 + $0xe0] sm:$0xff]   ;;  %v6586_v62 = vld [vmem:[%s7710_s23 + $0xe8] sm:$0xff]  }
  0x53   : > { %v6587_v63 = vld [vmem:[%s7710_s23 + $0xf0] sm:$0xff]   ;;  %v6588_v0 = vld [vmem:[%s7710_s23 + $0xf8] sm:$0xff]   ;;  %v6589_v1 = vld [vmem:[%s7710_s23 + $0x100] sm:$0xff]  }
  0x54   : > { %5964 = vmatpush3.bf16.msra.mxu0 %v6522_v6  ;;  %6454 = vmatpush3.bf16.msra.mxu1 %v6522_v6  ;;  %v6590_v2 = vld [vmem:[%s7710_s23 + $0x108] sm:$0xff]   ;;  %v6591_v3 = vld [vmem:[%s7710_s23 + $0x110] sm:$0xff]   ;;  %v6592_v4 = vld [vmem:[%s7710_s23 + $0x118] sm:$0xff]  }
  0x55   : > { %5965 = vmatprep.subr.bf16.mxu0 %v6523_v7  ;;  %6447 = vmatprep.subr.bf16.mxu1 %v6523_v7  ;;  %v6593_v6 = vld [vmem:[%s9461_s5] sm:$0xff]   ;;  %v6598_v11 = vld [vmem:[%s9461_s5 + $0x8] sm:$0xff]  }
  0x58   : > { %5966 = vmatpush3.bf16.msra.mxu0 %v6523_v7  ;;  %6455 = vmatpush3.bf16.msra.mxu1 %v6523_v7  ;;  %v6594_v7 = vld [vmem:[%s7710_s23 + $0x120] sm:$0xff]  }
  0x59   : > { %5967 = vmatprep.subr.bf16.mxu0 %v6524_v8  ;;  %6448 = vmatprep.subr.bf16.mxu1 %v6524_v8 }
  0x5c   : > { %5968 = vmatpush3.bf16.msra.mxu0 %v6524_v8  ;;  %6456 = vmatpush3.bf16.msra.mxu1 %v6524_v8  ;;  %v6595_v8 = vld [vmem:[%s7710_s23 + $0x128] sm:$0xff]  }
  0x5d   : > { %1858 = vmatprep.subr.bf16.mxu1 %v6553_v14  ;;  %6097 = vmatprep.subr.bf16.mxu0 %v6593_v6  ;;  %v6601_v14 = vld [vmem:[%s7710_s23 + $0x150] sm:$0xff]  }
  0x5f   : > { %5970 = vmatmul.mubr.bf16.vlgmr.msra.gmra.mrb[0].mxu0 %v6526_v9  ;;  %6082 = vmatmul.mubr.bf16.vlgmr.msra.gmra.mrb[0].mxu1 %v6550_v12  ;;  %v6596_v9 = vld [vmem:[%s7710_s23 + $0x130] sm:$0xff]   ;;  %v6599_v12 = vld [vmem:[%s7710_s23 + $0x140] sm:$0xff]  }
  0x60   : > { %5973 = vmatprep.mubr.bf16.mxu0 %v6527_v10  ;;  %1859 = vmatpush1.bf16.msra.mxu1 %v6551_v13  ;;  %v6597_v10 = vld [vmem:[%s7710_s23 + $0x138] sm:$0xff]   ;;  %v6600_v13 = vld [vmem:[%s7710_s23 + $0x148] sm:$0xff]  }
  0x61   : > { %1860 = vmatprep.subr.bf16.mxu1 %v6558_v18  ;;  %6085 = vmatprep.mubr.bf16.mxu1 %v6559_v19 }
  0x62   : > { %6098 = vmatpush3.bf16.msra.mxu0 %v6593_v6  ;;  %v6607_v6 = vld [vmem:[%s9461_s5 + $0x18] sm:$0xff]  }
  0x63   : > { %6099 = vmatprep.subr.bf16.mxu0 %v6598_v11 }
  0x64   : > { %1861 = vmatpush1.bf16.msra.mxu1 %v6556_v17  ;;  %v7856_v17 = vld [vmem:[%s9464_s8] ss:$0 sm:$0xff] }
  0x65   : > { %1862 = vmatprep.subr.bf16.mxu1 %v6563_v21 }
  0x66   : > { %6100 = vmatpush3.bf16.msra.mxu0 %v6598_v11 }
  0x67   : > { %5974 = vmatmul.mubr.bf16.gmra.mrb[4].mxu0 %v6528_v15  ;;  %6086 = vmatmul.mubr.bf16.gmra.mrb[4].mxu1 %v6560_v20  ;;  %v6602_v15 = vld [vmem:[%s7710_s23 + $0x158] sm:$0xff]  }
  0x68   : > { %5977 = vmatprep.mubr.bf16.mxu0 %v6529_v16  ;;  %1863 = vmatpush1.bf16.msra.mxu1 %v6561_v22  ;;  %v6603_v16 = vld [vmem:[%s9461_s5 + $0x10] sm:$0xff]  }
  0x69   : > { %6089 = vmatprep.mubr.bf16.mxu1 %v6567_v24  ;;  %1864 = vmatprep.subr.bf16.mxu1 %v6566_v23 }
  0x6a   : > { %6101 = vmatprep.subr.bf16.mxu0 %v6603_v16 }
  0x6b   : > { %6102 = vmatpush3.bf16.msra.mxu0 %v6603_v16 }
  0x6c   : > { %1865 = vmatpush1.bf16.msra.mxu1 %v6564_v27  ;;  %6103 = vmatprep.subr.bf16.mxu0 %v6607_v6 }
  0x6d   : > { %1866 = vmatprep.subr.bf16.mxu1 %v6571_v29 }
  0x6f   : > { %5978 = vmatmul.mubr.bf16.gmra.mrb[8].mxu0 %v6530_v25  ;;  %6090 = vmatmul.mubr.bf16.gmra.mrb[8].mxu1 %v6568_v28 }
  0x70   : > { %5981 = vmatprep.mubr.bf16.mxu0 %v6531_v26  ;;  %6093 = vmatprep.mubr.bf16.mxu1 %v6577_v31 }
  0x71   : > { %1867 = vmatpush1.bf16.msra.mxu1 %v6569_v30  ;;  %6104 = vmatpush3.bf16.msra.mxu0 %v6607_v6 }
  0x72   : > { %1868 = vmatprep.subr.bf16.mxu1 %v6576_v32 }
  0x75   : > { %1869 = vmatpush1.bf16.msra.mxu1 %v6574_v34 }
  0x76   : > { %1870 = vmatprep.subr.bf16.mxu1 %v6581_v51 }
  0x77   : > { %5982 = vmatmul.mubr.bf16.gmra.mrb[12].mxu0 %v6532_v33  ;;  %6094 = vmatmul.mubr.bf16.gmra.mrb[12].mxu1 %v6578_v36 }
  0x78   : > { %5985 = vmatprep.mubr.bf16.mxu0 %v6533_v35  ;;  %1890 = vmatprep.mubr.bf16.mxu1 %v9471_v58 }
  0x79   : > { %1871 = vmatpush1.bf16.msra.mxu1 %v6579_v53 }
  0x7a   : > { %1872 = vmatprep.subr.bf16.mxu1 %v6584_v55 }
  0x7d   : > { %1873 = vmatpush1.bf16.msra.mxu1 %v6582_v56 }
  0x7e   : > { %6261 = vmatprep.subr.bf16.mxu1 %v9469_v5 }
  0x7f   : > { %5986 = vmatmul.mubr.bf16.gmra.mrb[16].mxu0 %v6534_v37  ;;  %v6604_v37 = vld [vmem:[%s7710_s23 + $0x160] sm:$0xff]  }
  0x80   : > { %5989 = vmatprep.mubr.bf16.mxu0 %v6535_v38  ;;  %v6605_v38 = vld [vmem:[%s7710_s23 + $0x168] sm:$0xff]  }
  0x87   : > { %5990 = vmatmul.mubr.bf16.gmra.mrb[20].mxu0 %v6536_v39 }
  0x88   : > { %5993 = vmatprep.mubr.bf16.mxu0 %v6537_v40 }
  0x8f   : > { %5994 = vmatmul.mubr.bf16.gmra.mrb[24].mxu0 %v6538_v41 }
  0x90   : > { %5997 = vmatprep.mubr.bf16.mxu0 %v6539_v42 }
  0x97   : > { %5998 = vmatmul.mubr.bf16.gmra.mrb[28].mxu0 %v6540_v43 }
  0x98   : > { %6001 = vmatprep.mubr.bf16.mxu0 %v6541_v44 }
  0x9f   : > { %6002 = vmatmul.mubr.bf16.gmra.mrb[32].mxu0 %v6542_v45 }
  0xa0   : > { %6005 = vmatprep.mubr.bf16.mxu0 %v6543_v46 }
  0xa7   : > { %6006 = vmatmul.mubr.bf16.gmra.mrb[36].mxu0 %v6544_v47 }
  0xa8   : > { %6009 = vmatprep.mubr.bf16.mxu0 %v6545_v48 }
  0xaf   : > { %6010 = vmatmul.mubr.bf16.gmra.mrb[40].mxu0 %v6546_v49 }
  0xb0   : > { %6013 = vmatprep.mubr.bf16.mxu0 %v6547_v50 }
  0xb7   : > { %6014 = vmatmul.mubr.bf16.gmra.mrb[44].mxu0 %v6548_v52 }
  0xb8   : > { %6017 = vmatprep.mubr.bf16.mxu0 %v6554_v54 }
  0xbf   : > { %6018 = vmatmul.mubr.bf16.gmra.mrb[48].mxu0 %v6555_v57 }
  0xc0   : > { %6021 = vmatprep.mubr.bf16.mxu0 %v6572_v59 }
  0xc7   : > { %6022 = vmatmul.mubr.bf16.gmra.mrb[52].mxu0 %v6573_v60 }
  0xc8   : > { %6025 = vmatprep.mubr.bf16.mxu0 %v6585_v61 }
  0xcf   : > { %6026 = vmatmul.mubr.bf16.gmra.mrb[56].mxu0 %v6586_v62 }
  0xd0   : > { %6029 = vmatprep.mubr.bf16.mxu0 %v6587_v63 }
  0xd7   : > { %6030 = vmatmul.mubr.bf16.gmra.mrb[60].mxu0 %v6588_v0 }
  0xd8   : > { %6033 = vmatprep.mubr.bf16.mxu0 %v6589_v1 }
  0xdf   : > { %6034 = vmatmul.mubr.bf16.gmra.mrb[64].mxu0 %v6590_v2 }
  0xe0   : > { %6037 = vmatprep.mubr.bf16.mxu0 %v6591_v3 }
  0xe7   : > { %6038 = vmatmul.mubr.bf16.gmra.mrb[68].mxu0 %v6592_v4  ;;  %v6606_v4 = vld [vmem:[%s7710_s23 + $0x170] sm:$0xff]  }
  0xe8   : > { %6041 = vmatprep.mubr.bf16.mxu0 %v6594_v7  ;;  %v6608_v7 = vld [vmem:[%s7710_s23 + $0x178] sm:$0xff]  }
  0xef   : > { %6042 = vmatmul.mubr.bf16.gmra.mrb[72].mxu0 %v6595_v8 }
  0xf0   : > { %6045 = vmatprep.mubr.bf16.mxu0 %v6596_v9 }
  0xf7   : > { %6046 = vmatmul.mubr.bf16.gmra.mrb[76].mxu0 %v6597_v10 }
  0xf8   : > { %6049 = vmatprep.mubr.bf16.mxu0 %v6599_v12 }
  0xff   : > { %6050 = vmatmul.mubr.bf16.gmra.mrb[80].mxu0 %v6600_v13 }
 0x100   : > { %6053 = vmatprep.mubr.bf16.mxu0 %v6601_v14 }
 0x107   : > { %6054 = vmatmul.mubr.bf16.gmra.mrb[84].mxu0 %v6602_v15 }
 0x108   : > { %6057 = vmatprep.mubr.bf16.mxu0 %v6604_v37 }
 0x10f   : > { %6058 = vmatmul.mubr.bf16.gmra.mrb[88].mxu0 %v6605_v38 }
 0x110   : > { %6061 = vmatprep.mubr.bf16.mxu0 %v6606_v4 }
 0x117   : > { %6062 = vmatmul.mubr.bf16.gmra.mrb[92].mxu0 %v6608_v7 }
 0x132   : > { %v5971_v18 = vpop.f32.mrb[0].mxu0 }
 0x133   : > { %v1057_v19 = vadd.f32 %v5971_v18, %v7856_v17  ;;  %v1048_v20 = vpop.f32.mrb[1].mxu0 }
 0x134   : > { %v1049_v21 = vadd.f32 %v7856_v17, %v1048_v20  ;;  %v5972_v22 = vpop.f32.mrb[2].mxu0 }
 0x135   : > { %v1060_v23 = vadd.f32 %v5972_v22, %v7856_v17  ;;  %v1051_v24 = vpop.f32.mrb[3].mxu0  ;;  %v1561_v26 = vmax.f32 %v1057_v19, 0.0 }
 0x136   : > { %v1052_v25 = vadd.f32 %v7856_v17, %v1051_v24  ;;  %v1559_v28 = vmax.f32 %v1049_v21, 0.0 }
 0x137   : > { %v1562_v27 = vmax.f32 %v1060_v23, 0.0 }
 0x138   : > { %v1560_v29 = vmax.f32 %v1052_v25, 0.0 }
 0x139   : > { %v7862_v30 = vpack.c.bf16 %v1562_v27, %v1561_v26 }
 0x13a   : > { %v7864_v31 = vpack.c.bf16 %v1560_v29, %v1559_v28  ;;  %v5975_v32 = vpop.f32.mrb[4].mxu0 }
 0x13b   : > { %v1073_v33 = vadd.f32 %v5975_v32, %v7856_v17  ;;  %v1064_v34 = vpop.f32.mrb[5].mxu0 }
 0x13c   : > { %1891 = vmatmul.mubr.bf16.vlgmr.msra.gmra.mrb[16].mxu1 %v7864_v31  ;;  %v1065_v35 = vadd.f32 %v7856_v17, %v1064_v34  ;;  %v5976_v36 = vpop.f32.mrb[6].mxu0 }
 0x13d   : > { %v1565_v39 = vmax.f32 %v1073_v33, 0.0  ;;  %v1076_v40 = vadd.f32 %v5976_v36, %v7856_v17  ;;  %v1067_v41 = vpop.f32.mrb[7].mxu0  ;;  %1900 = vmatprep.mubr.bf16.mxu1 %v9471_v58 }
 0x13e   : > { %v1563_v42 = vmax.f32 %v1065_v35, 0.0  ;;  %v1068_v43 = vadd.f32 %v7856_v17, %v1067_v41 }
 0x13f   : > { %v1566_v44 = vmax.f32 %v1076_v40, 0.0  ;;  %v6610_v40 = vld [vmem:[%s7710_s23 + $0x188] sm:$0xff]  }
 0x140   : > { %v1564_v45 = vmax.f32 %v1068_v43, 0.0 }
 0x141   : > { %v7874_v46 = vpack.c.bf16 %v1566_v44, %v1565_v39  ;;  %v6609_v39 = vld [vmem:[%s7710_s23 + $0x180] sm:$0xff]  }
 0x142   : > { %v7876_v47 = vpack.c.bf16 %v1564_v45, %v1563_v42  ;;  %v5979_v48 = vpop.f32.mrb[8].mxu0  ;;  %6065 = vmatprep.mubr.bf16.mxu0 %v6609_v39 }
 0x143   : > { %v1089_v49 = vadd.f32 %v5979_v48, %v7856_v17  ;;  %v1080_v50 = vpop.f32.mrb[9].mxu0  ;;  %6066 = vmatmul.mubr.bf16.gmra.mrb[96].mxu0 %v6610_v40 }
 0x144   : > { %1901 = vmatmul.mubr.bf16.gmra.mrb[20].mxu1 %v7862_v30  ;;  %v1081_v51 = vadd.f32 %v7856_v17, %v1080_v50  ;;  %v5980_v52 = vpop.f32.mrb[10].mxu0 }
 0x145   : > { %1910 = vmatprep.mubr.bf16.mxu1 %v9471_v58  ;;  %v1569_v53 = vmax.f32 %v1089_v49, 0.0  ;;  %v1092_v54 = vadd.f32 %v5980_v52, %v7856_v17  ;;  %v1083_v55 = vpop.f32.mrb[11].mxu0 }
 0x146   : > { %v1567_v56 = vmax.f32 %v1081_v51, 0.0  ;;  %v1084_v57 = vadd.f32 %v7856_v17, %v1083_v55 }
 0x147   : > { %v1570_v59 = vmax.f32 %v1092_v54, 0.0 }
 0x148   : > { %v1568_v60 = vmax.f32 %v1084_v57, 0.0  ;;  %v6611_v57 = vld [vmem:[%s9461_s5 + $0x20] sm:$0xff]  }
 0x149   : > { %v7884_v61 = vpack.c.bf16 %v1570_v59, %v1569_v53  ;;  %6105 = vmatprep.subr.bf16.mxu0 %v6611_v57 }
 0x14a   : > { %v7886_v62 = vpack.c.bf16 %v1568_v60, %v1567_v56  ;;  %v5983_v63 = vpop.f32.mrb[12].mxu0  ;;  %6106 = vmatpush3.bf16.msra.mxu0 %v6611_v57 }
 0x14b   : > { %v1105_v0 = vadd.f32 %v5983_v63, %v7856_v17  ;;  %v1096_v1 = vpop.f32.mrb[13].mxu0 }
 0x14c   : > { %1911 = vmatmul.mubr.bf16.gmra.mrb[24].mxu1 %v7876_v47  ;;  %v1097_v2 = vadd.f32 %v7856_v17, %v1096_v1  ;;  %v5984_v3 = vpop.f32.mrb[14].mxu0 }
 0x14d   : > { %1920 = vmatprep.mubr.bf16.mxu1 %v9471_v58  ;;  %v1573_v8 = vmax.f32 %v1105_v0, 0.0  ;;  %v1108_v9 = vadd.f32 %v5984_v3, %v7856_v17  ;;  %v1099_v10 = vpop.f32.mrb[15].mxu0  ;;  %v6083_v0 = vpop.f32.mrb[0].mxu1 }
 0x14e   : > { %v1571_v11 = vmax.f32 %v1097_v2, 0.0  ;;  %v1100_v12 = vadd.f32 %v7856_v17, %v1099_v10 }
 0x14f   : > { %v1574_v13 = vmax.f32 %v1108_v9, 0.0 }
 0x150   : > { %v1572_v14 = vmax.f32 %v1100_v12, 0.0 }
 0x151   : > { %v7899_v15 = vpack.c.bf16 %v1574_v13, %v1573_v8  ;;  %v1496_v13 = vpop.f32.mrb[1].mxu1 }
 0x152   : > { %v7901_v16 = vpack.c.bf16 %v1572_v14, %v1571_v11  ;;  %v5987_v18 = vpop.f32.mrb[16].mxu0  ;;  %v6612_v14 = vld [vmem:[%s7710_s23 + $0x190] sm:$0xff]  }
 0x153   : > { %v1121_v19 = vadd.f32 %v5987_v18, %v7856_v17  ;;  %v1112_v20 = vpop.f32.mrb[17].mxu0  ;;  %v6613_v18 = vld [vmem:[%s7710_s23 + $0x198] sm:$0xff]   ;;  %6069 = vmatprep.mubr.bf16.mxu0 %v6612_v14 }
 0x154   : > { %1921 = vmatmul.mubr.bf16.gmra.mrb[28].mxu1 %v7874_v46  ;;  %v1113_v21 = vadd.f32 %v7856_v17, %v1112_v20  ;;  %v5988_v22 = vpop.f32.mrb[18].mxu0  ;;  %6070 = vmatmul.mubr.bf16.gmra.mrb[100].mxu0 %v6613_v18 }
 0x155   : > { %1930 = vmatprep.mubr.bf16.mxu1 %v9471_v58  ;;  %v1577_v23 = vmax.f32 %v1121_v19, 0.0  ;;  %v1124_v24 = vadd.f32 %v5988_v22, %v7856_v17  ;;  %v1115_v25 = vpop.f32.mrb[19].mxu0  ;;  %v6084_v22 = vpop.f32.mrb[2].mxu1 }
 0x156   : > { %v1575_v26 = vmax.f32 %v1113_v21, 0.0  ;;  %v1116_v27 = vadd.f32 %v7856_v17, %v1115_v25  ;;  %v1497_v25 = vadd.f32 %v7856_v17, %v1496_v13 }
 0x157   : > { %v1578_v28 = vmax.f32 %v1124_v24, 0.0 }
 0x158   : > { %v1576_v29 = vmax.f32 %v1116_v27, 0.0  ;;  %v1671_v40 = vmax.f32 %v1497_v25, 0.0 }
 0x159   : > { %v7909_v32 = vpack.c.bf16 %v1578_v28, %v1577_v23  ;;  %v1505_v28 = vadd.f32 %v6083_v0, %v7856_v17 }
 0x15a   : > { %v7911_v33 = vpack.c.bf16 %v1576_v29, %v1575_v26  ;;  %v5991_v34 = vpop.f32.mrb[20].mxu0  ;;  %v1499_v26 = vpop.f32.mrb[3].mxu1  ;;  %v1508_v29 = vadd.f32 %v6084_v22, %v7856_v17 }
 0x15b   : > { %v1137_v35 = vadd.f32 %v5991_v34, %v7856_v17  ;;  %v1128_v36 = vpop.f32.mrb[21].mxu0  ;;  %v1500_v34 = vadd.f32 %v7856_v17, %v1499_v26 }
 0x15c   : > { %1931 = vmatmul.mubr.bf16.gmra.mrb[32].mxu1 %v7886_v62  ;;  %v1129_v37 = vadd.f32 %v7856_v17, %v1128_v36  ;;  %v5992_v38 = vpop.f32.mrb[22].mxu0 }
 0x15d   : > { %1940 = vmatprep.mubr.bf16.mxu1 %v9471_v58  ;;  %6262 = vmatpush3.bf16.msra.mxu1 %v7911_v33  ;;  %v1581_v41 = vmax.f32 %v1137_v35, 0.0  ;;  %v1140_v42 = vadd.f32 %v5992_v38, %v7856_v17  ;;  %v1131_v43 = vpop.f32.mrb[23].mxu0  ;;  %v6087_v35 = vpop.f32.mrb[4].mxu1 }
 0x15e   : > { %6263 = vmatprep.subr.bf16.mxu1 %v9469_v5  ;;  %v1579_v44 = vmax.f32 %v1129_v37, 0.0  ;;  %v1132_v45 = vadd.f32 %v7856_v17, %v1131_v43 }
 0x15f   : > { %v1582_v48 = vmax.f32 %v1140_v42, 0.0 }
 0x160   : > { %v1580_v49 = vmax.f32 %v1132_v45, 0.0  ;;  %v1674_v45 = vmax.f32 %v1508_v29, 0.0 }
 0x161   : > { %6264 = vmatpush3.bf16.msra.mxu1 %v7909_v32  ;;  %v7924_v50 = vpack.c.bf16 %v1582_v48, %v1581_v41  ;;  %v1672_v41 = vmax.f32 %v1500_v34, 0.0 }
 0x162   : > { %v7926_v51 = vpack.c.bf16 %v1580_v49, %v1579_v44  ;;  %6265 = vmatprep.subr.bf16.mxu1 %v9469_v5  ;;  %v5995_v52 = vpop.f32.mrb[24].mxu0  ;;  %v1673_v44 = vmax.f32 %v1505_v28, 0.0  ;;  %v6615_v28 = vld [vmem:[%s7710_s23 + $0x1a8] sm:$0xff]  }
 0x163   : > { %v1153_v53 = vadd.f32 %v5995_v52, %v7856_v17  ;;  %v1144_v54 = vpop.f32.mrb[25].mxu0  ;;  %v1512_v52 = vpop.f32.mrb[5].mxu1 }
 0x164   : > { %1941 = vmatmul.mubr.bf16.gmra.mrb[36].mxu1 %v7884_v61  ;;  %v1145_v55 = vadd.f32 %v7856_v17, %v1144_v54  ;;  %v5996_v56 = vpop.f32.mrb[26].mxu0  ;;  %v6088_v57 = vpop.f32.mrb[6].mxu1 }
 0x165   : > { %1950 = vmatprep.mubr.bf16.mxu1 %v9471_v58  ;;  %6266 = vmatpush3.bf16.msra.mxu1 %v7926_v51  ;;  %v1585_v59 = vmax.f32 %v1153_v53, 0.0  ;;  %v1156_v60 = vadd.f32 %v5996_v56, %v7856_v17  ;;  %v1147_v63 = vpop.f32.mrb[27].mxu0  ;;  %v1521_v56 = vadd.f32 %v6087_v35, %v7856_v17  ;;  %v1515_v0 = vpop.f32.mrb[7].mxu1 }
 0x166   : > { %6267 = vmatprep.subr.bf16.mxu1 %v9469_v5  ;;  %v1583_v1 = vmax.f32 %v1145_v55, 0.0  ;;  %v1148_v2 = vadd.f32 %v7856_v17, %v1147_v63  ;;  %v1513_v63 = vadd.f32 %v7856_v17, %v1512_v52 }
 0x167   : > { %v1586_v3 = vmax.f32 %v1156_v60, 0.0  ;;  %v1677_v22 = vmax.f32 %v1521_v56, 0.0 }
 0x168   : > { %v1584_v4 = vmax.f32 %v1148_v2, 0.0  ;;  %v1675_v18 = vmax.f32 %v1513_v63, 0.0 }
 0x169   : > { %6268 = vmatpush3.bf16.msra.mxu1 %v7924_v50  ;;  %v7941_v6 = vpack.c.bf16 %v1586_v3, %v1585_v59  ;;  %v1524_v3 = vadd.f32 %v6088_v57, %v7856_v17 }
 0x16a   : > { %v7943_v7 = vpack.c.bf16 %v1584_v4, %v1583_v1  ;;  %6269 = vmatprep.subr.bf16.mxu1 %v9469_v5  ;;  %v5999_v8 = vpop.f32.mrb[28].mxu0  ;;  %v7976_v1 = vpack.c.bf16 %v1672_v41, %v1671_v40  ;;  %v1516_v4 = vadd.f32 %v7856_v17, %v1515_v0 }
 0x16b   : > { %v1169_v9 = vadd.f32 %v5999_v8, %v7856_v17  ;;  %v1160_v10 = vpop.f32.mrb[29].mxu0  ;;  %v6091_v8 = vpop.f32.mrb[8].mxu1 }
 0x16c   : > { %1951 = vmatmul.mubr.bf16.gmra.mrb[40].mxu1 %v7901_v16  ;;  %v1161_v11 = vadd.f32 %v7856_v17, %v1160_v10  ;;  %v6000_v12 = vpop.f32.mrb[30].mxu0  ;;  %9525 = vst [vmem:[#allocation9_spill] sm:$0xff] %v7976_v1  ;;  %v1528_v26 = vpop.f32.mrb[9].mxu1 }
 0x16d   : > { %1960 = vmatprep.mubr.bf16.mxu1 %v9471_v58  ;;  %6270 = vmatpush3.bf16.msra.mxu1 %v7943_v7  ;;  %v1589_v19 = vmax.f32 %v1169_v9, 0.0  ;;  %v1172_v20 = vadd.f32 %v6000_v12, %v7856_v17  ;;  %v1163_v21 = vpop.f32.mrb[31].mxu0  ;;  %v7980_v9 = vpack.c.bf16 %v1674_v45, %v1673_v44  ;;  %v1537_v12 = vadd.f32 %v6091_v8, %v7856_v17  ;;  %v6092_v40 = vpop.f32.mrb[10].mxu1 }
 0x16e   : > { %6271 = vmatprep.subr.bf16.mxu1 %v9469_v5  ;;  %v1587_v23 = vmax.f32 %v1161_v11, 0.0  ;;  %v1164_v24 = vadd.f32 %v7856_v17, %v1163_v21 }
 0x16f   : > { %v1590_v27 = vmax.f32 %v1172_v20, 0.0  ;;  %9526 = vst [vmem:[#allocation10_spill] sm:$0xff] %v7980_v9 }
 0x170   : > { %v1588_v36 = vmax.f32 %v1164_v24, 0.0 }
 0x171   : > { %6272 = vmatpush3.bf16.msra.mxu1 %v7941_v6  ;;  %v7961_v37 = vpack.c.bf16 %v1590_v27, %v1589_v19  ;;  %v1676_v19 = vmax.f32 %v1516_v4, 0.0  ;;  %v6614_v27 = vld [vmem:[%s7710_s23 + $0x1a0] sm:$0xff]  }
 0x172   : > { %v7963_v38 = vpack.c.bf16 %v1588_v36, %v1587_v23  ;;  %6273 = vmatprep.subr.bf16.mxu1 %v9469_v5  ;;  %v6003_v39 = vpop.f32.mrb[32].mxu0  ;;  %v1678_v23 = vmax.f32 %v1524_v3, 0.0  ;;  %v1681_v36 = vmax.f32 %v1537_v12, 0.0  ;;  %6073 = vmatprep.mubr.bf16.mxu0 %v6614_v27 }
 0x173   : > { %v1185_v42 = vadd.f32 %v6003_v39, %v7856_v17  ;;  %v1176_v43 = vpop.f32.mrb[33].mxu0  ;;  %v1529_v39 = vadd.f32 %v7856_v17, %v1528_v26  ;;  %v7999_v44 = vpack.c.bf16 %v1676_v19, %v1675_v18  ;;  %6074 = vmatmul.mubr.bf16.gmra.mrb[104].mxu0 %v6615_v28 }
 0x174   : > { %1961 = vmatmul.mubr.bf16.gmra.mrb[44].mxu1 %v7899_v15  ;;  %v1177_v48 = vadd.f32 %v7856_v17, %v1176_v43  ;;  %v6004_v49 = vpop.f32.mrb[34].mxu0  ;;  %v1531_v43 = vpop.f32.mrb[11].mxu1 }
 0x175   : > { %1970 = vmatprep.mubr.bf16.mxu1 %v9471_v58  ;;  %6274 = vmatpush3.bf16.msra.mxu1 %v7963_v38  ;;  %v1593_v53 = vmax.f32 %v1185_v42, 0.0  ;;  %v1188_v54 = vadd.f32 %v6004_v49, %v7856_v17  ;;  %v1179_v55 = vpop.f32.mrb[35].mxu0  ;;  %9528 = vst [vmem:[#allocation12_spill] sm:$0xff] %v7999_v44  ;;  %v1532_v49 = vadd.f32 %v7856_v17, %v1531_v43  ;;  %v6095_v52 = vpop.f32.mrb[12].mxu1 }
 0x176   : > { %6275 = vmatprep.subr.bf16.mxu1 %v9469_v5  ;;  %v1591_v59 = vmax.f32 %v1177_v48, 0.0  ;;  %v1180_v60 = vadd.f32 %v7856_v17, %v1179_v55  ;;  %v1679_v48 = vmax.f32 %v1529_v39, 0.0  ;;  %v1553_v0 = vadd.f32 %v6095_v52, %v7856_v17  ;;  %v1544_v12 = vpop.f32.mrb[13].mxu1  ;;  %v6617_v52 = vld [vmem:[%s7710_s23 + $0x1b0] sm:$0xff]  }
 0x177   : > { %v1594_v2 = vmax.f32 %v1188_v54, 0.0  ;;  %v1680_v57 = vmax.f32 %v1532_v49, 0.0  ;;  %6077 = vmatprep.mubr.bf16.mxu0 %v6617_v52 }
 0x178   : > { %v1592_v10 = vmax.f32 %v1180_v60, 0.0 }
 0x179   : > { %6276 = vmatpush3.bf16.msra.mxu1 %v7961_v37  ;;  %v7983_v11 = vpack.c.bf16 %v1594_v2, %v1593_v53  ;;  %v8002_v53 = vpack.c.bf16 %v1678_v23, %v1677_v22  ;;  %v8012_v4 = vpack.c.bf16 %v1680_v57, %v1679_v48  ;;  %v6096_v22 = vpop.f32.mrb[14].mxu1 }
 0x17a   : > { %v7986_v13 = vpack.c.bf16 %v1592_v10, %v1591_v59  ;;  %v6007_v14 = vpop.f32.mrb[36].mxu0  ;;  %6301 = vmatprep.subr.bf16.mxu1 %v9469_v5  ;;  %v1547_v26 = vpop.f32.mrb[15].mxu1 }
 0x17b   : > { %9527 = vst [vmem:[#allocation11_spill] sm:$0xff] %v7983_v11  ;;  %v1201_v20 = vadd.f32 %v6007_v14, %v7856_v17  ;;  %v1192_v21 = vpop.f32.mrb[37].mxu0  ;;  %9529 = vst [vmem:[#allocation13_spill] sm:$0xff] %v8002_v53  ;;  %v6616_v14 = vld [vmem:[%s9461_s5 + $0x28] sm:$0xff]  }
 0x17c   : > { %1971 = vmatmul.mubr.bf16.gmra.mrb[48].mxu1 %v7911_v33  ;;  %v1193_v24 = vadd.f32 %v7856_v17, %v1192_v21  ;;  %v6008_v25 = vpop.f32.mrb[38].mxu0  ;;  %v1540_v33 = vadd.f32 %v6092_v40, %v7856_v17  ;;  %9533 = vst [vmem:[#allocation17_spill] sm:$0xff] %v8012_v4  ;;  %v1545_v21 = vadd.f32 %v7856_v17, %v1544_v12 }
 0x17d   : > { %1980 = vmatprep.mubr.bf16.mxu1 %v9471_v58  ;;  %v1597_v29 = vmax.f32 %v1201_v20, 0.0  ;;  %v1204_v34 = vadd.f32 %v6008_v25, %v7856_v17  ;;  %v1195_v35 = vpop.f32.mrb[39].mxu0  ;;  %v1556_v25 = vadd.f32 %v6096_v22, %v7856_v17  ;;  %6107 = vmatprep.subr.bf16.mxu0 %v6616_v14 }
 0x17e   : > { %v1595_v41 = vmax.f32 %v1193_v24, 0.0  ;;  %v1196_v42 = vadd.f32 %v7856_v17, %v1195_v35  ;;  %v1682_v55 = vmax.f32 %v1540_v33, 0.0  ;;  %v1685_v24 = vmax.f32 %v1553_v0, 0.0  ;;  %6108 = vmatpush3.bf16.msra.mxu0 %v6616_v14 }
 0x17f   : > { %v1598_v45 = vmax.f32 %v1204_v34, 0.0  ;;  %v1683_v28 = vmax.f32 %v1545_v21, 0.0  ;;  %v1686_v35 = vmax.f32 %v1556_v25, 0.0 }
 0x180   : > { %v1596_v54 = vmax.f32 %v1196_v42, 0.0  ;;  %v8008_v63 = vpack.c.bf16 %v1682_v55, %v1681_v36 }
 0x181   : > { %v8004_v56 = vpack.c.bf16 %v1598_v45, %v1597_v29  ;;  %v1548_v29 = vadd.f32 %v7856_v17, %v1547_v26  ;;  %v8029_v42 = vpack.c.bf16 %v1686_v35, %v1685_v24 }
 0x182   : > { %v8006_v59 = vpack.c.bf16 %v1596_v54, %v1595_v41  ;;  %v6011_v60 = vpop.f32.mrb[40].mxu0  ;;  %9532 = vst [vmem:[#allocation16_spill] sm:$0xff] %v8008_v63  ;;  %v6618_v54 = vld [vmem:[%s7710_s23 + $0x1b8] sm:$0xff]   ;;  %s8327_s23 = scalar_lea.vmem %s9568_s0, %s9626_s28  ;;  %s9079_s28 = scalar_lea.vmem [#allocation5], %s5438_s27 }
 0x183   : > { %9530 = vst [vmem:[#allocation14_spill] sm:$0xff] %v8004_v56  ;;  %v1217_v2 = vadd.f32 %v6011_v60, %v7856_v17  ;;  %v1208_v3 = vpop.f32.mrb[41].mxu0  ;;  %v1684_v39 = vmax.f32 %v1548_v29, 0.0  ;;  %9536 = vst [vmem:[#allocation20_spill] sm:$0xff] %v8029_v42  ;;  %6078 = vmatmul.mubr.bf16.gmra.mrb[108].mxu0 %v6618_v54  ;;  %s5311_s30 = sshll.u32 %s9079_s28, 4  ;;  %s9399_s27 = scalar_lea.hbm %s9466_s10, %s5718_s11  ;;  %s9401_s30 = int_to_ptr.vmem [resolvable:$true] %s5311_s30 }
 0x184   : > { %9531 = vst [vmem:[#allocation15_spill] sm:$0xff] %v8006_v59  ;;  %1981 = vmatmul.mubr.bf16.gmra.mrb[52].mxu1 %v7909_v32  ;;  %v1209_v8 = vadd.f32 %v7856_v17, %v1208_v3  ;;  %v6012_v10 = vpop.f32.mrb[42].mxu0  ;;  %s7470_s20 = scalar_lea.vmem %s9401_s30, 256 }
 0x185   : > { %1990 = vmatprep.mubr.bf16.mxu1 %v9471_v58  ;;  %v1601_v18 = vmax.f32 %v1217_v2, 0.0  ;;  %v1220_v19 = vadd.f32 %v6012_v10, %v7856_v17  ;;  %v1211_v20 = vpop.f32.mrb[43].mxu0  ;;  %v8032_v45 = vpack.c.bf16 %v1684_v39, %v1683_v28  ;;  %p7471_p12 = scmp.ne.s32.totalorder %s9401_s30, %s7470_s20 }
 0x186   : > { %v1599_v23 = vmax.f32 %v1209_v8, 0.0  ;;  %v1212_v32 = vadd.f32 %v7856_v17, %v1211_v20 }
 0x187   : > { %v1602_v27 = vmax.f32 %v1220_v19, 0.0  ;;  %9537 = vst [vmem:[#allocation21_spill] sm:$0xff] %v8032_v45  ;;  %p7472_p8 = pnand %p7471_p12, %p9616_p13 }
 0x188   : > { %v1600_v34 = vmax.f32 %v1212_v32, 0.0 }
 0x189   : > { %v8025_v36 = vpack.c.bf16 %v1602_v27, %v1601_v18  ;;  %p7473_p10 = pneg %p7472_p8 }
 0x18a   : > { %v8027_v40 = vpack.c.bf16 %v1600_v34, %v1599_v23  ;;  %v6015_v41 = vpop.f32.mrb[44].mxu0 }
 0x18b   : > { %9534 = vst [vmem:[#allocation18_spill] sm:$0xff] %v8025_v36  ;;  %v1233_v33 = vadd.f32 %v6015_v41, %v7856_v17  ;;  %v1224_v43 = vpop.f32.mrb[45].mxu0 }
 0x18c   : > { %9535 = vst [vmem:[#allocation19_spill] sm:$0xff] %v8027_v40  ;;  %1991 = vmatmul.mubr.bf16.gmra.mrb[56].mxu1 %v7926_v51  ;;  %v1225_v48 = vadd.f32 %v7856_v17, %v1224_v43  ;;  %v6016_v49 = vpop.f32.mrb[46].mxu0 }
 0x18d   : > { %2000 = vmatprep.mubr.bf16.mxu1 %v9471_v58  ;;  %v1605_v55 = vmax.f32 %v1233_v33, 0.0  ;;  %v1236_v57 = vadd.f32 %v6016_v49, %v7856_v17  ;;  %v1227_v60 = vpop.f32.mrb[47].mxu0 }
 0x18e   : > { %v1603_v0 = vmax.f32 %v1225_v48, 0.0  ;;  %v1228_v2 = vadd.f32 %v7856_v17, %v1227_v60 }
 0x18f   : > { %v1606_v3 = vmax.f32 %v1236_v57, 0.0 }
 0x190   : > { %v1604_v8 = vmax.f32 %v1228_v2, 0.0 }
 0x191   : > { %v8041_v10 = vpack.c.bf16 %v1606_v3, %v1605_v55 }
 0x192   : > { %v8043_v51 = vpack.c.bf16 %v1604_v8, %v1603_v0  ;;  %v6019_v12 = vpop.f32.mrb[48].mxu0 }
 0x193   : > { %9538 = vst [vmem:[#allocation22_spill] sm:$0xff] %v8041_v10  ;;  %v1249_v14 = vadd.f32 %v6019_v12, %v7856_v17  ;;  %v1240_v18 = vpop.f32.mrb[49].mxu0 }
 0x194   : > { %9539 = vst [vmem:[#allocation23_spill] sm:$0xff] %v8043_v51  ;;  %2001 = vmatmul.mubr.bf16.gmra.mrb[60].mxu1 %v7924_v50  ;;  %v1241_v19 = vadd.f32 %v7856_v17, %v1240_v18  ;;  %v6020_v20 = vpop.f32.mrb[50].mxu0 }
 0x195   : > { %2010 = vmatprep.mubr.bf16.mxu1 %v9471_v58  ;;  %v1609_v21 = vmax.f32 %v1249_v14, 0.0  ;;  %v1252_v22 = vadd.f32 %v6020_v20, %v7856_v17  ;;  %v1243_v23 = vpop.f32.mrb[51].mxu0 }
 0x196   : > { %v1607_v32 = vmax.f32 %v1241_v19, 0.0  ;;  %v1244_v24 = vadd.f32 %v7856_v17, %v1243_v23 }
 0x197   : > { %v1610_v25 = vmax.f32 %v1252_v22, 0.0 }
 0x198   : > { %v1608_v26 = vmax.f32 %v1244_v24, 0.0 }
 0x199   : > { %v8051_v27 = vpack.c.bf16 %v1610_v25, %v1609_v21 }
 0x19a   : > { %v8053_v28 = vpack.c.bf16 %v1608_v26, %v1607_v32  ;;  %v6023_v29 = vpop.f32.mrb[52].mxu0 }
 0x19b   : > { %9540 = vst [vmem:[#allocation24_spill] sm:$0xff] %v8051_v27  ;;  %v1265_v50 = vadd.f32 %v6023_v29, %v7856_v17  ;;  %v1256_v34 = vpop.f32.mrb[53].mxu0 }
 0x19c   : > { %9541 = vst [vmem:[#allocation25_spill] sm:$0xff] %v8053_v28  ;;  %2011 = vmatmul.mubr.bf16.gmra.mrb[64].mxu1 %v7943_v7  ;;  %v1257_v35 = vadd.f32 %v7856_v17, %v1256_v34  ;;  %v6024_v39 = vpop.f32.mrb[54].mxu0 }
 0x19d   : > { %2020 = vmatprep.mubr.bf16.mxu1 %v9471_v58  ;;  %v1613_v41 = vmax.f32 %v1265_v50, 0.0  ;;  %v1268_v33 = vadd.f32 %v6024_v39, %v7856_v17  ;;  %v1259_v43 = vpop.f32.mrb[55].mxu0 }
 0x19e   : > { %v1611_v48 = vmax.f32 %v1257_v35, 0.0  ;;  %v1260_v49 = vadd.f32 %v7856_v17, %v1259_v43 }
 0x19f   : > { %v1614_v52 = vmax.f32 %v1268_v33, 0.0  ;;  %v6619_v33 = vld [vmem:[%s9461_s5 + $0x30] sm:$0xff]  }
 0x1a0   : > { %v1612_v54 = vmax.f32 %v1260_v49, 0.0  ;;  %6109 = vmatprep.subr.bf16.mxu0 %v6619_v33 }
 0x1a1   : > { %v8061_v55 = vpack.c.bf16 %v1614_v52, %v1613_v41  ;;  %6110 = vmatpush3.bf16.msra.mxu0 %v6619_v33 }
 0x1a2   : > { %v8063_v57 = vpack.c.bf16 %v1612_v54, %v1611_v48  ;;  %v6027_v60 = vpop.f32.mrb[56].mxu0 }
 0x1a3   : > { %9542 = vst [vmem:[#allocation26_spill] sm:$0xff] %v8061_v55  ;;  %v1281_v7 = vadd.f32 %v6027_v60, %v7856_v17  ;;  %v1272_v0 = vpop.f32.mrb[57].mxu0  ;;  %v6620_v60 = vld [vmem:[%s9461_s5 + $0x38] sm:$0xff]  }
 0x1a4   : > { %9543 = vst [vmem:[#allocation27_spill] sm:$0xff] %v8063_v57  ;;  %2021 = vmatmul.mubr.bf16.gmra.mrb[68].mxu1 %v7941_v6  ;;  %v1273_v2 = vadd.f32 %v7856_v17, %v1272_v0  ;;  %v6028_v3 = vpop.f32.mrb[58].mxu0  ;;  %6111 = vmatprep.subr.bf16.mxu0 %v6620_v60 }
 0x1a5   : > { %2030 = vmatprep.mubr.bf16.mxu1 %v9471_v58  ;;  %v1617_v8 = vmax.f32 %v1281_v7, 0.0  ;;  %v1284_v12 = vadd.f32 %v6028_v3, %v7856_v17  ;;  %v1275_v14 = vpop.f32.mrb[59].mxu0  ;;  %6112 = vmatpush3.bf16.msra.mxu0 %v6620_v60 }
 0x1a6   : > { %v1615_v18 = vmax.f32 %v1273_v2, 0.0  ;;  %v1276_v19 = vadd.f32 %v7856_v17, %v1275_v14  ;;  %6241 = vmatprep.subr.bf16.mxu0 %v9469_v5 }
 0x1a7   : > { %v1618_v20 = vmax.f32 %v1284_v12, 0.0 }
 0x1a8   : > { %v1616_v21 = vmax.f32 %v1276_v19, 0.0 }
 0x1a9   : > { %v8071_v22 = vpack.c.bf16 %v1618_v20, %v1617_v8 }
 0x1aa   : > { %v8073_v23 = vpack.c.bf16 %v1616_v21, %v1615_v18  ;;  %v6031_v32 = vpop.f32.mrb[60].mxu0 }
 0x1ab   : > { %9544 = vst [vmem:[#allocation28_spill] sm:$0xff] %v8071_v22  ;;  %v1288_v6 = vpop.f32.mrb[61].mxu0  ;;  %v1297_v34 = vadd.f32 %v6031_v32, %v7856_v17 }
 0x1ac   : > { %9545 = vst [vmem:[#allocation29_spill] sm:$0xff] %v8073_v23  ;;  %2031 = vmatmul.mubr.bf16.gmra.mrb[72].mxu1 %v7963_v38  ;;  %v1289_v24 = vadd.f32 %v7856_v17, %v1288_v6  ;;  %v6032_v25 = vpop.f32.mrb[62].mxu0 }
 0x1ad   : > { %2040 = vmatprep.mubr.bf16.mxu1 %v9471_v58  ;;  %v1291_v26 = vpop.f32.mrb[63].mxu0  ;;  %v1300_v35 = vadd.f32 %v6032_v25, %v7856_v17  ;;  %v1621_v41 = vmax.f32 %v1297_v34, 0.0 }
 0x1ae   : > { %v1619_v29 = vmax.f32 %v1289_v24, 0.0  ;;  %v1292_v50 = vadd.f32 %v7856_v17, %v1291_v26 }
 0x1af   : > { %v1622_v38 = vmax.f32 %v1300_v35, 0.0 }
 0x1b0   : > { %v1620_v39 = vmax.f32 %v1292_v50, 0.0 }
 0x1b1   : > { %v8087_v48 = vpack.c.bf16 %v1622_v38, %v1621_v41 }
 0x1b2   : > { %v8084_v43 = vpack.c.bf16 %v1620_v39, %v1619_v29  ;;  %v6035_v49 = vpop.f32.mrb[64].mxu0 }
 0x1b3   : > { %9547 = vst [vmem:[#allocation31_spill] sm:$0xff] %v8087_v48  ;;  %v1304_v52 = vpop.f32.mrb[65].mxu0  ;;  %v1313_v12 = vadd.f32 %v6035_v49, %v7856_v17 }
 0x1b4   : > { %9546 = vst [vmem:[#allocation30_spill] sm:$0xff] %v8084_v43  ;;  %2041 = vmatmul.mubr.bf16.gmra.mrb[76].mxu1 %v7961_v37  ;;  %v6036_v54 = vpop.f32.mrb[66].mxu0  ;;  %v1305_v0 = vadd.f32 %v7856_v17, %v1304_v52 }
 0x1b5   : > { %2050 = vmatprep.mubr.bf16.mxu1 %v9471_v58  ;;  %v1307_v7 = vpop.f32.mrb[67].mxu0  ;;  %v1316_v14 = vadd.f32 %v6036_v54, %v7856_v17  ;;  %v1625_v18 = vmax.f32 %v1313_v12, 0.0 }
 0x1b6   : > { %v1308_v2 = vadd.f32 %v7856_v17, %v1307_v7  ;;  %v1623_v37 = vmax.f32 %v1305_v0, 0.0 }
 0x1b7   : > { %v1626_v19 = vmax.f32 %v1316_v14, 0.0 }
 0x1b8   : > { %v1624_v3 = vmax.f32 %v1308_v2, 0.0 }
 0x1b9   : > { %v8103_v20 = vpack.c.bf16 %v1626_v19, %v1625_v18 }
 0x1ba   : > { %v8097_v8 = vpack.c.bf16 %v1624_v3, %v1623_v37  ;;  %v6039_v21 = vpop.f32.mrb[68].mxu0 }
 0x1bb   : > { %v1320_v32 = vpop.f32.mrb[69].mxu0  ;;  %v1329_v35 = vadd.f32 %v6039_v21, %v7856_v17 }
 0x1bc   : > { %2051 = vmatmul.mubr.bf16.gmra.mrb[80].mxu1 %v7986_v13  ;;  %v6040_v6 = vpop.f32.mrb[70].mxu0  ;;  %v1321_v25 = vadd.f32 %v7856_v17, %v1320_v32 }
 0x1bd   : > { %2060 = vmatprep.mubr.bf16.mxu1 %v9471_v58  ;;  %v1323_v24 = vpop.f32.mrb[71].mxu0  ;;  %v1332_v39 = vadd.f32 %v6040_v6, %v7856_v17  ;;  %v1629_v41 = vmax.f32 %v1329_v35, 0.0 }
 0x1be   : > { %v1324_v26 = vadd.f32 %v7856_v17, %v1323_v24  ;;  %v1627_v29 = vmax.f32 %v1321_v25, 0.0 }
 0x1bf   : > { %v1630_v33 = vmax.f32 %v1332_v39, 0.0 }
 0x1c0   : > { %v1628_v50 = vmax.f32 %v1324_v26, 0.0 }
 0x1c1   : > { %v8115_v38 = vpack.c.bf16 %v1630_v33, %v1629_v41 }
 0x1c2   : > { %v8109_v34 = vpack.c.bf16 %v1628_v50, %v1627_v29  ;;  %v6043_v49 = vpop.f32.mrb[72].mxu0 }
 0x1c3   : > { %v1336_v52 = vpop.f32.mrb[73].mxu0  ;;  %v1345_v12 = vadd.f32 %v6043_v49, %v7856_v17 }
 0x1c4   : > { %2061 = vmatmul.mubr.bf16.gmra.mrb[84].mxu1 %v7983_v11  ;;  %v6044_v54 = vpop.f32.mrb[74].mxu0  ;;  %v1337_v7 = vadd.f32 %v7856_v17, %v1336_v52 }
 0x1c5   : > { %2070 = vmatprep.mubr.bf16.mxu1 %v9471_v58  ;;  %v1339_v60 = vpop.f32.mrb[75].mxu0  ;;  %v1348_v14 = vadd.f32 %v6044_v54, %v7856_v17  ;;  %v1633_v18 = vmax.f32 %v1345_v12, 0.0 }
 0x1c6   : > { %v1340_v0 = vadd.f32 %v7856_v17, %v1339_v60  ;;  %v1631_v2 = vmax.f32 %v1337_v7, 0.0 }
 0x1c7   : > { %v1634_v19 = vmax.f32 %v1348_v14, 0.0 }
 0x1c8   : > { %v1632_v37 = vmax.f32 %v1340_v0, 0.0 }
 0x1c9   : > { %v8127_v21 = vpack.c.bf16 %v1634_v19, %v1633_v18 }
 0x1ca   : > { %v8121_v3 = vpack.c.bf16 %v1632_v37, %v1631_v2  ;;  %v6047_v32 = vpop.f32.mrb[76].mxu0 }
 0x1cb   : > { %9549 = vst [vmem:[#allocation33_spill] sm:$0xff] %v8127_v21  ;;  %v1352_v6 = vpop.f32.mrb[77].mxu0  ;;  %v1361_v41 = vadd.f32 %v6047_v32, %v7856_v17 }
 0x1cc   : > { %2071 = vmatmul.mubr.bf16.gmra.mrb[88].mxu1 %v8006_v59  ;;  %9548 = vst [vmem:[#allocation32_spill] sm:$0xff] %v8121_v3  ;;  %v6048_v24 = vpop.f32.mrb[78].mxu0  ;;  %v1353_v26 = vadd.f32 %v7856_v17, %v1352_v6 }
 0x1cd   : > { %2080 = vmatprep.mubr.bf16.mxu1 %v9471_v58  ;;  %v1355_v25 = vpop.f32.mrb[79].mxu0  ;;  %v1364_v33 = vadd.f32 %v6048_v24, %v7856_v17  ;;  %v1637_v49 = vmax.f32 %v1361_v41, 0.0  ;;  %v9468_v24 = vlaneseq }
 0x1ce   : > { %v1356_v29 = vadd.f32 %v7856_v17, %v1355_v25  ;;  %v1635_v50 = vmax.f32 %v1353_v26, 0.0 }
 0x1cf   : > { %v1638_v52 = vmax.f32 %v1364_v33, 0.0 }
 0x1d0   : > { %v1636_v35 = vmax.f32 %v1356_v29, 0.0 }
 0x1d1   : > { %v8139_v54 = vpack.c.bf16 %v1638_v52, %v1637_v49 }
 0x1d2   : > { %v8133_v39 = vpack.c.bf16 %v1636_v35, %v1635_v50  ;;  %v6051_v60 = vpop.f32.mrb[80].mxu0  ;;  %v1769_v35 = vshrl.u32 %v9468_v24, 7 }
 0x1d3   : > { %9551 = vst [vmem:[#allocation35_spill] sm:$0xff] %v8139_v54  ;;  %v1368_v7 = vpop.f32.mrb[81].mxu0  ;;  %v1377_v32 = vadd.f32 %v6051_v60, %v7856_v17 }
 0x1d4   : > { %2081 = vmatmul.mubr.bf16.gmra.mrb[92].mxu1 %v8004_v56  ;;  %9550 = vst [vmem:[#allocation34_spill] sm:$0xff] %v8133_v39  ;;  %v6052_v0 = vpop.f32.mrb[82].mxu0  ;;  %v1369_v37 = vadd.f32 %v7856_v17, %v1368_v7  ;;  %v1774_v7 = vsub.s32 1, %v1769_v35  ;;  %v1770_v5 = vsub.s32 0, %v1769_v35 }
 0x1d5   : > { %2090 = vmatprep.mubr.bf16.mxu1 %v9471_v58  ;;  %v1371_v2 = vpop.f32.mrb[83].mxu0  ;;  %v1380_v6 = vadd.f32 %v6052_v0, %v7856_v17  ;;  %v1641_v25 = vmax.f32 %v1377_v32, 0.0  ;;  %v5442_v0 = vld [vmem:[%s9464_s8 + $0x1] ss:$4 sm:$0x3] }
 0x1d6   : > { %v1372_v12 = vadd.f32 %v7856_v17, %v1371_v2  ;;  %v1639_v14 = vmax.f32 %v1369_v37, 0.0 }
 0x1d7   : > { %v1642_v26 = vmax.f32 %v1380_v6, 0.0 }
 0x1d8   : > { %v1640_v18 = vmax.f32 %v1372_v12, 0.0 }
 0x1d9   : > { %v8151_v29 = vpack.c.bf16 %v1642_v26, %v1641_v25 }
 0x1da   : > { %v8145_v19 = vpack.c.bf16 %v1640_v18, %v1639_v14  ;;  %v6055_v50 = vpop.f32.mrb[84].mxu0  ;;  %v8163_v14 = vrot.slane %v5442_v0, %v1774_v7 }
 0x1db   : > { %9553 = vst [vmem:[#allocation37_spill] sm:$0xff] %v8151_v29  ;;  %v1384_v41 = vpop.f32.mrb[85].mxu0  ;;  %v1393_v6 = vadd.f32 %v6055_v50, %v7856_v17  ;;  %v9556_v50 = vmov 0  }
 0x1dc   : > { %2091 = vmatmul.mubr.bf16.gmra.mrb[96].mxu1 %v8027_v40  ;;  %9552 = vst [vmem:[#allocation36_spill] sm:$0xff] %v8145_v19  ;;  %v6056_v33 = vpop.f32.mrb[86].mxu0  ;;  %v1385_v52 = vadd.f32 %v7856_v17, %v1384_v41 }
 0x1dd   : > { %2100 = vmatprep.mubr.bf16.mxu1 %v9471_v58  ;;  %v1387_v49 = vpop.f32.mrb[87].mxu0  ;;  %v1396_v25 = vadd.f32 %v6056_v33, %v7856_v17 }
 0x1de   : > { %v1388_v60 = vadd.f32 %v7856_v17, %v1387_v49  ;;  %v1643_v2 = vmax.f32 %v1385_v52, 0.0  ;;  %v1645_v52 = vmax.f32 %v1393_v6, 0.0 }
 0x1e0   : > { %v1644_v37 = vmax.f32 %v1388_v60, 0.0  ;;  %v1646_v60 = vmax.f32 %v1396_v25, 0.0 }
 0x1e2   : > { %v8161_v12 = vpack.c.bf16 %v1644_v37, %v1643_v2  ;;  %v8171_v7 = vpack.c.bf16 %v1646_v60, %v1645_v52  ;;  %v6059_v37 = vpop.f32.mrb[88].mxu0 }
 0x1e3   : > { %v1400_v33 = vpop.f32.mrb[89].mxu0 }
 0x1e4   : > { %2101 = vmatmul.mubr.bf16.gmra.mrb[100].mxu1 %v8025_v36  ;;  %9554 = vst [vmem:[#allocation38_spill] sm:$0xff] %v8161_v12  ;;  %9555 = vst [vmem:[#allocation39_spill] sm:$0xff] %v8171_v7  ;;  %v1401_v25 = vadd.f32 %v7856_v17, %v1400_v33  ;;  %v8185_v33 = vld [vmem:[%s9464_s8] ss:$0 sm:$0xff] }
 0x1e5   : > { %2110 = vmatprep.mubr.bf16.mxu1 %v9471_v58 }
 0x1ec   : > { %2111 = vmatmul.mubr.bf16.gmra.mrb[104].mxu1 %v8043_v51 }
 0x1ed   : > { %2120 = vmatprep.mubr.bf16.mxu1 %v9471_v58 }
 0x1f4   : > { %2121 = vmatmul.mubr.bf16.gmra.mrb[108].mxu1 %v8041_v10 }
 0x1f5   : > { %2130 = vmatprep.mubr.bf16.mxu1 %v9471_v58 }
 0x1fc   : > { %2131 = vmatmul.mubr.bf16.gmra.mrb[112].mxu1 %v8053_v28 }
 0x1fd   : > { %2140 = vmatprep.mubr.bf16.mxu1 %v9471_v58 }
 0x204   : > { %2141 = vmatmul.mubr.bf16.gmra.mrb[116].mxu1 %v8051_v27 }
 0x205   : > { %2150 = vmatprep.mubr.bf16.mxu1 %v9471_v58 }
 0x20c   : > { %2151 = vmatmul.mubr.bf16.gmra.mrb[120].mxu1 %v8063_v57  ;;  %v6060_v57 = vpop.f32.mrb[90].mxu0 }
 0x20d   : > { %2160 = vmatprep.mubr.bf16.mxu1 %v9471_v58  ;;  %v1403_v27 = vpop.f32.mrb[91].mxu0 }
 0x20f   : > { %v1892_v18 = vpop.f32.mrb[16].mxu1 }
 0x210   : > { %v1894_v32 = vpop.f32.mrb[17].mxu1 }
 0x211   : > { %v1895_v26 = vadd.f32 %v1894_v32, %v8163_v14  ;;  %v1896_v41 = vpop.f32.mrb[18].mxu1 }
 0x212   : > { %v1898_v49 = vpop.f32.mrb[19].mxu1 }
 0x213   : > { %v5532_v24 = vmul.f32 -1.442695, %v1895_v26  ;;  %v1899_v2 = vadd.f32 %v1898_v49, %v8163_v14  ;;  %v1404_v26 = vadd.f32 %v7856_v17, %v1403_v27  ;;  %v8176_v49 = vrot.slane %v5442_v0, %v1770_v5 }
 0x214   : > { %2161 = vmatmul.mubr.bf16.gmra.mrb[124].mxu1 %v8061_v55  ;;  %v1412_v5 = vadd.f32 %v8185_v33, %v6060_v57 }
 0x215   : > { %6637 = vpow2.f32 %v5532_v24  ;;  %v5533_v58 = vmul.f32 -1.442695, %v1899_v2  ;;  %2170 = vmatprep.mubr.bf16.mxu1 %v9556_v50  ;;  %v1647_v24 = vmax.f32 %v1401_v25, 0.0  ;;  %v1648_v2 = vmax.f32 %v1404_v26, 0.0 }
 0x216   : > { %v1893_v0 = vadd.f32 %v1892_v18, %v8176_v49  ;;  %v1650_v26 = vmax.f32 %v1412_v5, 0.0 }
 0x217   : > { %6639 = vpow2.f32 %v5533_v58  ;;  %v1902_v32 = vpop.f32.mrb[20].mxu1  ;;  %v1409_v58 = vadd.f32 %v6059_v37, %v7856_v17  ;;  %v8188_v27 = vpack.c.bf16 %v1648_v2, %v1647_v24  ;;  %v1897_v17 = vadd.f32 %v1896_v41, %v8176_v49  ;;  %v6063_v2 = vpop.f32.mrb[92].mxu0 }
 0x218   : > { %v1904_v6 = vpop.f32.mrb[21].mxu1  ;;  %v1425_v41 = vadd.f32 %v8185_v33, %v6063_v2 }
 0x219   : > { %v1905_v52 = vadd.f32 %v1904_v6, %v8163_v14  ;;  %v1906_v60 = vpop.f32.mrb[22].mxu1  ;;  %9557 = vst [vmem:[#allocation40_spill] sm:$0xff] %v8188_v27  ;;  %v1649_v25 = vmax.f32 %v1409_v58, 0.0 }
 0x21a   : > { %v1908_v35 = vpop.f32.mrb[23].mxu1 }
 0x21b   : > { %v5534_v55 = vmul.f32 -1.442695, %v1905_v52  ;;  %v1909_v28 = vadd.f32 %v1908_v35, %v8163_v14  ;;  %v8193_v10 = vpack.c.bf16 %v1650_v26, %v1649_v25  ;;  %v1903_v25 = vadd.f32 %v1902_v32, %v8176_v49 }
 0x21c   : > { %2171 = vmatmul.mubr.bf16.gmra.mrb[128].mxu1 %v8073_v23 }
 0x21d   : > { %6641 = vpow2.f32 %v5534_v55  ;;  %v5535_v6 = vmul.f32 -1.442695, %v1909_v28  ;;  %2180 = vmatprep.mubr.bf16.mxu1 %v9556_v50  ;;  %9558 = vst [vmem:[#allocation41_spill] sm:$0xff] %v8193_v10 }
 0x21f   : > { %v6638_v52 = vpop.eup %6637  ;;  %6643 = vpow2.f32 %v5535_v6  ;;  %v1912_v37 = vpop.f32.mrb[24].mxu1 }
 0x220   : > { %v3043_v35 = vadd.f32 1.0, %v6638_v52  ;;  %v1914_v23 = vpop.f32.mrb[25].mxu1  ;;  %6645 = vtanh.f32 %v1893_v0  ;;  %v1416_v6 = vpop.f32.mrb[93].mxu0  ;;  %v1653_v52 = vmax.f32 %v1425_v41, 0.0 }
 0x221   : > { %v6640_v57 = vpop.eup %6639  ;;  %v1915_v24 = vadd.f32 %v1914_v23, %v8163_v14  ;;  %v1916_v18 = vpop.f32.mrb[26].mxu1  ;;  %v1417_v0 = vadd.f32 %v8185_v33, %v1416_v6 }
 0x222   : > { %6647 = vrcp.f32 %v3043_v35  ;;  %v3044_v28 = vadd.f32 1.0, %v6640_v57  ;;  %v1918_v55 = vpop.f32.mrb[27].mxu1  ;;  %v6064_v23 = vpop.f32.mrb[94].mxu0 }
 0x223   : > { %6649 = vtanh.f32 %v1897_v17  ;;  %v5536_v58 = vmul.f32 -1.442695, %v1915_v24  ;;  %v1919_v5 = vadd.f32 %v1918_v55, %v8163_v14  ;;  %v1428_v17 = vadd.f32 %v8185_v33, %v6064_v23  ;;  %v1419_v35 = vpop.f32.mrb[95].mxu0 }
 0x224   : > { %6651 = vrcp.f32 %v3044_v28  ;;  %2181 = vmatmul.mubr.bf16.gmra.mrb[132].mxu1 %v8071_v22  ;;  %v1651_v57 = vmax.f32 %v1417_v0, 0.0  ;;  %v1420_v24 = vadd.f32 %v8185_v33, %v1419_v35  ;;  %v1907_v28 = vadd.f32 %v1906_v60, %v8176_v49 }
 0x225   : > { %6653 = vpow2.f32 %v5536_v58  ;;  %v5537_v26 = vmul.f32 -1.442695, %v1919_v5  ;;  %2190 = vmatprep.mubr.bf16.mxu1 %v9556_v50  ;;  %v1654_v2 = vmax.f32 %v1428_v17, 0.0 }
 0x226   : > { %v1652_v51 = vmax.f32 %v1420_v24, 0.0  ;;  %v1913_v24 = vadd.f32 %v1912_v37, %v8176_v49 }
 0x227   : > { %v6642_v55 = vpop.eup %6641  ;;  %6655 = vpow2.f32 %v5537_v26  ;;  %v1922_v32 = vpop.f32.mrb[28].mxu1  ;;  %v8206_v36 = vpack.c.bf16 %v1654_v2, %v1653_v52 }
 0x228   : > { %v3045_v22 = vadd.f32 1.0, %v6642_v55  ;;  %v1924_v6 = vpop.f32.mrb[29].mxu1  ;;  %6657 = vtanh.f32 %v1903_v25  ;;  %v8208_v35 = vpack.c.bf16 %v1652_v51, %v1651_v57  ;;  %v1917_v57 = vadd.f32 %v1916_v18, %v8176_v49 }
 0x229   : > { %v6644_v58 = vpop.eup %6643  ;;  %v1925_v5 = vadd.f32 %v1924_v6, %v8163_v14  ;;  %v1926_v41 = vpop.f32.mrb[30].mxu1  ;;  %9559 = vst [vmem:[#allocation42_spill] sm:$0xff] %v8206_v36 }
 0x22a   : > { %6659 = vrcp.f32 %v3045_v22  ;;  %v3046_v0 = vadd.f32 1.0, %v6644_v58  ;;  %v1928_v23 = vpop.f32.mrb[31].mxu1  ;;  %9560 = vst [vmem:[#allocation43_spill] sm:$0xff] %v8208_v35  ;;  %v6646_v40 = vpop.eup %6645 }
 0x22b   : > { %6661 = vtanh.f32 %v1907_v28  ;;  %v5538_v60 = vmul.f32 -1.442695, %v1925_v5  ;;  %v1929_v26 = vadd.f32 %v1928_v23, %v8163_v14 }
 0x22c   : > { %v6648_v17 = vpop.eup %6647  ;;  %6663 = vrcp.f32 %v3046_v0  ;;  %2191 = vmatmul.mubr.bf16.gmra.mrb[136].mxu1 %v8084_v43 }
 0x22d   : > { %v6650_v25 = vpop.eup %6649  ;;  %6665 = vpow2.f32 %v5538_v60  ;;  %v5539_v52 = vmul.f32 -1.442695, %v1929_v26  ;;  %2200 = vmatprep.mubr.bf16.mxu1 %v9556_v50  ;;  %v3427_v22 = vmul.f32 %v6648_v17, %v6646_v40  ;;  %v6067_v26 = vpop.f32.mrb[96].mxu0 }
 0x22e   : > { %v6652_v55 = vpop.eup %6651 }
 0x22f   : > { %v6654_v51 = vpop.eup %6653  ;;  %6667 = vpow2.f32 %v5539_v52  ;;  %v8215_v28 = vpop.f32.mrb[32].mxu1  ;;  %v3428_v2 = vmul.f32 %v6652_v55, %v6650_v25  ;;  %v1441_v25 = vadd.f32 %v8185_v33, %v6067_v26 }
 0x230   : > { %v3047_v6 = vadd.f32 1.0, %v6654_v51  ;;  %v1934_v58 = vpop.f32.mrb[33].mxu1  ;;  %6669 = vtanh.f32 %v1913_v24  ;;  %v1432_v55 = vpop.f32.mrb[97].mxu0 }
 0x231   : > { %v6656_v5 = vpop.eup %6655  ;;  %v1935_v0 = vadd.f32 %v1934_v58, %v8163_v14  ;;  %v8218_v37 = vpop.f32.mrb[34].mxu1  ;;  %v3555_v23 = vpack.c.bf16 %v3428_v2, %v3427_v22  ;;  %v1433_v24 = vadd.f32 %v8185_v33, %v1432_v55 }
 0x232   : > { %6671 = vrcp.f32 %v3047_v6  ;;  %v3048_v60 = vadd.f32 1.0, %v6656_v5  ;;  %v1938_v40 = vpop.f32.mrb[35].mxu1  ;;  %v6658_v17 = vpop.eup %6657  ;;  %v1923_v6 = vadd.f32 %v1922_v32, %v8176_v49 }
 0x233   : > { %6673 = vtanh.f32 %v1917_v57  ;;  %v5540_v18 = vmul.f32 -1.442695, %v1935_v0  ;;  %v1939_v52 = vadd.f32 %v1938_v40, %v8163_v14  ;;  %6113 = vmatprep.mubr.bf16.mxu0 %v3555_v23  ;;  %v6068_v22 = vpop.f32.mrb[98].mxu0  ;;  %v1657_v23 = vmax.f32 %v1441_v25, 0.0 }
 0x234   : > { %v6660_v51 = vpop.eup %6659  ;;  %6675 = vrcp.f32 %v3048_v60  ;;  %2201 = vmatmul.mubr.bf16.gmra.mrb[140].mxu1 %v8087_v48  ;;  %v1435_v5 = vpop.f32.mrb[99].mxu0  ;;  %v1444_v40 = vadd.f32 %v8185_v33, %v6068_v22  ;;  %v1927_v48 = vadd.f32 %v1926_v41, %v8176_v49  ;;  %v1655_v32 = vmax.f32 %v1433_v24, 0.0 }
 0x235   : > { %v6662_v2 = vpop.eup %6661  ;;  %6677 = vpow2.f32 %v5540_v18  ;;  %v5541_v58 = vmul.f32 -1.442695, %v1939_v52  ;;  %2210 = vmatprep.mubr.bf16.mxu1 %v9556_v50  ;;  %v3429_v57 = vmul.f32 %v6660_v51, %v6658_v17  ;;  %v1436_v60 = vadd.f32 %v8185_v33, %v1435_v5 }
 0x236   : > { %v6664_v0 = vpop.eup %6663  ;;  %v1658_v56 = vmax.f32 %v1444_v40, 0.0 }
 0x237   : > { %v6666_v26 = vpop.eup %6665  ;;  %6679 = vpow2.f32 %v5541_v58  ;;  %v8229_v55 = vpop.f32.mrb[36].mxu1  ;;  %v3430_v43 = vmul.f32 %v6664_v0, %v6662_v2  ;;  %v1656_v59 = vmax.f32 %v1436_v60, 0.0 }
 0x238   : > { %v3049_v18 = vadd.f32 1.0, %v6666_v26  ;;  %v1944_v52 = vpop.f32.mrb[37].mxu1  ;;  %6681 = vtanh.f32 %v1923_v6  ;;  %v8234_v41 = vpack.c.bf16 %v1658_v56, %v1657_v23  ;;  %v1933_v6 = vadd.f32 %v8215_v28, %v8176_v49 }
 0x239   : > { %v6668_v17 = vpop.eup %6667  ;;  %v1945_v25 = vadd.f32 %v1944_v52, %v8163_v14  ;;  %v8232_v51 = vpop.f32.mrb[38].mxu1  ;;  %v3556_v22 = vpack.c.bf16 %v3430_v43, %v3429_v57  ;;  %v8237_v0 = vpack.c.bf16 %v1656_v59, %v1655_v32  ;;  %v9563_v57 = vmov 0.0  }
 0x23a   : > { %6683 = vrcp.f32 %v3049_v18  ;;  %v3050_v5 = vadd.f32 1.0, %v6668_v17  ;;  %v1948_v11 = vpop.f32.mrb[39].mxu1  ;;  %9561 = vst [vmem:[#allocation44_spill] sm:$0xff] %v8234_v41  ;;  %v6670_v58 = vpop.eup %6669  ;;  %v1937_v23 = vadd.f32 %v8218_v37, %v8176_v49 }
 0x23b   : > { %6685 = vtanh.f32 %v1927_v48  ;;  %v5542_v2 = vmul.f32 -1.442695, %v1945_v25  ;;  %v1949_v24 = vadd.f32 %v1948_v11, %v8163_v14  ;;  %6114 = vmatmul.mubr.bf16.vlgmr.msra.gmra.mrb[112].mxu0 %v3556_v22  ;;  %9562 = vst [vmem:[#allocation45_spill] sm:$0xff] %v8237_v0  ;;  %v6071_v22 = vpop.f32.mrb[100].mxu0 }
 0x23c   : > { %v6672_v40 = vpop.eup %6671  ;;  %6687 = vrcp.f32 %v3050_v5  ;;  %6242 = vmatpush3.bf16.msra.mxu0 %v7864_v31  ;;  %2211 = vmatmul.mubr.bf16.gmra.mrb[144].mxu1 %v8097_v8 }
 0x23d   : > { %v6674_v43 = vpop.eup %6673  ;;  %6689 = vpow2.f32 %v5542_v2  ;;  %v5543_v56 = vmul.f32 -1.442695, %v1949_v24  ;;  %6243 = vmatprep.subr.bf16.mxu0 %v9563_v57  ;;  %2220 = vmatprep.mubr.bf16.mxu1 %v9556_v50  ;;  %v3431_v11 = vmul.f32 %v6672_v40, %v6670_v58  ;;  %v1448_v24 = vpop.f32.mrb[101].mxu0 }
 0x23e   : > { %v6676_v48 = vpop.eup %6675 }
 0x23f   : > { %v6678_v59 = vpop.eup %6677  ;;  %6691 = vpow2.f32 %v5543_v56  ;;  %v8247_v31 = vpop.f32.mrb[40].mxu1  ;;  %v3432_v60 = vmul.f32 %v6676_v48, %v6674_v43  ;;  %v1449_v43 = vadd.f32 %v8185_v33, %v1448_v24 }
 0x240   : > { %v3051_v26 = vadd.f32 1.0, %v6678_v59  ;;  %6244 = vmatpush3.bf16.msra.mxu0 %v7862_v30  ;;  %v1954_v28 = vpop.f32.mrb[41].mxu1  ;;  %6693 = vtanh.f32 %v1933_v6  ;;  %v1457_v30 = vadd.f32 %v8185_v33, %v6071_v22  ;;  %v6072_v6 = vpop.f32.mrb[102].mxu0 }
 0x241   : > { %v6680_v32 = vpop.eup %6679  ;;  %v1955_v18 = vadd.f32 %v1954_v28, %v8163_v14  ;;  %v8251_v52 = vpop.f32.mrb[42].mxu1  ;;  %6245 = vmatprep.subr.bf16.mxu0 %v9563_v57  ;;  %v3557_v17 = vpack.c.bf16 %v3432_v60, %v3431_v11  ;;  %v1943_v11 = vadd.f32 %v8229_v55, %v8176_v49 }
 0x242   : > { %6695 = vrcp.f32 %v3051_v26  ;;  %v3052_v25 = vadd.f32 1.0, %v6680_v32  ;;  %v1958_v37 = vpop.f32.mrb[43].mxu1  ;;  %v6682_v5 = vpop.eup %6681  ;;  %v1661_v26 = vmax.f32 %v1457_v30, 0.0 }
 0x243   : > { %6697 = vtanh.f32 %v1937_v23  ;;  %v5544_v58 = vmul.f32 -1.442695, %v1955_v18  ;;  %v1959_v2 = vadd.f32 %v1958_v37, %v8163_v14  ;;  %6117 = vmatprep.mubr.bf16.mxu0 %v3557_v17  ;;  %v1451_v23 = vpop.f32.mrb[103].mxu0  ;;  %v1947_v18 = vadd.f32 %v8232_v51, %v8176_v49 }
 0x244   : > { %v6684_v40 = vpop.eup %6683  ;;  %6699 = vrcp.f32 %v3052_v25  ;;  %6246 = vmatpush3.bf16.msra.mxu0 %v7876_v47  ;;  %2221 = vmatmul.mubr.bf16.gmra.mrb[148].mxu1 %v8103_v20  ;;  %v1460_v47 = vadd.f32 %v8185_v33, %v6072_v6  ;;  %v1452_v28 = vadd.f32 %v8185_v33, %v1451_v23  ;;  %v1659_v25 = vmax.f32 %v1449_v43, 0.0 }
 0x245   : > { %v6686_v56 = vpop.eup %6685  ;;  %6701 = vpow2.f32 %v5544_v58  ;;  %v5545_v48 = vmul.f32 -1.442695, %v1959_v2  ;;  %6247 = vmatprep.subr.bf16.mxu0 %v9563_v57  ;;  %2230 = vmatprep.mubr.bf16.mxu1 %v9556_v50  ;;  %v3433_v59 = vmul.f32 %v6684_v40, %v6682_v5 }
 0x246   : > { %v6688_v60 = vpop.eup %6687  ;;  %v1662_v5 = vmax.f32 %v1460_v47, 0.0  ;;  %v1660_v58 = vmax.f32 %v1452_v28, 0.0 }
 0x247   : > { %v6690_v32 = vpop.eup %6689  ;;  %6703 = vpow2.f32 %v5545_v48  ;;  %v8267_v55 = vpop.f32.mrb[44].mxu1  ;;  %v3434_v17 = vmul.f32 %v6688_v60, %v6686_v56  ;;  %v1953_v60 = vadd.f32 %v8247_v31, %v8176_v49 }
 0x248   : > { %v3053_v37 = vadd.f32 1.0, %v6690_v32  ;;  %6248 = vmatpush3.bf16.msra.mxu0 %v7874_v46  ;;  %v1964_v22 = vpop.f32.mrb[45].mxu1  ;;  %6705 = vtanh.f32 %v1943_v11  ;;  %v8274_v56 = vpack.c.bf16 %v1662_v5, %v1661_v26  ;;  %v8277_v23 = vpack.c.bf16 %v1660_v58, %v1659_v25 }
 0x249   : > { %v6692_v2 = vpop.eup %6691  ;;  %v1965_v30 = vadd.f32 %v1964_v22, %v8163_v14  ;;  %v8271_v24 = vpop.f32.mrb[46].mxu1  ;;  %6249 = vmatprep.subr.bf16.mxu0 %v9563_v57  ;;  %v3558_v51 = vpack.c.bf16 %v3434_v17, %v3433_v59 }
 0x24a   : > { %6707 = vrcp.f32 %v3053_v37  ;;  %v3054_v40 = vadd.f32 1.0, %v6692_v2  ;;  %v1968_v6 = vpop.f32.mrb[47].mxu1  ;;  %9564 = vst [vmem:[#allocation46_spill] sm:$0xff] %v8274_v56  ;;  %v6694_v43 = vpop.eup %6693  ;;  %9565 = vst [vmem:[#allocation47_spill] sm:$0xff] %v8277_v23 }
 0x24b   : > { %6709 = vtanh.f32 %v1947_v18  ;;  %v5546_v46 = vmul.f32 -1.442695, %v1965_v30  ;;  %v1969_v48 = vadd.f32 %v1968_v6, %v8163_v14  ;;  %6118 = vmatmul.mubr.bf16.gmra.mrb[116].mxu0 %v3558_v51  ;;  %v1957_v18 = vadd.f32 %v8251_v52, %v8176_v49  ;;  %v6075_v30 = vpop.f32.mrb[104].mxu0 }
 0x24c   : > { %v6696_v11 = vpop.eup %6695  ;;  %6711 = vrcp.f32 %v3054_v40  ;;  %6250 = vmatpush3.bf16.msra.mxu0 %v7886_v62  ;;  %2231 = vmatmul.mubr.bf16.gmra.mrb[152].mxu1 %v8109_v34 }
 0x24d   : > { %v6698_v59 = vpop.eup %6697  ;;  %6713 = vpow2.f32 %v5546_v46  ;;  %v5547_v26 = vmul.f32 -1.442695, %v1969_v48  ;;  %6251 = vmatprep.subr.bf16.mxu0 %v9563_v57  ;;  %2240 = vmatprep.mubr.bf16.mxu1 %v9556_v50  ;;  %v3435_v47 = vmul.f32 %v6696_v11, %v6694_v43  ;;  %v1464_v43 = vpop.f32.mrb[105].mxu0 }
 0x24e   : > { %v6700_v28 = vpop.eup %6699  ;;  %v1465_v48 = vadd.f32 %v8185_v33, %v1464_v43  ;;  %v6076_v11 = vpop.f32.mrb[106].mxu0 }
 0x24f   : > { %v6702_v32 = vpop.eup %6701  ;;  %6715 = vpow2.f32 %v5547_v26  ;;  %v8287_v62 = vpop.f32.mrb[48].mxu1  ;;  %v3436_v17 = vmul.f32 %v6700_v28, %v6698_v59 }
 0x250   : > { %v3055_v25 = vadd.f32 1.0, %v6702_v32  ;;  %6252 = vmatpush3.bf16.msra.mxu0 %v7884_v61  ;;  %v1974_v31 = vpop.f32.mrb[49].mxu1  ;;  %6717 = vtanh.f32 %v1953_v60  ;;  %v1473_v61 = vadd.f32 %v8185_v33, %v6075_v30  ;;  %v1963_v60 = vadd.f32 %v8267_v55, %v8176_v49  ;;  %v1467_v28 = vpop.f32.mrb[107].mxu0 }
 0x251   : > { %v6704_v37 = vpop.eup %6703  ;;  %v1975_v22 = vadd.f32 %v1974_v31, %v8163_v14  ;;  %v8291_v5 = vpop.f32.mrb[50].mxu1  ;;  %6253 = vmatprep.subr.bf16.mxu0 %v9563_v57  ;;  %v3559_v58 = vpack.c.bf16 %v3436_v17, %v3435_v47  ;;  %v1468_v17 = vadd.f32 %v8185_v33, %v1467_v28  ;;  %v1967_v31 = vadd.f32 %v8271_v24, %v8176_v49 }
 0x252   : > { %6719 = vrcp.f32 %v3055_v25  ;;  %v3056_v2 = vadd.f32 1.0, %v6704_v37  ;;  %v1978_v52 = vpop.f32.mrb[51].mxu1  ;;  %v6706_v51 = vpop.eup %6705 }
 0x253   : > { %6721 = vtanh.f32 %v1957_v18  ;;  %v5548_v40 = vmul.f32 -1.442695, %v1975_v22  ;;  %v1979_v6 = vadd.f32 %v1978_v52, %v8163_v14  ;;  %6121 = vmatprep.mubr.bf16.mxu0 %v3559_v58  ;;  %v1476_v18 = vadd.f32 %v8185_v33, %v6076_v11 }
 0x254   : > { %v6708_v46 = vpop.eup %6707  ;;  %6723 = vrcp.f32 %v3056_v2  ;;  %6254 = vmatpush3.bf16.msra.mxu0 %v7901_v16  ;;  %2241 = vmatmul.mubr.bf16.gmra.mrb[156].mxu1 %v8115_v38  ;;  %v1665_v16 = vmax.f32 %v1473_v61, 0.0  ;;  %v1663_v22 = vmax.f32 %v1465_v48, 0.0  ;;  %v1664_v30 = vmax.f32 %v1468_v17, 0.0 }
 0x255   : > { %v6710_v59 = vpop.eup %6709  ;;  %6725 = vpow2.f32 %v5548_v40  ;;  %v5549_v26 = vmul.f32 -1.442695, %v1979_v6  ;;  %6255 = vmatprep.subr.bf16.mxu0 %v9563_v57  ;;  %2250 = vmatprep.mubr.bf16.mxu1 %v9556_v50  ;;  %v3437_v47 = vmul.f32 %v6708_v46, %v6706_v51  ;;  %v1666_v52 = vmax.f32 %v1476_v18, 0.0  ;;  %v5671_v18 = vld [vmem:[%s8327_s23 + $0x2] ss:$0 sm:$0xff] }
 0x256   : > { %v6712_v32 = vpop.eup %6711  ;;  %4537 = vperm.xlu1 %6516, %v5671_v18  }
 0x257   : > { %v6714_v25 = vpop.eup %6713  ;;  %6727 = vpow2.f32 %v5549_v26  ;;  %v8307_v55 = vpop.f32.mrb[52].mxu1  ;;  %v3438_v37 = vmul.f32 %v6712_v32, %v6710_v59  ;;  %v8315_v46 = vpack.c.bf16 %v1666_v52, %v1665_v16  ;;  %v8318_v59 = vpack.c.bf16 %v1664_v30, %v1663_v22 }
 0x258   : > { %v3057_v58 = vadd.f32 1.0, %v6714_v25  ;;  %6256 = vmatpush3.bf16.msra.mxu0 %v7899_v15  ;;  %v1984_v2 = vpop.f32.mrb[53].mxu1  ;;  %6729 = vtanh.f32 %v1963_v60  ;;  %v1977_v25 = vadd.f32 %v8291_v5, %v8176_v49  ;;  %v6079_v5 = vpop.f32.mrb[108].mxu0 }
 0x259   : > { %v6716_v51 = vpop.eup %6715  ;;  %v1985_v40 = vadd.f32 %v1984_v2, %v8163_v14  ;;  %v8312_v6 = vpop.f32.mrb[54].mxu1  ;;  %v3560_v61 = vpack.c.bf16 %v3438_v37, %v3437_v47  ;;  %6281 = vmatprep.subr.bf16.mxu0 %v9563_v57  ;;  %9566 = vst [vmem:[#allocation48_spill] sm:$0xff] %v8315_v46  ;;  %9567 = vst [vmem:[#allocation49_spill] sm:$0xff] %v8318_v59  ;;  %v1973_v47 = vadd.f32 %v8287_v62, %v8176_v49 }
 0x25a   : > { %6731 = vrcp.f32 %v3057_v58  ;;  %v3058_v24 = vadd.f32 1.0, %v6716_v51  ;;  %v1988_v43 = vpop.f32.mrb[55].mxu1  ;;  %v6718_v15 = vpop.eup %6717  ;;  %v5672_v58 = vld [vmem:[%s8327_s23 + $0x3] ss:$0 sm:$0xff] }
 0x25b   : > { %6733 = vtanh.f32 %v1967_v31  ;;  %v5550_v48 = vmul.f32 -1.442695, %v1985_v40  ;;  %v1989_v11 = vadd.f32 %v1988_v43, %v8163_v14  ;;  %6122 = vmatmul.mubr.bf16.gmra.mrb[120].mxu0 %v3560_v61  ;;  %4540 = vperm.xlu1 %6516, %v5672_v58  }
 0x25c   : > { %v6720_v60 = vpop.eup %6719  ;;  %6735 = vrcp.f32 %v3058_v24  ;;  %2251 = vmatmul.mubr.bf16.gmra.mrb[160].mxu1 %v8121_v3 }
 0x25d   : > { %v6722_v26 = vpop.eup %6721  ;;  %6737 = vpow2.f32 %v5550_v48  ;;  %v5551_v28 = vmul.f32 -1.442695, %v1989_v11  ;;  %2260 = vmatprep.mubr.bf16.mxu1 %v9556_v50  ;;  %v3439_v32 = vmul.f32 %v6720_v60, %v6718_v15  ;;  %v1489_v48 = vadd.f32 %v8185_v33, %v6079_v5  ;;  %v1480_v11 = vpop.f32.mrb[109].mxu0 }
 0x25e   : > { %v6724_v16 = vpop.eup %6723 }
 0x25f   : > { %v6726_v17 = vpop.eup %6725  ;;  %6739 = vpow2.f32 %v5551_v28  ;;  %v8332_v62 = vpop.f32.mrb[56].mxu1  ;;  %v3440_v31 = vmul.f32 %v6724_v16, %v6722_v26  ;;  %v1481_v26 = vadd.f32 %v8185_v33, %v1480_v11  ;;  %v5674_v28 = vld [vmem:[%s8327_s23 + $0x5] ss:$0 sm:$0xff]  ;;  %v1983_v16 = vadd.f32 %v8307_v55, %v8176_v49 }
 0x260   : > { %v3059_v37 = vadd.f32 1.0, %v6726_v17  ;;  %v1994_v22 = vpop.f32.mrb[57].mxu1  ;;  %6741 = vtanh.f32 %v1973_v47  ;;  %v6080_v47 = vpop.f32.mrb[110].mxu0  ;;  %4546 = vperm.xlu1 %6516, %v5674_v28  }
 0x261   : > { %v6728_v2 = vpop.eup %6727  ;;  %v1995_v52 = vadd.f32 %v1994_v22, %v8163_v14  ;;  %v8336_v30 = vpop.f32.mrb[58].mxu1  ;;  %v3561_v51 = vpack.c.bf16 %v3440_v31, %v3439_v32  ;;  %v1492_v22 = vadd.f32 %v8185_v33, %v6080_v47 }
 0x262   : > { %6743 = vrcp.f32 %v3059_v37  ;;  %v3060_v40 = vadd.f32 1.0, %v6728_v2  ;;  %v1998_v61 = vpop.f32.mrb[59].mxu1  ;;  %v6730_v24 = vpop.eup %6729  ;;  %v1669_v37 = vmax.f32 %v1489_v48, 0.0 }
 0x263   : > { %6745 = vtanh.f32 %v1977_v25  ;;  %v5552_v43 = vmul.f32 -1.442695, %v1995_v52  ;;  %v1999_v15 = vadd.f32 %v1998_v61, %v8163_v14  ;;  %6125 = vmatprep.mubr.bf16.mxu0 %v3561_v51  ;;  %v1483_v25 = vpop.f32.mrb[111].mxu0  ;;  %v1987_v52 = vadd.f32 %v8312_v6, %v8176_v49 }
 0x264   : > { %v6732_v60 = vpop.eup %6731  ;;  %6747 = vrcp.f32 %v3060_v40  ;;  %2261 = vmatmul.mubr.bf16.gmra.mrb[164].mxu1 %v8127_v21  ;;  %v1484_v58 = vadd.f32 %v8185_v33, %v1483_v25  ;;  %v1667_v40 = vmax.f32 %v1481_v26, 0.0 }
 0x265   : > { %v6734_v32 = vpop.eup %6733  ;;  %6749 = vpow2.f32 %v5552_v43  ;;  %v5553_v18 = vmul.f32 -1.442695, %v1999_v15  ;;  %2270 = vmatprep.mubr.bf16.mxu1 %v9556_v50  ;;  %v3441_v17 = vmul.f32 %v6732_v60, %v6730_v24  ;;  %v1670_v24 = vmax.f32 %v1492_v22, 0.0  ;;  %v5675_v15 = vld [vmem:[%s8327_s23 + $0x6] ss:$0 sm:$0xff] }
 0x266   : > { %v6736_v31 = vpop.eup %6735  ;;  %v1668_v43 = vmax.f32 %v1484_v58, 0.0  ;;  %4549 = vperm.xlu1 %6516, %v5675_v15  }
 0x267   : > { %v6738_v2 = vpop.eup %6737  ;;  %6751 = vpow2.f32 %v5553_v18  ;;  %v2002_v51 = vpop.f32.mrb[60].mxu1  ;;  %v3442_v55 = vmul.f32 %v6736_v31, %v6734_v32  ;;  %v8352_v6 = vpack.c.bf16 %v1670_v24, %v1669_v37 }
 0x268   : > { %v3061_v61 = vadd.f32 1.0, %v6738_v2  ;;  %v2004_v5 = vpop.f32.mrb[61].mxu1  ;;  %6753 = vtanh.f32 %v1983_v16  ;;  %v8355_v32 = vpack.c.bf16 %v1668_v43, %v1667_v40 }
 0x269   : > { %v6740_v11 = vpop.eup %6739  ;;  %v2005_v48 = vadd.f32 %v2004_v5, %v8163_v14  ;;  %v2006_v60 = vpop.f32.mrb[62].mxu1  ;;  %v3562_v33 = vpack.c.bf16 %v3442_v55, %v3441_v17  ;;  %9569 = vst [vmem:[#allocation50_spill] sm:$0xff] %v8352_v6  ;;  %v1993_v17 = vadd.f32 %v8332_v62, %v8176_v49 }
 0x26a   : > { %6755 = vrcp.f32 %v3061_v61  ;;  %v3062_v47 = vadd.f32 1.0, %v6740_v11  ;;  %v2008_v25 = vpop.f32.mrb[63].mxu1  ;;  %v6742_v18 = vpop.eup %6741  ;;  %9570 = vst [vmem:[#allocation51_spill] sm:$0xff] %v8355_v32 }
 0x26b   : > { %6757 = vtanh.f32 %v1987_v52  ;;  %v5554_v26 = vmul.f32 -1.442695, %v2005_v48  ;;  %v2009_v28 = vadd.f32 %v2008_v25, %v8163_v14  ;;  %6126 = vmatmul.mubr.bf16.gmra.mrb[124].mxu0 %v3562_v33  ;;  %v1997_v52 = vadd.f32 %v8336_v30, %v8176_v49 }
 0x26c   : > { %v6744_v31 = vpop.eup %6743  ;;  %6759 = vrcp.f32 %v3062_v47  ;;  %2271 = vmatmul.mubr.bf16.gmra.mrb[168].mxu1 %v8133_v39 }
 0x26d   : > { %v6746_v16 = vpop.eup %6745  ;;  %6761 = vpow2.f32 %v5554_v26  ;;  %v5555_v37 = vmul.f32 -1.442695, %v2009_v28  ;;  %2280 = vmatprep.mubr.bf16.mxu1 %v9556_v50  ;;  %v3443_v22 = vmul.f32 %v6744_v31, %v6742_v18  ;;  %v2003_v26 = vadd.f32 %v2002_v51, %v8176_v49 }
 0x26e   : > { %v6748_v58 = vpop.eup %6747 }
 0x26f   : > { %v6750_v2 = vpop.eup %6749  ;;  %6763 = vpow2.f32 %v5555_v37  ;;  %v2012_v55 = vpop.f32.mrb[64].mxu1  ;;  %v3444_v40 = vmul.f32 %v6748_v58, %v6746_v16  ;;  %v2007_v37 = vadd.f32 %v2006_v60, %v8176_v49 }
 0x270   : > { %v3063_v61 = vadd.f32 1.0, %v6750_v2  ;;  %v2014_v5 = vpop.f32.mrb[65].mxu1  ;;  %6765 = vtanh.f32 %v1993_v17 }
 0x271   : > { %v6752_v24 = vpop.eup %6751  ;;  %v2015_v43 = vadd.f32 %v2014_v5, %v8163_v14  ;;  %v2016_v62 = vpop.f32.mrb[66].mxu1  ;;  %v3563_v15 = vpack.c.bf16 %v3444_v40, %v3443_v22 }
 0x272   : > { %6767 = vrcp.f32 %v3063_v61  ;;  %v3064_v11 = vadd.f32 1.0, %v6752_v24  ;;  %v2018_v48 = vpop.f32.mrb[67].mxu1  ;;  %v6754_v33 = vpop.eup %6753 }
 0x273   : > { %6769 = vtanh.f32 %v1997_v52  ;;  %v5556_v47 = vmul.f32 -1.442695, %v2015_v43  ;;  %v2019_v25 = vadd.f32 %v2018_v48, %v8163_v14  ;;  %6129 = vmatprep.mubr.bf16.mxu0 %v3563_v15 }
 0x274   : > { %v6756_v30 = vpop.eup %6755  ;;  %6771 = vrcp.f32 %v3064_v11  ;;  %2281 = vmatmul.mubr.bf16.gmra.mrb[172].mxu1 %v8139_v54 }
 0x275   : > { %v6758_v18 = vpop.eup %6757  ;;  %6773 = vpow2.f32 %v5556_v47  ;;  %v5557_v28 = vmul.f32 -1.442695, %v2019_v25  ;;  %2290 = vmatprep.mubr.bf16.mxu1 %v9556_v50  ;;  %v3445_v31 = vmul.f32 %v6756_v30, %v6754_v33  ;;  %v2013_v47 = vadd.f32 %v2012_v55, %v8176_v49 }
 0x276   : > { %v6760_v16 = vpop.eup %6759 }
 0x277   : > { %v6762_v17 = vpop.eup %6761  ;;  %6775 = vpow2.f32 %v5557_v28  ;;  %v2022_v22 = vpop.f32.mrb[68].mxu1  ;;  %v3446_v58 = vmul.f32 %v6760_v16, %v6758_v18  ;;  %v2017_v28 = vadd.f32 %v2016_v62, %v8176_v49 }
 0x278   : > { %v3065_v2 = vadd.f32 1.0, %v6762_v17  ;;  %v2024_v52 = vpop.f32.mrb[69].mxu1  ;;  %6777 = vtanh.f32 %v2003_v26 }
 0x279   : > { %v6764_v40 = vpop.eup %6763  ;;  %v2025_v61 = vadd.f32 %v2024_v52, %v8163_v14  ;;  %v2026_v5 = vpop.f32.mrb[70].mxu1  ;;  %v3564_v51 = vpack.c.bf16 %v3446_v58, %v3445_v31 }
 0x27a   : > { %6779 = vrcp.f32 %v3065_v2  ;;  %v3066_v24 = vadd.f32 1.0, %v6764_v40  ;;  %v2028_v43 = vpop.f32.mrb[71].mxu1  ;;  %v6766_v15 = vpop.eup %6765 }
 0x27b   : > { %6781 = vtanh.f32 %v2007_v37  ;;  %v5558_v11 = vmul.f32 -1.442695, %v2025_v61  ;;  %v2029_v48 = vadd.f32 %v2028_v43, %v8163_v14  ;;  %6130 = vmatmul.mubr.bf16.gmra.mrb[128].mxu0 %v3564_v51 }
 0x27c   : > { %v6768_v60 = vpop.eup %6767  ;;  %6783 = vrcp.f32 %v3066_v24  ;;  %2291 = vmatmul.mubr.bf16.gmra.mrb[176].mxu1 %v8145_v19 }
 0x27d   : > { %v6770_v33 = vpop.eup %6769  ;;  %6785 = vpow2.f32 %v5558_v11  ;;  %v5559_v25 = vmul.f32 -1.442695, %v2029_v48  ;;  %2300 = vmatprep.mubr.bf16.mxu1 %v9556_v50  ;;  %v3447_v30 = vmul.f32 %v6768_v60, %v6766_v15  ;;  %v2023_v11 = vadd.f32 %v2022_v22, %v8176_v49 }
 0x27e   : > { %v6772_v18 = vpop.eup %6771 }
 0x27f   : > { %v6774_v26 = vpop.eup %6773  ;;  %6787 = vpow2.f32 %v5559_v25  ;;  %v2032_v31 = vpop.f32.mrb[72].mxu1  ;;  %v3448_v16 = vmul.f32 %v6772_v18, %v6770_v33  ;;  %v2027_v25 = vadd.f32 %v2026_v5, %v8176_v49 }
 0x280   : > { %v3067_v17 = vadd.f32 1.0, %v6774_v26  ;;  %v2034_v37 = vpop.f32.mrb[73].mxu1  ;;  %6789 = vtanh.f32 %v2013_v47 }
 0x281   : > { %v6776_v58 = vpop.eup %6775  ;;  %v2035_v2 = vadd.f32 %v2034_v37, %v8163_v14  ;;  %v2036_v52 = vpop.f32.mrb[74].mxu1  ;;  %v3565_v55 = vpack.c.bf16 %v3448_v16, %v3447_v30 }
 0x282   : > { %6791 = vrcp.f32 %v3067_v17  ;;  %v3068_v40 = vadd.f32 1.0, %v6776_v58  ;;  %v2038_v61 = vpop.f32.mrb[75].mxu1  ;;  %v6778_v51 = vpop.eup %6777 }
 0x283   : > { %6793 = vtanh.f32 %v2017_v28  ;;  %v5560_v24 = vmul.f32 -1.442695, %v2035_v2  ;;  %v2039_v43 = vadd.f32 %v2038_v61, %v8163_v14  ;;  %6133 = vmatprep.mubr.bf16.mxu0 %v3565_v55 }
 0x284   : > { %v6780_v62 = vpop.eup %6779  ;;  %6795 = vrcp.f32 %v3068_v40  ;;  %2301 = vmatmul.mubr.bf16.gmra.mrb[180].mxu1 %v8151_v29 }
 0x285   : > { %v6782_v15 = vpop.eup %6781  ;;  %6797 = vpow2.f32 %v5560_v24  ;;  %v5561_v48 = vmul.f32 -1.442695, %v2039_v43  ;;  %2310 = vmatprep.mubr.bf16.mxu1 %v9556_v50  ;;  %v3449_v60 = vmul.f32 %v6780_v62, %v6778_v51  ;;  %v2033_v24 = vadd.f32 %v2032_v31, %v8176_v49 }
 0x286   : > { %v6784_v33 = vpop.eup %6783 }
 0x287   : > { %v6786_v47 = vpop.eup %6785  ;;  %6799 = vpow2.f32 %v5561_v48  ;;  %v2042_v30 = vpop.f32.mrb[76].mxu1  ;;  %v3450_v18 = vmul.f32 %v6784_v33, %v6782_v15  ;;  %v2037_v48 = vadd.f32 %v2036_v52, %v8176_v49 }
 0x288   : > { %v3069_v26 = vadd.f32 1.0, %v6786_v47  ;;  %v2044_v28 = vpop.f32.mrb[77].mxu1  ;;  %6801 = vtanh.f32 %v2023_v11 }
 0x289   : > { %v6788_v16 = vpop.eup %6787  ;;  %v2045_v17 = vadd.f32 %v2044_v28, %v8163_v14  ;;  %v2046_v37 = vpop.f32.mrb[78].mxu1  ;;  %v3566_v22 = vpack.c.bf16 %v3450_v18, %v3449_v60 }
 0x28a   : > { %6803 = vrcp.f32 %v3069_v26  ;;  %v3070_v58 = vadd.f32 1.0, %v6788_v16  ;;  %v2048_v2 = vpop.f32.mrb[79].mxu1  ;;  %v6790_v55 = vpop.eup %6789 }
 0x28b   : > { %6805 = vtanh.f32 %v2027_v25  ;;  %v5562_v40 = vmul.f32 -1.442695, %v2045_v17  ;;  %v2049_v61 = vadd.f32 %v2048_v2, %v8163_v14  ;;  %6134 = vmatmul.mubr.bf16.gmra.mrb[132].mxu0 %v3566_v22 }
 0x28c   : > { %v6792_v5 = vpop.eup %6791  ;;  %6807 = vrcp.f32 %v3070_v58  ;;  %2311 = vmatmul.mubr.bf16.gmra.mrb[184].mxu1 %v8161_v12 }
 0x28d   : > { %v6794_v51 = vpop.eup %6793  ;;  %6809 = vpow2.f32 %v5562_v40  ;;  %v5563_v43 = vmul.f32 -1.442695, %v2049_v61  ;;  %2320 = vmatprep.mubr.bf16.mxu1 %v9556_v50  ;;  %v3451_v62 = vmul.f32 %v6792_v5, %v6790_v55  ;;  %v2043_v40 = vadd.f32 %v2042_v30, %v8176_v49 }
 0x28e   : > { %v6796_v15 = vpop.eup %6795 }
 0x28f   : > { %v6798_v11 = vpop.eup %6797  ;;  %6811 = vpow2.f32 %v5563_v43  ;;  %v3452_v60 = vmul.f32 %v6796_v15, %v6794_v51  ;;  %v2052_v33 = vpop.f32.mrb[80].mxu1  ;;  %v2047_v43 = vadd.f32 %v2046_v37, %v8176_v49 }
 0x290   : > { %v3071_v47 = vadd.f32 1.0, %v6798_v11  ;;  %v2054_v25 = vpop.f32.mrb[81].mxu1  ;;  %6813 = vtanh.f32 %v2033_v24 }
 0x291   : > { %v6800_v18 = vpop.eup %6799  ;;  %v3567_v26 = vpack.c.bf16 %v3452_v60, %v3451_v62  ;;  %v2055_v28 = vadd.f32 %v2054_v25, %v8163_v14  ;;  %v2056_v31 = vpop.f32.mrb[82].mxu1 }
 0x292   : > { %6815 = vrcp.f32 %v3071_v47  ;;  %v3072_v16 = vadd.f32 1.0, %v6800_v18  ;;  %v2058_v17 = vpop.f32.mrb[83].mxu1  ;;  %v6802_v22 = vpop.eup %6801 }
 0x293   : > { %6817 = vtanh.f32 %v2037_v48  ;;  %6137 = vmatprep.mubr.bf16.mxu0 %v3567_v26  ;;  %v5564_v58 = vmul.f32 -1.442695, %v2055_v28  ;;  %v2059_v52 = vadd.f32 %v2058_v17, %v8163_v14  ;;  %v5669_v28 = vld [vmem:[%s8327_s23] ss:$0 sm:$0xff] }
 0x294   : > { %v6804_v2 = vpop.eup %6803  ;;  %6819 = vrcp.f32 %v3072_v16  ;;  %2321 = vmatmul.mubr.bf16.gmra.mrb[188].mxu1 %v8171_v7  ;;  %4531 = vperm.xlu0 %6515, %v5669_v28  }
 0x295   : > { %v6806_v55 = vpop.eup %6805  ;;  %2330 = vmatprep.mubr.bf16.mxu1 %v9556_v50  ;;  %v3453_v61 = vmul.f32 %v6804_v2, %v6802_v22  ;;  %6821 = vpow2.f32 %v5564_v58  ;;  %v5565_v5 = vmul.f32 -1.442695, %v2059_v52  ;;  %v2053_v58 = vadd.f32 %v2052_v33, %v8176_v49 }
 0x296   : > { %v6808_v51 = vpop.eup %6807 }
 0x297   : > { %v6810_v24 = vpop.eup %6809  ;;  %v3454_v62 = vmul.f32 %v6808_v51, %v6806_v55  ;;  %6823 = vpow2.f32 %v5565_v5  ;;  %v2062_v15 = vpop.f32.mrb[84].mxu1  ;;  %v2057_v55 = vadd.f32 %v2056_v31, %v8176_v49 }
 0x298   : > { %v3073_v11 = vadd.f32 1.0, %v6810_v24  ;;  %v2064_v48 = vpop.f32.mrb[85].mxu1  ;;  %6825 = vtanh.f32 %v2043_v40 }
 0x299   : > { %v6812_v60 = vpop.eup %6811  ;;  %v3568_v47 = vpack.c.bf16 %v3454_v62, %v3453_v61  ;;  %v2065_v30 = vadd.f32 %v2064_v48, %v8163_v14  ;;  %v2066_v25 = vpop.f32.mrb[86].mxu1 }
 0x29a   : > { %6827 = vrcp.f32 %v3073_v11  ;;  %v3074_v18 = vadd.f32 1.0, %v6812_v60  ;;  %v2068_v26 = vpop.f32.mrb[87].mxu1  ;;  %v6814_v16 = vpop.eup %6813  ;;  %v5670_v11 = vld [vmem:[%s8327_s23 + $0x1] ss:$0 sm:$0xff] }
 0x29b   : > { %6829 = vtanh.f32 %v2047_v43  ;;  %6138 = vmatmul.mubr.bf16.gmra.mrb[136].mxu0 %v3568_v47  ;;  %v5566_v17 = vmul.f32 -1.442695, %v2065_v30  ;;  %v2069_v37 = vadd.f32 %v2068_v26, %v8163_v14  ;;  %4534 = vperm.xlu0 %6515, %v5670_v11  }
 0x29c   : > { %v6816_v22 = vpop.eup %6815  ;;  %6831 = vrcp.f32 %v3074_v18  ;;  %2331 = vmatmul.mubr.bf16.gmra.mrb[192].mxu1 %v8188_v27  ;;  %v5673_v18 = vld [vmem:[%s8327_s23 + $0x4] ss:$0 sm:$0xff] }
 0x29d   : > { %v6818_v52 = vpop.eup %6817  ;;  %2340 = vmatprep.mubr.bf16.mxu1 %v9556_v50  ;;  %v3455_v2 = vmul.f32 %v6816_v22, %v6814_v16  ;;  %6833 = vpow2.f32 %v5566_v17  ;;  %v5567_v40 = vmul.f32 -1.442695, %v2069_v37  ;;  %v2063_v37 = vadd.f32 %v2062_v15, %v8176_v49 }
 0x29e   : > { %v6820_v61 = vpop.eup %6819 }
 0x29f   : > { %v6822_v5 = vpop.eup %6821  ;;  %v3456_v51 = vmul.f32 %v6820_v61, %v6818_v52  ;;  %6835 = vpow2.f32 %v5567_v40  ;;  %v2072_v24 = vpop.f32.mrb[88].mxu1  ;;  %v2067_v52 = vadd.f32 %v2066_v25, %v8176_v49  ;;  %4543 = vperm.xlu0 %6515, %v5673_v18   ;;  %v5676_v40 = vld [vmem:[%s8327_s23 + $0x7] ss:$0 sm:$0xff]  ;;  %s5295_s23 = scalar_lea.sflag [#allocation4], %s7706_s18 }
 0x2a0   : > { %6837 = vtanh.f32 %v2053_v58  ;;  %v3075_v43 = vadd.f32 1.0, %v6822_v5  ;;  %v2074_v62 = vpop.f32.mrb[89].mxu1 }
 0x2a1   : > { %v6824_v48 = vpop.eup %6823  ;;  %v3569_v33 = vpack.c.bf16 %v3456_v51, %v3455_v2  ;;  %6839 = vtanh.f32 %v2057_v55  ;;  %v2075_v60 = vadd.f32 %v2074_v62, %v8163_v14  ;;  %v2076_v47 = vpop.f32.mrb[90].mxu1 }
 0x2a2   : > { %6841 = vrcp.f32 %v3075_v43  ;;  %v3076_v31 = vadd.f32 1.0, %v6824_v48  ;;  %v2078_v30 = vpop.f32.mrb[91].mxu1  ;;  %v6826_v26 = vpop.eup %6825 }
 0x2a3   : > { %6141 = vmatprep.mubr.bf16.mxu0 %v3569_v33  ;;  %v5568_v28 = vmul.f32 -1.442695, %v2075_v60  ;;  %v2079_v16 = vadd.f32 %v2078_v30, %v8163_v14  ;;  %4552 = vperm.xlu0 %6515, %v5676_v40  }
 0x2a4   : > { %v6828_v17 = vpop.eup %6827  ;;  %2341 = vmatmul.mubr.bf16.gmra.mrb[196].mxu1 %v8193_v10  ;;  %6843 = vrcp.f32 %v3076_v31 }
 0x2a5   : > { %v6830_v22 = vpop.eup %6829  ;;  %2350 = vmatprep.mubr.bf16.mxu1 %v9556_v50  ;;  %v3457_v58 = vmul.f32 %v6828_v17, %v6826_v26  ;;  %6845 = vpow2.f32 %v5568_v28  ;;  %v5569_v2 = vmul.f32 -1.442695, %v2079_v16  ;;  %v2073_v16 = vadd.f32 %v2072_v24, %v8176_v49 }
 0x2a6   : > { %v6832_v55 = vpop.eup %6831  ;;  %v2077_v17 = vadd.f32 %v2076_v47, %v8176_v49 }
 0x2a7   : > { %v6834_v61 = vpop.eup %6833  ;;  %v3458_v5 = vmul.f32 %v6832_v55, %v6830_v22  ;;  %6847 = vpow2.f32 %v5569_v2  ;;  %v2082_v51 = vpop.f32.mrb[92].mxu1 }
 0x2a8   : > { %6849 = vtanh.f32 %v2063_v37  ;;  %v3077_v43 = vadd.f32 1.0, %v6834_v61  ;;  %v2084_v62 = vpop.f32.mrb[93].mxu1 }
 0x2a9   : > { %v6836_v11 = vpop.eup %6835  ;;  %v3570_v15 = vpack.c.bf16 %v3458_v5, %v3457_v58  ;;  %6851 = vtanh.f32 %v2067_v52  ;;  %v2085_v48 = vadd.f32 %v2084_v62, %v8163_v14  ;;  %v2086_v33 = vpop.f32.mrb[94].mxu1 }
 0x2aa   : > { %v6838_v25 = vpop.eup %6837  ;;  %6853 = vrcp.f32 %v3077_v43  ;;  %v3078_v60 = vadd.f32 1.0, %v6836_v11  ;;  %v2088_v31 = vpop.f32.mrb[95].mxu1 }
 0x2ab   : > { %v6840_v30 = vpop.eup %6839  ;;  %6142 = vmatmul.mubr.bf16.gmra.mrb[140].mxu0 %v3570_v15  ;;  %v5570_v18 = vmul.f32 -1.442695, %v2085_v48  ;;  %v2089_v26 = vadd.f32 %v2088_v31, %v8163_v14 }
 0x2ac   : > { %v6842_v28 = vpop.eup %6841  ;;  %2351 = vmatmul.mubr.bf16.gmra.mrb[200].mxu1 %v8208_v35  ;;  %6855 = vrcp.f32 %v3078_v60 }
 0x2ad   : > { %2360 = vmatprep.mubr.bf16.mxu1 %v9556_v50  ;;  %6857 = vpow2.f32 %v5570_v18  ;;  %v5571_v37 = vmul.f32 -1.442695, %v2089_v26  ;;  %v3459_v22 = vmul.f32 %v6842_v28, %v6838_v25  ;;  %v2087_v18 = vadd.f32 %v2086_v33, %v8176_v49 }
 0x2ae   : > { %v6844_v58 = vpop.eup %6843 }
 0x2af   : > { %v6846_v52 = vpop.eup %6845  ;;  %6859 = vpow2.f32 %v5571_v37  ;;  %v2092_v2 = vpop.f32.mrb[96].mxu1  ;;  %v3460_v55 = vmul.f32 %v6844_v58, %v6840_v30  ;;  %v2083_v30 = vadd.f32 %v2082_v51, %v8176_v49 }
 0x2b0   : > { %6861 = vtanh.f32 %v2073_v16  ;;  %v3079_v40 = vadd.f32 1.0, %v6846_v52  ;;  %v2094_v61 = vpop.f32.mrb[97].mxu1 }
 0x2b1   : > { %v6848_v5 = vpop.eup %6847  ;;  %6863 = vtanh.f32 %v2077_v17  ;;  %v2095_v43 = vadd.f32 %v2094_v61, %v8163_v14  ;;  %v2096_v24 = vpop.f32.mrb[98].mxu1  ;;  %v3571_v62 = vpack.c.bf16 %v3460_v55, %v3459_v22 }
 0x2b2   : > { %v6850_v11 = vpop.eup %6849  ;;  %6865 = vrcp.f32 %v3079_v40  ;;  %v3080_v47 = vadd.f32 1.0, %v6848_v5  ;;  %v2098_v15 = vpop.f32.mrb[99].mxu1 }
 0x2b3   : > { %v6852_v48 = vpop.eup %6851  ;;  %v5572_v25 = vmul.f32 -1.442695, %v2095_v43  ;;  %v2099_v60 = vadd.f32 %v2098_v15, %v8163_v14  ;;  %6145 = vmatprep.mubr.bf16.mxu0 %v3571_v62 }
 0x2b4   : > { %v6854_v31 = vpop.eup %6853  ;;  %2361 = vmatmul.mubr.bf16.gmra.mrb[204].mxu1 %v8206_v36  ;;  %6867 = vrcp.f32 %v3080_v47 }
 0x2b5   : > { %2370 = vmatprep.mubr.bf16.mxu1 %v9556_v50  ;;  %6869 = vpow2.f32 %v5572_v25  ;;  %v5573_v26 = vmul.f32 -1.442695, %v2099_v60  ;;  %v3461_v28 = vmul.f32 %v6854_v31, %v6850_v11  ;;  %v2097_v25 = vadd.f32 %v2096_v24, %v8176_v49 }
 0x2b6   : > { %v6856_v16 = vpop.eup %6855 }
 0x2b7   : > { %v6858_v17 = vpop.eup %6857  ;;  %6871 = vpow2.f32 %v5573_v26  ;;  %v2102_v37 = vpop.f32.mrb[100].mxu1  ;;  %v3462_v22 = vmul.f32 %v6856_v16, %v6852_v48  ;;  %v2093_v48 = vadd.f32 %v2092_v2, %v8176_v49 }
 0x2b8   : > { %6873 = vtanh.f32 %v2083_v30  ;;  %v3081_v58 = vadd.f32 1.0, %v6858_v17  ;;  %v2104_v52 = vpop.f32.mrb[101].mxu1 }
 0x2b9   : > { %v6860_v55 = vpop.eup %6859  ;;  %6875 = vtanh.f32 %v2087_v18  ;;  %v2105_v40 = vadd.f32 %v2104_v52, %v8163_v14  ;;  %v2106_v51 = vpop.f32.mrb[102].mxu1  ;;  %v3572_v61 = vpack.c.bf16 %v3462_v22, %v3461_v28 }
 0x2ba   : > { %v6862_v5 = vpop.eup %6861  ;;  %6877 = vrcp.f32 %v3081_v58  ;;  %v3082_v33 = vadd.f32 1.0, %v6860_v55  ;;  %v2108_v43 = vpop.f32.mrb[103].mxu1 }
 0x2bb   : > { %v6864_v62 = vpop.eup %6863  ;;  %v5574_v11 = vmul.f32 -1.442695, %v2105_v40  ;;  %v2109_v47 = vadd.f32 %v2108_v43, %v8163_v14  ;;  %6146 = vmatmul.mubr.bf16.gmra.mrb[144].mxu0 %v3572_v61 }
 0x2bc   : > { %v6866_v15 = vpop.eup %6865  ;;  %2371 = vmatmul.mubr.bf16.gmra.mrb[208].mxu1 %v8237_v0  ;;  %6879 = vrcp.f32 %v3082_v33 }
 0x2bd   : > { %2380 = vmatprep.mubr.bf16.mxu1 %v9556_v50  ;;  %6881 = vpow2.f32 %v5574_v11  ;;  %v5575_v60 = vmul.f32 -1.442695, %v2109_v47  ;;  %v3463_v31 = vmul.f32 %v6866_v15, %v6862_v5  ;;  %v2107_v11 = vadd.f32 %v2106_v51, %v8176_v49 }
 0x2be   : > { %v6868_v30 = vpop.eup %6867 }
 0x2bf   : > { %v6870_v18 = vpop.eup %6869  ;;  %6883 = vpow2.f32 %v5575_v60  ;;  %v2112_v26 = vpop.f32.mrb[104].mxu1  ;;  %v3464_v28 = vmul.f32 %v6868_v30, %v6864_v62  ;;  %v2103_v62 = vadd.f32 %v2102_v37, %v8176_v49 }
 0x2c0   : > { %6885 = vtanh.f32 %v2093_v48  ;;  %v3083_v16 = vadd.f32 1.0, %v6870_v18  ;;  %v2114_v17 = vpop.f32.mrb[105].mxu1 }
 0x2c1   : > { %v6872_v22 = vpop.eup %6871  ;;  %6887 = vtanh.f32 %v2097_v25  ;;  %v2115_v58 = vadd.f32 %v2114_v17, %v8163_v14  ;;  %v2116_v2 = vpop.f32.mrb[106].mxu1  ;;  %v3573_v52 = vpack.c.bf16 %v3464_v28, %v3463_v31 }
 0x2c2   : > { %v6874_v55 = vpop.eup %6873  ;;  %6889 = vrcp.f32 %v3083_v16  ;;  %v3084_v24 = vadd.f32 1.0, %v6872_v22  ;;  %v2118_v40 = vpop.f32.mrb[107].mxu1 }
 0x2c3   : > { %v6876_v61 = vpop.eup %6875  ;;  %v5576_v5 = vmul.f32 -1.442695, %v2115_v58  ;;  %v2119_v33 = vadd.f32 %v2118_v40, %v8163_v14  ;;  %6149 = vmatprep.mubr.bf16.mxu0 %v3573_v52 }
 0x2c4   : > { %v6878_v43 = vpop.eup %6877  ;;  %2381 = vmatmul.mubr.bf16.gmra.mrb[212].mxu1 %v8234_v41  ;;  %6891 = vrcp.f32 %v3084_v24 }
 0x2c5   : > { %2390 = vmatprep.mubr.bf16.mxu1 %v9556_v50  ;;  %6893 = vpow2.f32 %v5576_v5  ;;  %v5577_v47 = vmul.f32 -1.442695, %v2119_v33  ;;  %v3465_v15 = vmul.f32 %v6878_v43, %v6874_v55  ;;  %v2117_v5 = vadd.f32 %v2116_v2, %v8176_v49 }
 0x2c6   : > { %v6880_v48 = vpop.eup %6879 }
 0x2c7   : > { %v6882_v25 = vpop.eup %6881  ;;  %6895 = vpow2.f32 %v5577_v47  ;;  %v2122_v60 = vpop.f32.mrb[108].mxu1  ;;  %v3466_v31 = vmul.f32 %v6880_v48, %v6876_v61  ;;  %v2113_v61 = vadd.f32 %v2112_v26, %v8176_v49 }
 0x2c8   : > { %6897 = vtanh.f32 %v2103_v62  ;;  %v3085_v30 = vadd.f32 1.0, %v6882_v25  ;;  %v2124_v18 = vpop.f32.mrb[109].mxu1 }
 0x2c9   : > { %v6884_v28 = vpop.eup %6883  ;;  %6899 = vtanh.f32 %v2107_v11  ;;  %v2125_v16 = vadd.f32 %v2124_v18, %v8163_v14  ;;  %v2126_v37 = vpop.f32.mrb[110].mxu1  ;;  %v3574_v17 = vpack.c.bf16 %v3466_v31, %v3465_v15 }
 0x2ca   : > { %v6886_v22 = vpop.eup %6885  ;;  %6901 = vrcp.f32 %v3085_v30  ;;  %v3086_v51 = vadd.f32 1.0, %v6884_v28  ;;  %v2128_v58 = vpop.f32.mrb[111].mxu1 }
 0x2cb   : > { %v6888_v52 = vpop.eup %6887  ;;  %v5578_v55 = vmul.f32 -1.442695, %v2125_v16  ;;  %v2129_v24 = vadd.f32 %v2128_v58, %v8163_v14  ;;  %6150 = vmatmul.mubr.bf16.gmra.mrb[148].mxu0 %v3574_v17 }
 0x2cc   : > { %v6890_v40 = vpop.eup %6889  ;;  %2391 = vmatmul.mubr.bf16.gmra.mrb[216].mxu1 %v8277_v23  ;;  %6903 = vrcp.f32 %v3086_v51 }
 0x2cd   : > { %2400 = vmatprep.mubr.bf16.mxu1 %v9556_v50  ;;  %6905 = vpow2.f32 %v5578_v55  ;;  %v5579_v33 = vmul.f32 -1.442695, %v2129_v24  ;;  %v3467_v43 = vmul.f32 %v6890_v40, %v6886_v22  ;;  %v2127_v55 = vadd.f32 %v2126_v37, %v8176_v49 }
 0x2ce   : > { %v6892_v62 = vpop.eup %6891 }
 0x2cf   : > { %v6894_v11 = vpop.eup %6893  ;;  %6907 = vpow2.f32 %v5579_v33  ;;  %v2132_v47 = vpop.f32.mrb[112].mxu1  ;;  %v3468_v15 = vmul.f32 %v6892_v62, %v6888_v52  ;;  %v2123_v52 = vadd.f32 %v2122_v60, %v8176_v49 }
 0x2d0   : > { %6909 = vtanh.f32 %v2113_v61  ;;  %v3087_v48 = vadd.f32 1.0, %v6894_v11  ;;  %v2134_v25 = vpop.f32.mrb[113].mxu1 }
 0x2d1   : > { %v6896_v31 = vpop.eup %6895  ;;  %6911 = vtanh.f32 %v2117_v5  ;;  %v2135_v30 = vadd.f32 %v2134_v25, %v8163_v14  ;;  %v2136_v26 = vpop.f32.mrb[114].mxu1  ;;  %v3575_v18 = vpack.c.bf16 %v3468_v15, %v3467_v43 }
 0x2d2   : > { %v6898_v28 = vpop.eup %6897  ;;  %6913 = vrcp.f32 %v3087_v48  ;;  %v3088_v2 = vadd.f32 1.0, %v6896_v31  ;;  %v2138_v16 = vpop.f32.mrb[115].mxu1 }
 0x2d3   : > { %v6900_v17 = vpop.eup %6899  ;;  %v5580_v22 = vmul.f32 -1.442695, %v2135_v30  ;;  %v2139_v51 = vadd.f32 %v2138_v16, %v8163_v14  ;;  %6153 = vmatprep.mubr.bf16.mxu0 %v3575_v18 }
 0x2d4   : > { %v6902_v58 = vpop.eup %6901  ;;  %2401 = vmatmul.mubr.bf16.gmra.mrb[220].mxu1 %v8274_v56  ;;  %6915 = vrcp.f32 %v3088_v2 }
 0x2d5   : > { %2410 = vmatprep.mubr.bf16.mxu1 %v9556_v50  ;;  %6917 = vpow2.f32 %v5580_v22  ;;  %v5581_v24 = vmul.f32 -1.442695, %v2139_v51  ;;  %v3469_v40 = vmul.f32 %v6902_v58, %v6898_v28  ;;  %v2137_v22 = vadd.f32 %v2136_v26, %v8176_v49 }
 0x2d6   : > { %v6904_v61 = vpop.eup %6903 }
 0x2d7   : > { %v6906_v5 = vpop.eup %6905  ;;  %6919 = vpow2.f32 %v5581_v24  ;;  %v2142_v33 = vpop.f32.mrb[116].mxu1  ;;  %v3470_v43 = vmul.f32 %v6904_v61, %v6900_v17  ;;  %v2133_v17 = vadd.f32 %v2132_v47, %v8176_v49 }
 0x2d8   : > { %6921 = vtanh.f32 %v2123_v52  ;;  %v3089_v62 = vadd.f32 1.0, %v6906_v5  ;;  %v2144_v11 = vpop.f32.mrb[117].mxu1 }
 0x2d9   : > { %v6908_v15 = vpop.eup %6907  ;;  %6923 = vtanh.f32 %v2127_v55  ;;  %v2145_v48 = vadd.f32 %v2144_v11, %v8163_v14  ;;  %v2146_v60 = vpop.f32.mrb[118].mxu1  ;;  %v3576_v25 = vpack.c.bf16 %v3470_v43, %v3469_v40 }
 0x2da   : > { %v6910_v31 = vpop.eup %6909  ;;  %6925 = vrcp.f32 %v3089_v62  ;;  %v3090_v37 = vadd.f32 1.0, %v6908_v15  ;;  %v2148_v30 = vpop.f32.mrb[119].mxu1 }
 0x2db   : > { %v6912_v18 = vpop.eup %6911  ;;  %v5582_v28 = vmul.f32 -1.442695, %v2145_v48  ;;  %v2149_v2 = vadd.f32 %v2148_v30, %v8163_v14  ;;  %6154 = vmatmul.mubr.bf16.gmra.mrb[152].mxu0 %v3576_v25 }
 0x2dc   : > { %v6914_v16 = vpop.eup %6913  ;;  %2411 = vmatmul.mubr.bf16.gmra.mrb[224].mxu1 %v8318_v59  ;;  %6927 = vrcp.f32 %v3090_v37 }
 0x2dd   : > { %2420 = vmatprep.mubr.bf16.mxu1 %v9556_v50  ;;  %6929 = vpow2.f32 %v5582_v28  ;;  %v5583_v51 = vmul.f32 -1.442695, %v2149_v2  ;;  %v3471_v58 = vmul.f32 %v6914_v16, %v6910_v31  ;;  %v2147_v28 = vadd.f32 %v2146_v60, %v8176_v49 }
 0x2de   : > { %v6916_v52 = vpop.eup %6915 }
 0x2df   : > { %v6918_v55 = vpop.eup %6917  ;;  %6931 = vpow2.f32 %v5583_v51  ;;  %v2152_v24 = vpop.f32.mrb[120].mxu1  ;;  %v3472_v40 = vmul.f32 %v6916_v52, %v6912_v18  ;;  %v2143_v18 = vadd.f32 %v2142_v33, %v8176_v49 }
 0x2e0   : > { %6933 = vtanh.f32 %v2133_v17  ;;  %v3091_v61 = vadd.f32 1.0, %v6918_v55  ;;  %v2154_v5 = vpop.f32.mrb[121].mxu1 }
 0x2e1   : > { %v6920_v43 = vpop.eup %6919  ;;  %6935 = vtanh.f32 %v2137_v22  ;;  %v2155_v62 = vadd.f32 %v2154_v5, %v8163_v14  ;;  %v2156_v47 = vpop.f32.mrb[122].mxu1  ;;  %v3577_v11 = vpack.c.bf16 %v3472_v40, %v3471_v58 }
 0x2e2   : > { %v6922_v15 = vpop.eup %6921  ;;  %6937 = vrcp.f32 %v3091_v61  ;;  %v3092_v26 = vadd.f32 1.0, %v6920_v43  ;;  %v2158_v48 = vpop.f32.mrb[123].mxu1 }
 0x2e3   : > { %v6924_v25 = vpop.eup %6923  ;;  %v5584_v31 = vmul.f32 -1.442695, %v2155_v62  ;;  %v2159_v37 = vadd.f32 %v2158_v48, %v8163_v14  ;;  %6157 = vmatprep.mubr.bf16.mxu0 %v3577_v11 }
 0x2e4   : > { %v6926_v30 = vpop.eup %6925  ;;  %2421 = vmatmul.mubr.bf16.gmra.mrb[228].mxu1 %v8315_v46  ;;  %6939 = vrcp.f32 %v3092_v26 }
 0x2e5   : > { %2430 = vmatprep.mubr.bf16.mxu1 %v9556_v50  ;;  %6941 = vpow2.f32 %v5584_v31  ;;  %v5585_v2 = vmul.f32 -1.442695, %v2159_v37  ;;  %v3473_v16 = vmul.f32 %v6926_v30, %v6922_v15  ;;  %v2157_v31 = vadd.f32 %v2156_v47, %v8176_v49 }
 0x2e6   : > { %v6928_v17 = vpop.eup %6927 }
 0x2e7   : > { %v6930_v22 = vpop.eup %6929  ;;  %6943 = vpow2.f32 %v5585_v2  ;;  %v2162_v51 = vpop.f32.mrb[124].mxu1  ;;  %v3474_v58 = vmul.f32 %v6928_v17, %v6924_v25  ;;  %v2153_v25 = vadd.f32 %v2152_v24, %v8176_v49 }
 0x2e8   : > { %6945 = vtanh.f32 %v2143_v18  ;;  %v3093_v52 = vadd.f32 1.0, %v6930_v22  ;;  %v2164_v55 = vpop.f32.mrb[125].mxu1 }
 0x2e9   : > { %v6932_v40 = vpop.eup %6931  ;;  %6947 = vtanh.f32 %v2147_v28  ;;  %v2165_v61 = vadd.f32 %v2164_v55, %v8163_v14  ;;  %v2166_v33 = vpop.f32.mrb[126].mxu1  ;;  %v3578_v5 = vpack.c.bf16 %v3474_v58, %v3473_v16 }
 0x2ea   : > { %v6934_v43 = vpop.eup %6933  ;;  %6949 = vrcp.f32 %v3093_v52  ;;  %v3094_v60 = vadd.f32 1.0, %v6932_v40  ;;  %v2168_v62 = vpop.f32.mrb[127].mxu1 }
 0x2eb   : > { %v6936_v11 = vpop.eup %6935  ;;  %v5586_v15 = vmul.f32 -1.442695, %v2165_v61  ;;  %v2169_v26 = vadd.f32 %v2168_v62, %v8163_v14  ;;  %6158 = vmatmul.mubr.bf16.gmra.mrb[156].mxu0 %v3578_v5 }
 0x2ec   : > { %v6938_v48 = vpop.eup %6937  ;;  %2431 = vmatmul.mubr.bf16.gmra.mrb[232].mxu1 %v8355_v32  ;;  %6951 = vrcp.f32 %v3094_v60 }
 0x2ed   : > { %2440 = vmatprep.mubr.bf16.mxu1 %v9556_v50  ;;  %6953 = vpow2.f32 %v5586_v15  ;;  %v5587_v37 = vmul.f32 -1.442695, %v2169_v26  ;;  %v3475_v30 = vmul.f32 %v6938_v48, %v6934_v43  ;;  %v2167_v15 = vadd.f32 %v2166_v33, %v8176_v49 }
 0x2ee   : > { %v6940_v18 = vpop.eup %6939 }
 0x2ef   : > { %v6942_v28 = vpop.eup %6941  ;;  %6955 = vpow2.f32 %v5587_v37  ;;  %v2172_v2 = vpop.f32.mrb[128].mxu1  ;;  %v3476_v16 = vmul.f32 %v6940_v18, %v6936_v11  ;;  %v2163_v11 = vadd.f32 %v2162_v51, %v8176_v49 }
 0x2f0   : > { %6957 = vtanh.f32 %v2153_v25  ;;  %v3095_v17 = vadd.f32 1.0, %v6942_v28  ;;  %v2174_v22 = vpop.f32.mrb[129].mxu1 }
 0x2f1   : > { %v6944_v58 = vpop.eup %6943  ;;  %6959 = vtanh.f32 %v2157_v31  ;;  %v2175_v52 = vadd.f32 %v2174_v22, %v8163_v14  ;;  %v2176_v24 = vpop.f32.mrb[130].mxu1  ;;  %v3579_v55 = vpack.c.bf16 %v3476_v16, %v3475_v30 }
 0x2f2   : > { %v6946_v40 = vpop.eup %6945  ;;  %6961 = vrcp.f32 %v3095_v17  ;;  %v3096_v47 = vadd.f32 1.0, %v6944_v58  ;;  %v2178_v61 = vpop.f32.mrb[131].mxu1 }
 0x2f3   : > { %v6948_v5 = vpop.eup %6947  ;;  %v5588_v43 = vmul.f32 -1.442695, %v2175_v52  ;;  %v2179_v60 = vadd.f32 %v2178_v61, %v8163_v14  ;;  %6161 = vmatprep.mubr.bf16.mxu0 %v3579_v55 }
 0x2f4   : > { %v6950_v62 = vpop.eup %6949  ;;  %2441 = vmatmul.mubr.bf16.gmra.mrb[236].mxu1 %v8352_v6  ;;  %6963 = vrcp.f32 %v3096_v47 }
 0x2f5   : > { %2450 = vmatprep.mubr.bf16.mxu1 %v9556_v50  ;;  %6965 = vpow2.f32 %v5588_v43  ;;  %v5589_v26 = vmul.f32 -1.442695, %v2179_v60  ;;  %v3477_v48 = vmul.f32 %v6950_v62, %v6946_v40  ;;  %v2177_v43 = vadd.f32 %v2176_v24, %v8176_v49 }
 0x2f6   : > { %v6952_v25 = vpop.eup %6951 }
 0x2f7   : > { %v6954_v31 = vpop.eup %6953  ;;  %6967 = vpow2.f32 %v5589_v26  ;;  %v2182_v37 = vpop.f32.mrb[132].mxu1  ;;  %v3478_v30 = vmul.f32 %v6952_v25, %v6948_v5  ;;  %v2173_v5 = vadd.f32 %v2172_v2, %v8176_v49 }
 0x2f8   : > { %6969 = vtanh.f32 %v2163_v11  ;;  %v3097_v18 = vadd.f32 1.0, %v6954_v31  ;;  %v2184_v28 = vpop.f32.mrb[133].mxu1 }
 0x2f9   : > { %v6956_v16 = vpop.eup %6955  ;;  %6971 = vtanh.f32 %v2167_v15  ;;  %v2185_v17 = vadd.f32 %v2184_v28, %v8163_v14  ;;  %v2186_v51 = vpop.f32.mrb[134].mxu1  ;;  %v3580_v22 = vpack.c.bf16 %v3478_v30, %v3477_v48 }
 0x2fa   : > { %v6958_v58 = vpop.eup %6957  ;;  %6973 = vrcp.f32 %v3097_v18  ;;  %v3098_v33 = vadd.f32 1.0, %v6956_v16  ;;  %v2188_v52 = vpop.f32.mrb[135].mxu1 }
 0x2fb   : > { %v6960_v55 = vpop.eup %6959  ;;  %v5590_v40 = vmul.f32 -1.442695, %v2185_v17  ;;  %v2189_v47 = vadd.f32 %v2188_v52, %v8163_v14  ;;  %6162 = vmatmul.mubr.bf16.gmra.mrb[160].mxu0 %v3580_v22 }
 0x2fc   : > { %v6962_v61 = vpop.eup %6961  ;;  %2451 = vmatmul.mubr.bf16.gmra.mrb[240].mxu1 %v7976_v1  ;;  %6975 = vrcp.f32 %v3098_v33 }
 0x2fd   : > { %2460 = vmatprep.mubr.bf16.mxu1 %v9556_v50  ;;  %6977 = vpow2.f32 %v5590_v40  ;;  %v5591_v60 = vmul.f32 -1.442695, %v2189_v47  ;;  %v3479_v62 = vmul.f32 %v6962_v61, %v6958_v58  ;;  %v2187_v40 = vadd.f32 %v2186_v51, %v8176_v49 }
 0x2fe   : > { %v6964_v11 = vpop.eup %6963 }
 0x2ff   : > { %v6966_v15 = vpop.eup %6965  ;;  %6979 = vpow2.f32 %v5591_v60  ;;  %v2192_v26 = vpop.f32.mrb[136].mxu1  ;;  %v3480_v48 = vmul.f32 %v6964_v11, %v6960_v55  ;;  %v2183_v55 = vadd.f32 %v2182_v37, %v8176_v49 }
 0x300   : > { %6981 = vtanh.f32 %v2173_v5  ;;  %v3099_v25 = vadd.f32 1.0, %v6966_v15  ;;  %v2194_v31 = vpop.f32.mrb[137].mxu1 }
 0x301   : > { %v6968_v30 = vpop.eup %6967  ;;  %6983 = vtanh.f32 %v2177_v43  ;;  %v2195_v18 = vadd.f32 %v2194_v31, %v8163_v14  ;;  %v2196_v2 = vpop.f32.mrb[138].mxu1  ;;  %v3581_v28 = vpack.c.bf16 %v3480_v48, %v3479_v62 }
 0x302   : > { %v6970_v16 = vpop.eup %6969  ;;  %6985 = vrcp.f32 %v3099_v25  ;;  %v3100_v24 = vadd.f32 1.0, %v6968_v30  ;;  %v2198_v17 = vpop.f32.mrb[139].mxu1 }
 0x303   : > { %v6972_v22 = vpop.eup %6971  ;;  %v5592_v58 = vmul.f32 -1.442695, %v2195_v18  ;;  %v2199_v33 = vadd.f32 %v2198_v17, %v8163_v14  ;;  %6165 = vmatprep.mubr.bf16.mxu0 %v3581_v28 }
 0x304   : > { %v6974_v52 = vpop.eup %6973  ;;  %2461 = vmatmul.mubr.bf16.gmra.mrb[244].mxu1 %v7980_v9  ;;  %6987 = vrcp.f32 %v3100_v24 }
 0x305   : > { %2470 = vmatprep.mubr.bf16.mxu1 %v9556_v50  ;;  %6989 = vpow2.f32 %v5592_v58  ;;  %v5593_v47 = vmul.f32 -1.442695, %v2199_v33  ;;  %v3481_v61 = vmul.f32 %v6974_v52, %v6970_v16  ;;  %v8490_v58 = vld [vmem:[%s9464_s8 + $0x2] ss:$0 sm:$0xff]  ;;  %v2197_v33 = vadd.f32 %v2196_v2, %v8176_v49 }
 0x306   : > { %v6976_v5 = vpop.eup %6975 }
 0x307   : > { %v6978_v43 = vpop.eup %6977  ;;  %6991 = vpow2.f32 %v5593_v47  ;;  %v8481_v60 = vpop.f32.mrb[140].mxu1  ;;  %v3482_v62 = vmul.f32 %v6976_v5, %v6972_v22  ;;  %v2193_v22 = vadd.f32 %v2192_v26, %v8176_v49 }
 0x308   : > { %6993 = vtanh.f32 %v2183_v55  ;;  %v3101_v11 = vadd.f32 1.0, %v6978_v43  ;;  %v2204_v15 = vpop.f32.mrb[141].mxu1  ;;  %v8497_v43 = vpop.permute.xlu1 %4537 }
 0x309   : > { %v6980_v48 = vpop.eup %6979  ;;  %6995 = vtanh.f32 %v2187_v40  ;;  %v2205_v37 = vadd.f32 %v2204_v15, %v8163_v14  ;;  %v2206_v25 = vpop.f32.mrb[142].mxu1  ;;  %v3582_v31 = vpack.c.bf16 %v3482_v62, %v3481_v61  ;;  %v9571_v61 = vlaneseq }
 0x30a   : > { %v6982_v30 = vpop.eup %6981  ;;  %6997 = vrcp.f32 %v3101_v11  ;;  %v3102_v51 = vadd.f32 1.0, %v6980_v48  ;;  %v2208_v18 = vpop.f32.mrb[143].mxu1 }
 0x30b   : > { %v6984_v28 = vpop.eup %6983  ;;  %v5594_v16 = vmul.f32 -1.442695, %v2205_v37  ;;  %v2209_v24 = vadd.f32 %v2208_v18, %v8163_v14  ;;  %6166 = vmatmul.mubr.bf16.gmra.mrb[164].mxu0 %v3582_v31  ;;  %v8495_v5 = vand.u32 127, %v9571_v61 }
 0x30c   : > { %v6986_v17 = vpop.eup %6985  ;;  %2471 = vmatmul.mubr.bf16.gmra.mrb[248].mxu1 %v7999_v44  ;;  %6999 = vrcp.f32 %v3102_v51 }
 0x30d   : > { %2480 = vmatprep.mubr.bf16.mxu1 %v9556_v50  ;;  %7001 = vpow2.f32 %v5594_v16  ;;  %v5595_v52 = vmul.f32 -1.442695, %v2209_v24  ;;  %v3483_v55 = vmul.f32 %v6986_v17, %v6982_v30  ;;  %vm4556_vm0 = vcmp.lt.s32.totalorder %v8495_v5, %v8497_v43 }
 0x30e   : > { %v6988_v40 = vpop.eup %6987  ;;  %v6115_v47 = vpop.f32.mrb[112].mxu0 }
 0x30f   : > { %v6990_v26 = vpop.eup %6989  ;;  %v3721_v62 = vpop.f32.mrb[113].mxu0  ;;  %7003 = vpow2.f32 %v5595_v52  ;;  %v3484_v11 = vmul.f32 %v6988_v40, %v6984_v28 }
 0x310   : > { %v8499_v15 = vpop.f32.mrb[144].mxu1  ;;  %v3722_v48 = vadd.f32 %v8490_v58, %v3721_v62  ;;  %v6116_v37 = vpop.f32.mrb[114].mxu0  ;;  %7005 = vtanh.f32 %v2193_v22  ;;  %v3103_v2 = vadd.f32 1.0, %v6990_v26  ;;  %v2203_v62 = vadd.f32 %v8481_v60, %v8176_v49 }
 0x311   : > { %v2214_v31 = vpop.f32.mrb[145].mxu1  ;;  %v6992_v30 = vpop.eup %6991  ;;  %7007 = vtanh.f32 %v2197_v33  ;;  %v3583_v18 = vpack.c.bf16 %v3484_v11, %v3483_v55  ;;  %v2207_v11 = vadd.f32 %v2206_v25, %v8176_v49  ;;  %v3730_v60 = vadd.f32 %v6115_v47, %v8490_v58 }
 0x312   : > { %v3724_v51 = vpop.f32.mrb[115].mxu0  ;;  %v2215_v16 = vadd.f32 %v2214_v31, %v8163_v14  ;;  %v2216_v24 = vpop.f32.mrb[146].mxu1  ;;  %4232 = vxpose.xlu1.b32.start [1/16] (narrow) %v3722_v48, 8  ;;  %7009 = vrcp.f32 %v3103_v2  ;;  %v3104_v28 = vadd.f32 1.0, %v6992_v30 }
 0x313   : > { %v6994_v17 = vpop.eup %6993  ;;  %v2218_v52 = vpop.f32.mrb[147].mxu1  ;;  %6169 = vmatprep.mubr.bf16.mxu0 %v3583_v18  ;;  %v3725_v55 = vadd.f32 %v8490_v58, %v3724_v51 }
 0x314   : > { %v8505_v40 = vpop.permute.xlu1 %4540  ;;  %v6996_v22 = vpop.eup %6995  ;;  %v5596_v61 = vmul.f32 -1.442695, %v2215_v16  ;;  %v2219_v26 = vadd.f32 %v2218_v52, %v8163_v14  ;;  %2481 = vmatmul.mubr.bf16.gmra.mrb[252].mxu1 %v8002_v53  ;;  %7011 = vrcp.f32 %v3104_v28 }
 0x315   : > { %vm4557_vm1 = vcmp.lt.s32.totalorder %v8495_v5, %v8505_v40  ;;  %v6998_v33 = vpop.eup %6997  ;;  %2490 = vmatprep.mubr.bf16.mxu1 %v9556_v50 }
 0x316   : > { %v3485_v48 = vmul.f32 %v6998_v33, %v6994_v17  ;;  %7013 = vpow2.f32 %v5596_v61  ;;  %v5597_v2 = vmul.f32 -1.442695, %v2219_v26  ;;  %v7000_v31 = vpop.eup %6999  ;;  %4233 = vxpose.xlu1.b32.cont [2/16] (narrow) %v3725_v55, 8 }
 0x317   : > { %v7002_v18 = vpop.eup %7001  ;;  %v3486_v16 = vmul.f32 %v7000_v31, %v6996_v22  ;;  %v8518_v51 = vpop.f32.mrb[148].mxu1 }
 0x318   : > { %v8516_v30 = vpop.permute.xlu1 %4546  ;;  %7015 = vpow2.f32 %v5597_v2  ;;  %v3105_v28 = vadd.f32 1.0, %v7002_v18  ;;  %v2224_v25 = vpop.f32.mrb[149].mxu1 }
 0x319   : > { %vm4559_vm2 = vcmp.lt.s32.totalorder %v8495_v5, %v8516_v30  ;;  %7017 = vtanh.f32 %v2203_v62  ;;  %v7004_v17 = vpop.eup %7003  ;;  %v3584_v52 = vpack.c.bf16 %v3486_v16, %v3485_v48  ;;  %v2225_v61 = vadd.f32 %v2224_v25, %v8163_v14  ;;  %v2226_v26 = vpop.f32.mrb[150].mxu1 }
 0x31a   : > { %7019 = vtanh.f32 %v2207_v11  ;;  %v7006_v33 = vpop.eup %7005  ;;  %4234 = vxpose.xlu1.b32.cont [3/16] (narrow) %v3730_v60, 8  ;;  %v3106_v22 = vadd.f32 1.0, %v7004_v17  ;;  %v2228_v55 = vpop.f32.mrb[151].mxu1  ;;  %v3733_v62 = vadd.f32 %v6116_v37, %v8490_v58  ;;  %v2213_v11 = vadd.f32 %v8499_v15, %v8176_v49 }
 0x31b   : > { %7021 = vrcp.f32 %v3105_v28  ;;  %v7008_v2 = vpop.eup %7007  ;;  %6170 = vmatmul.mubr.bf16.gmra.mrb[168].mxu0 %v3584_v52  ;;  %v5598_v31 = vmul.f32 -1.442695, %v2225_v61  ;;  %v2229_v53 = vadd.f32 %v2228_v55, %v8163_v14  ;;  %v8529_v48 = vpop.permute.xlu0 %4531  ;;  %v2217_v16 = vadd.f32 %v2216_v24, %v8176_v49 }
 0x31c   : > { %v7010_v47 = vpop.eup %7009  ;;  %2491 = vmatmul.mubr.bf16.gmra.mrb[0].mxu1 %v8012_v4  ;;  %7023 = vrcp.f32 %v3106_v22  ;;  %vm4554_vm4 = vcmp.lt.s32.totalorder %v8495_v5, %v8529_v48 }
 0x31d   : > { %2500 = vmatprep.mubr.bf16.mxu1 %v9556_v50  ;;  %v3487_v18 = vmul.f32 %v7010_v47, %v7006_v33  ;;  %7025 = vpow2.f32 %v5598_v31  ;;  %v5599_v60 = vmul.f32 -1.442695, %v2229_v53 }
 0x31e   : > { %v7012_v28 = vpop.eup %7011  ;;  %v6119_v25 = vpop.f32.mrb[116].mxu0  ;;  %4235 = vxpose.xlu1.b32.cont [4/16] (narrow) %v3733_v62, 8 }
 0x31f   : > { %v3737_v37 = vpop.f32.mrb[117].mxu0  ;;  %v3488_v52 = vmul.f32 %v7012_v28, %v7008_v2  ;;  %7027 = vpow2.f32 %v5599_v60  ;;  %v2232_v61 = vpop.f32.mrb[152].mxu1 }
 0x320   : > { %v7014_v17 = vpop.eup %7013  ;;  %v3738_v22 = vadd.f32 %v8490_v58, %v3737_v37  ;;  %v6120_v15 = vpop.f32.mrb[118].mxu0  ;;  %7029 = vtanh.f32 %v2213_v11 }
 0x321   : > { %v3107_v55 = vadd.f32 1.0, %v7014_v17  ;;  %v2234_v4 = vpop.f32.mrb[153].mxu1  ;;  %v3740_v33 = vpop.f32.mrb[119].mxu0  ;;  %v3585_v47 = vpack.c.bf16 %v3488_v52, %v3487_v18  ;;  %7031 = vtanh.f32 %v2217_v16  ;;  %v2227_v18 = vadd.f32 %v2226_v26, %v8176_v49 }
 0x322   : > { %v7016_v44 = vpop.eup %7015  ;;  %v2235_v53 = vadd.f32 %v2234_v4, %v8163_v14  ;;  %v2236_v24 = vpop.f32.mrb[154].mxu1  ;;  %4236 = vxpose.xlu1.b32.cont [5/16] (narrow) %v3738_v22, 8  ;;  %v3741_v9 = vadd.f32 %v8490_v58, %v3740_v33  ;;  %v2223_v4 = vadd.f32 %v8518_v51, %v8176_v49  ;;  %v3746_v51 = vadd.f32 %v6119_v25, %v8490_v58 }
 0x323   : > { %v7018_v31 = vpop.eup %7017  ;;  %7033 = vrcp.f32 %v3107_v55  ;;  %v3108_v62 = vadd.f32 1.0, %v7016_v44  ;;  %v2238_v2 = vpop.f32.mrb[155].mxu1  ;;  %6173 = vmatprep.mubr.bf16.mxu0 %v3585_v47 }
 0x324   : > { %v8535_v60 = vpop.permute.xlu0 %4534  ;;  %v7020_v28 = vpop.eup %7019  ;;  %v5600_v37 = vmul.f32 -1.442695, %v2235_v53  ;;  %v2239_v11 = vadd.f32 %v2238_v2, %v8163_v14  ;;  %2501 = vmatmul.mubr.bf16.gmra.mrb[4].mxu1 %v8008_v63 }
 0x325   : > { %v7022_v17 = vpop.eup %7021  ;;  %7035 = vrcp.f32 %v3108_v62  ;;  %2510 = vmatprep.mubr.bf16.mxu1 %v9556_v50  ;;  %vm4555_vm6 = vcmp.lt.s32.totalorder %v8495_v5, %v8535_v60 }
 0x326   : > { %v3489_v44 = vmul.f32 %v7022_v17, %v7018_v31  ;;  %7037 = vpow2.f32 %v5600_v37  ;;  %v5601_v16 = vmul.f32 -1.442695, %v2239_v11  ;;  %v7024_v52 = vpop.eup %7023  ;;  %4237 = vxpose.xlu1.b32.cont [6/16] (narrow) %v3741_v9, 8 }
 0x327   : > { %v7026_v55 = vpop.eup %7025  ;;  %v3490_v47 = vmul.f32 %v7024_v52, %v7020_v28  ;;  %v2242_v33 = vpop.f32.mrb[156].mxu1 }
 0x328   : > { %v8544_v22 = vpop.permute.xlu0 %4543  ;;  %7039 = vpow2.f32 %v5601_v16  ;;  %v3109_v53 = vadd.f32 1.0, %v7026_v55  ;;  %v2244_v31 = vpop.f32.mrb[157].mxu1 }
 0x329   : > { %vm4558_vm3 = vcmp.lt.s32.totalorder %v8495_v5, %v8544_v22  ;;  %7041 = vtanh.f32 %v2223_v4  ;;  %v7028_v62 = vpop.eup %7027  ;;  %v3586_v26 = vpack.c.bf16 %v3490_v47, %v3489_v44  ;;  %v2245_v2 = vadd.f32 %v2244_v31, %v8163_v14  ;;  %v2246_v9 = vpop.f32.mrb[158].mxu1 }
 0x32a   : > { %7043 = vtanh.f32 %v2227_v18  ;;  %v7030_v37 = vpop.eup %7029  ;;  %4238 = vxpose.xlu1.b32.cont [7/16] (narrow) %v3746_v51, 8  ;;  %v3110_v28 = vadd.f32 1.0, %v7028_v62  ;;  %v2248_v11 = vpop.f32.mrb[159].mxu1  ;;  %v3749_v4 = vadd.f32 %v6120_v15, %v8490_v58  ;;  %v2233_v44 = vadd.f32 %v2232_v61, %v8176_v49 }
 0x32b   : > { %7045 = vrcp.f32 %v3109_v53  ;;  %v7032_v17 = vpop.eup %7031  ;;  %6174 = vmatmul.mubr.bf16.gmra.mrb[172].mxu0 %v3586_v26  ;;  %v5602_v16 = vmul.f32 -1.442695, %v2245_v2  ;;  %v2249_v52 = vadd.f32 %v2248_v11, %v8163_v14  ;;  %v2237_v18 = vadd.f32 %v2236_v24, %v8176_v49 }
 0x32c   : > { %2511 = vmatmul.mubr.bf16.gmra.mrb[8].mxu1 %v8032_v45  ;;  %7047 = vrcp.f32 %v3110_v28 }
 0x32d   : > { %v7034_v25 = vpop.eup %7033  ;;  %2520 = vmatprep.mubr.bf16.mxu1 %v9556_v50  ;;  %7049 = vpow2.f32 %v5602_v16  ;;  %v5603_v55 = vmul.f32 -1.442695, %v2249_v52 }
 0x32e   : > { %v3491_v47 = vmul.f32 %v7034_v25, %v7030_v37  ;;  %v6123_v53 = vpop.f32.mrb[120].mxu0  ;;  %4239 = vxpose.xlu1.b32.cont [8/16] (narrow) %v3749_v4, 8 }
 0x32f   : > { %v7036_v51 = vpop.eup %7035  ;;  %v3753_v62 = vpop.f32.mrb[121].mxu0  ;;  %7051 = vpow2.f32 %v5603_v55 }
 0x330   : > { %v7038_v31 = vpop.eup %7037  ;;  %v2252_v26 = vpop.f32.mrb[160].mxu1  ;;  %v3492_v15 = vmul.f32 %v7036_v51, %v7032_v17  ;;  %v3754_v2 = vadd.f32 %v8490_v58, %v3753_v62  ;;  %7053 = vtanh.f32 %v2233_v44 }
 0x331   : > { %v6124_v28 = vpop.f32.mrb[122].mxu0  ;;  %v3111_v61 = vadd.f32 1.0, %v7038_v31  ;;  %v2254_v11 = vpop.f32.mrb[161].mxu1  ;;  %7055 = vtanh.f32 %v2237_v18  ;;  %v2243_v18 = vadd.f32 %v2242_v33, %v8176_v49 }
 0x332   : > { %v7040_v50 = vpop.eup %7039  ;;  %v3756_v45 = vpop.f32.mrb[123].mxu0  ;;  %v2255_v24 = vadd.f32 %v2254_v11, %v8163_v14  ;;  %v3587_v16 = vpack.c.bf16 %v3492_v15, %v3491_v47  ;;  %4240 = vxpose.xlu1.b32.cont [9/16] (narrow) %v3754_v2, 8  ;;  %v2247_v47 = vadd.f32 %v2246_v9, %v8176_v49 }
 0x333   : > { %v2256_v37 = vpop.f32.mrb[162].mxu1  ;;  %v7042_v52 = vpop.eup %7041  ;;  %7057 = vrcp.f32 %v3111_v61  ;;  %v3112_v25 = vadd.f32 1.0, %v7040_v50  ;;  %v3757_v31 = vadd.f32 %v8490_v58, %v3756_v45 }
 0x334   : > { %v2258_v4 = vpop.f32.mrb[163].mxu1  ;;  %v7044_v55 = vpop.eup %7043  ;;  %v5604_v17 = vmul.f32 -1.442695, %v2255_v24  ;;  %6177 = vmatprep.mubr.bf16.mxu0 %v3587_v16  ;;  %2521 = vmatmul.mubr.bf16.gmra.mrb[12].mxu1 %v8029_v42  ;;  %v3762_v24 = vadd.f32 %v6123_v53, %v8490_v58 }
 0x335   : > { %v2259_v51 = vadd.f32 %v2258_v4, %v8163_v14  ;;  %v7046_v44 = vpop.eup %7045  ;;  %7059 = vrcp.f32 %v3112_v25  ;;  %6277 = vmatprep.mubr.msk.bf16.mxu1 %vm7543_vm7, %v9563_v57 }
 0x336   : > { %7061 = vpow2.f32 %v5604_v17  ;;  %v3493_v15 = vmul.f32 %v7046_v44, %v7042_v52  ;;  %v7048_v2 = vpop.eup %7047  ;;  %4241 = vxpose.xlu1.b32.cont [10/16] (narrow) %v3757_v31, 8 }
 0x337   : > { %v5605_v62 = vmul.f32 -1.442695, %v2259_v51  ;;  %v7050_v61 = vpop.eup %7049  ;;  %v2262_v11 = vpop.f32.mrb[164].mxu1  ;;  %v3494_v50 = vmul.f32 %v7048_v2, %v7044_v55 }
 0x338   : > { %v3113_v45 = vadd.f32 1.0, %v7050_v61  ;;  %v2264_v16 = vpop.f32.mrb[165].mxu1 }
 0x339   : > { %7063 = vpow2.f32 %v5605_v62  ;;  %v7052_v4 = vpop.eup %7051  ;;  %v2265_v33 = vadd.f32 %v2264_v16, %v8163_v14  ;;  %v2266_v25 = vpop.f32.mrb[166].mxu1  ;;  %v3588_v9 = vpack.c.bf16 %v3494_v50, %v3493_v15  ;;  %v2257_v62 = vadd.f32 %v2256_v37, %v8176_v49 }
 0x33a   : > { %7065 = vtanh.f32 %v2243_v18  ;;  %v7054_v17 = vpop.eup %7053  ;;  %4242 = vxpose.xlu1.b32.cont [11/16] (narrow) %v3762_v24, 8  ;;  %v3114_v52 = vadd.f32 1.0, %v7052_v4  ;;  %v2268_v51 = vpop.f32.mrb[167].mxu1  ;;  %v3765_v18 = vadd.f32 %v6124_v28, %v8490_v58 }
 0x33b   : > { %7067 = vtanh.f32 %v2247_v47  ;;  %v7056_v44 = vpop.eup %7055  ;;  %v5606_v31 = vmul.f32 -1.442695, %v2265_v33  ;;  %v2269_v55 = vadd.f32 %v2268_v51, %v8163_v14  ;;  %6178 = vmatmul.mubr.bf16.gmra.mrb[176].mxu0 %v3588_v9  ;;  %v2253_v47 = vadd.f32 %v2252_v26, %v8176_v49 }
 0x33c   : > { %7069 = vrcp.f32 %v3113_v45 }
 0x33d   : > { %v7058_v53 = vpop.eup %7057  ;;  %7071 = vrcp.f32 %v3114_v52  ;;  %v5607_v15 = vmul.f32 -1.442695, %v2269_v55 }
 0x33e   : > { %7073 = vpow2.f32 %v5606_v31  ;;  %v3495_v2 = vmul.f32 %v7058_v53, %v7054_v17  ;;  %v6127_v50 = vpop.f32.mrb[124].mxu0  ;;  %4243 = vxpose.xlu1.b32.cont [12/16] (narrow) %v3765_v18, 8 }
 0x33f   : > { %v7060_v61 = vpop.eup %7059  ;;  %v3769_v45 = vpop.f32.mrb[125].mxu0  ;;  %7075 = vpow2.f32 %v5607_v15 }
 0x340   : > { %v7062_v24 = vpop.eup %7061  ;;  %v2272_v16 = vpop.f32.mrb[168].mxu1  ;;  %v3496_v4 = vmul.f32 %v7060_v61, %v7056_v44  ;;  %v3770_v33 = vadd.f32 %v8490_v58, %v3769_v45  ;;  %7077 = vtanh.f32 %v2253_v47  ;;  %v2267_v45 = vadd.f32 %v2266_v25, %v8176_v49 }
 0x341   : > { %v6128_v9 = vpop.f32.mrb[126].mxu0  ;;  %v3115_v28 = vadd.f32 1.0, %v7062_v24  ;;  %v2274_v52 = vpop.f32.mrb[169].mxu1  ;;  %7079 = vtanh.f32 %v2257_v62  ;;  %v2263_v62 = vadd.f32 %v2262_v11, %v8176_v49 }
 0x342   : > { %v3772_v51 = vpop.f32.mrb[127].mxu0  ;;  %v2275_v37 = vadd.f32 %v2274_v52, %v8163_v14  ;;  %v2276_v17 = vpop.f32.mrb[170].mxu1  ;;  %v3589_v31 = vpack.c.bf16 %v3496_v4, %v3495_v2  ;;  %4244 = vxpose.xlu1.b32.cont [13/16] (narrow) %v3770_v33, 8 }
 0x343   : > { %v7064_v26 = vpop.eup %7063  ;;  %7081 = vrcp.f32 %v3115_v28  ;;  %v2278_v18 = vpop.f32.mrb[171].mxu1  ;;  %v3773_v24 = vadd.f32 %v8490_v58, %v3772_v51 }
 0x344   : > { %v7066_v55 = vpop.eup %7065  ;;  %v3116_v53 = vadd.f32 1.0, %v7064_v26  ;;  %v5608_v44 = vmul.f32 -1.442695, %v2275_v37  ;;  %v2279_v61 = vadd.f32 %v2278_v18, %v8163_v14  ;;  %6181 = vmatprep.mubr.bf16.mxu0 %v3589_v31  ;;  %v3778_v37 = vadd.f32 %v6127_v50, %v8490_v58 }
 0x345   : > { %v7068_v15 = vpop.eup %7067 }
 0x346   : > { %v7070_v47 = vpop.eup %7069  ;;  %7083 = vrcp.f32 %v3116_v53  ;;  %v5609_v2 = vmul.f32 -1.442695, %v2279_v61  ;;  %4245 = vxpose.xlu1.b32.cont [14/16] (narrow) %v3773_v24, 8 }
 0x347   : > { %7085 = vpow2.f32 %v5608_v44  ;;  %v3497_v4 = vmul.f32 %v7070_v47, %v7066_v55  ;;  %v7072_v33 = vpop.eup %7071  ;;  %v2282_v52 = vpop.f32.mrb[172].mxu1 }
 0x348   : > { %v7074_v28 = vpop.eup %7073  ;;  %7087 = vpow2.f32 %v5609_v2  ;;  %v3498_v26 = vmul.f32 %v7072_v33, %v7068_v15  ;;  %v2284_v18 = vpop.f32.mrb[173].mxu1  ;;  %v2277_v2 = vadd.f32 %v2276_v17, %v8176_v49 }
 0x349   : > { %7089 = vtanh.f32 %v2263_v62  ;;  %v3117_v31 = vadd.f32 1.0, %v7074_v28  ;;  %v7076_v51 = vpop.eup %7075  ;;  %v2285_v11 = vadd.f32 %v2284_v18, %v8163_v14  ;;  %v2286_v53 = vpop.f32.mrb[174].mxu1  ;;  %v3781_v62 = vadd.f32 %v6128_v9, %v8490_v58 }
 0x34a   : > { %7091 = vtanh.f32 %v2267_v45  ;;  %v3590_v25 = vpack.c.bf16 %v3498_v26, %v3497_v4  ;;  %v7078_v44 = vpop.eup %7077  ;;  %4246 = vxpose.xlu1.b32.cont [15/16] (narrow) %v3778_v37, 8  ;;  %v3118_v55 = vadd.f32 1.0, %v7076_v51  ;;  %v2288_v61 = vpop.f32.mrb[175].mxu1  ;;  %v2273_v45 = vadd.f32 %v2272_v16, %v8176_v49 }
 0x34b   : > { %7093 = vrcp.f32 %v3117_v31  ;;  %v7080_v47 = vpop.eup %7079  ;;  %v5610_v24 = vmul.f32 -1.442695, %v2285_v11  ;;  %v2289_v15 = vadd.f32 %v2288_v61, %v8163_v14 }
 0x34c   : > { %6182 = vmatmul.mubr.bf16.gmra.mrb[180].mxu0 %v3590_v25  ;;  %7095 = vrcp.f32 %v3118_v55 }
 0x34d   : > { %v7082_v50 = vpop.eup %7081  ;;  %7097 = vpow2.f32 %v5610_v24  ;;  %v5611_v4 = vmul.f32 -1.442695, %v2289_v15 }
 0x34e   : > { %v3499_v33 = vmul.f32 %v7082_v50, %v7078_v44  ;;  %v6131_v26 = vpop.f32.mrb[128].mxu0  ;;  %4247 = vxpose.xlu1.b32.end [16/16] (narrow) %v3781_v62, 8 }
 0x34f   : > { %v3785_v31 = vpop.f32.mrb[129].mxu0  ;;  %7099 = vpow2.f32 %v5611_v4  ;;  %v2292_v18 = vpop.f32.mrb[176].mxu1 }
 0x350   : > { %v7084_v28 = vpop.eup %7083  ;;  %v3786_v11 = vadd.f32 %v8490_v58, %v3785_v31  ;;  %v6132_v25 = vpop.f32.mrb[130].mxu0  ;;  %7101 = vtanh.f32 %v2273_v45  ;;  %v2287_v31 = vadd.f32 %v2286_v53, %v8176_v49 }
 0x351   : > { %v7086_v37 = vpop.eup %7085  ;;  %v3500_v51 = vmul.f32 %v7084_v28, %v7080_v47  ;;  %v2294_v55 = vpop.f32.mrb[177].mxu1  ;;  %7103 = vtanh.f32 %v2277_v2  ;;  %v2283_v2 = vadd.f32 %v2282_v52, %v8176_v49 }
 0x352   : > { %v3119_v9 = vadd.f32 1.0, %v7086_v37  ;;  %v7088_v16 = vpop.eup %7087  ;;  %v3788_v61 = vpop.f32.mrb[131].mxu0  ;;  %v2295_v17 = vadd.f32 %v2294_v55, %v8163_v14  ;;  %4264 = vxpose.xlu0.b32.start [1/16] (narrow) %v3786_v11, 8 }
 0x353   : > { %v2296_v44 = vpop.f32.mrb[178].mxu1  ;;  %v3591_v24 = vpack.c.bf16 %v3500_v51, %v3499_v33  ;;  %v7090_v15 = vpop.eup %7089  ;;  %v3120_v50 = vadd.f32 1.0, %v7088_v16  ;;  %v3789_v37 = vadd.f32 %v8490_v58, %v3788_v61 }
 0x354   : > { %7105 = vrcp.f32 %v3119_v9  ;;  %v2298_v62 = vpop.f32.mrb[179].mxu1  ;;  %v7092_v4 = vpop.eup %7091  ;;  %v5612_v47 = vmul.f32 -1.442695, %v2295_v17  ;;  %v3794_v17 = vadd.f32 %v6131_v26, %v8490_v58 }
 0x355   : > { %v2299_v28 = vadd.f32 %v2298_v62, %v8163_v14  ;;  %6185 = vmatprep.mubr.bf16.mxu0 %v3591_v24  ;;  %v7094_v45 = vpop.eup %7093  ;;  %7107 = vrcp.f32 %v3120_v50 }
 0x356   : > { %7109 = vpow2.f32 %v5612_v47  ;;  %v3501_v51 = vmul.f32 %v7094_v45, %v7090_v15  ;;  %v7096_v11 = vpop.eup %7095  ;;  %4265 = vxpose.xlu0.b32.cont [2/16] (narrow) %v3789_v37, 8 }
 0x357   : > { %v5613_v33 = vmul.f32 -1.442695, %v2299_v28  ;;  %v7098_v9 = vpop.eup %7097  ;;  %v2302_v55 = vpop.f32.mrb[180].mxu1  ;;  %v3502_v16 = vmul.f32 %v7096_v11, %v7092_v4 }
 0x358   : > { %v3121_v24 = vadd.f32 1.0, %v7098_v9  ;;  %v2304_v62 = vpop.f32.mrb[181].mxu1 }
 0x359   : > { %7111 = vpow2.f32 %v5613_v33  ;;  %v7100_v61 = vpop.eup %7099  ;;  %v2305_v52 = vadd.f32 %v2304_v62, %v8163_v14  ;;  %v2306_v50 = vpop.f32.mrb[182].mxu1  ;;  %v3592_v53 = vpack.c.bf16 %v3502_v16, %v3501_v51  ;;  %v2297_v33 = vadd.f32 %v2296_v44, %v8176_v49 }
 0x35a   : > { %7113 = vtanh.f32 %v2283_v2  ;;  %v7102_v47 = vpop.eup %7101  ;;  %4266 = vxpose.xlu0.b32.cont [3/16] (narrow) %v3794_v17, 8  ;;  %v3122_v15 = vadd.f32 1.0, %v7100_v61  ;;  %v2308_v28 = vpop.f32.mrb[183].mxu1  ;;  %v3797_v2 = vadd.f32 %v6132_v25, %v8490_v58 }
 0x35b   : > { %7115 = vtanh.f32 %v2287_v31  ;;  %v7104_v45 = vpop.eup %7103  ;;  %v5614_v37 = vmul.f32 -1.442695, %v2305_v52  ;;  %v2309_v4 = vadd.f32 %v2308_v28, %v8163_v14  ;;  %6186 = vmatmul.mubr.bf16.gmra.mrb[184].mxu0 %v3592_v53  ;;  %v2293_v31 = vadd.f32 %v2292_v18, %v8176_v49 }
 0x35c   : > { %7117 = vrcp.f32 %v3121_v24 }
 0x35d   : > { %7119 = vrcp.f32 %v3122_v15  ;;  %v5615_v51 = vmul.f32 -1.442695, %v2309_v4 }
 0x35e   : > { %v7106_v26 = vpop.eup %7105  ;;  %7121 = vpow2.f32 %v5614_v37  ;;  %v6135_v16 = vpop.f32.mrb[132].mxu0  ;;  %4267 = vxpose.xlu0.b32.cont [4/16] (narrow) %v3797_v2, 8 }
 0x35f   : > { %v3503_v11 = vmul.f32 %v7106_v26, %v7102_v47  ;;  %v7108_v9 = vpop.eup %7107  ;;  %v3801_v24 = vpop.f32.mrb[133].mxu0  ;;  %7123 = vpow2.f32 %v5615_v51 }
 0x360   : > { %v7110_v17 = vpop.eup %7109  ;;  %v2312_v62 = vpop.f32.mrb[184].mxu1  ;;  %v3504_v61 = vmul.f32 %v7108_v9, %v7104_v45  ;;  %v3802_v52 = vadd.f32 %v8490_v58, %v3801_v24  ;;  %7125 = vtanh.f32 %v2293_v31  ;;  %v2307_v24 = vadd.f32 %v2306_v50, %v8176_v49 }
 0x361   : > { %v6136_v53 = vpop.f32.mrb[134].mxu0  ;;  %v3123_v25 = vadd.f32 1.0, %v7110_v17  ;;  %v2314_v15 = vpop.f32.mrb[185].mxu1  ;;  %7127 = vtanh.f32 %v2297_v33  ;;  %v2303_v33 = vadd.f32 %v2302_v55, %v8176_v49 }
 0x362   : > { %v3804_v28 = vpop.f32.mrb[135].mxu0  ;;  %v2315_v44 = vadd.f32 %v2314_v15, %v8163_v14  ;;  %v2316_v47 = vpop.f32.mrb[186].mxu1  ;;  %v3593_v37 = vpack.c.bf16 %v3504_v61, %v3503_v11  ;;  %4268 = vxpose.xlu0.b32.cont [5/16] (narrow) %v3802_v52, 8 }
 0x363   : > { %v7112_v18 = vpop.eup %7111  ;;  %7129 = vrcp.f32 %v3123_v25  ;;  %v2318_v2 = vpop.f32.mrb[187].mxu1  ;;  %v3805_v17 = vadd.f32 %v8490_v58, %v3804_v28 }
 0x364   : > { %v7114_v4 = vpop.eup %7113  ;;  %v3124_v26 = vadd.f32 1.0, %v7112_v18  ;;  %v5616_v45 = vmul.f32 -1.442695, %v2315_v44  ;;  %v2319_v9 = vadd.f32 %v2318_v2, %v8163_v14  ;;  %6189 = vmatprep.mubr.bf16.mxu0 %v3593_v37  ;;  %v3810_v44 = vadd.f32 %v6135_v16, %v8490_v58 }
 0x365   : > { %v7116_v51 = vpop.eup %7115 }
 0x366   : > { %v7118_v31 = vpop.eup %7117  ;;  %7131 = vrcp.f32 %v3124_v26  ;;  %v5617_v11 = vmul.f32 -1.442695, %v2319_v9  ;;  %4269 = vxpose.xlu0.b32.cont [6/16] (narrow) %v3805_v17, 8 }
 0x367   : > { %7133 = vpow2.f32 %v5616_v45  ;;  %v3505_v61 = vmul.f32 %v7118_v31, %v7114_v4  ;;  %v7120_v52 = vpop.eup %7119  ;;  %v2322_v15 = vpop.f32.mrb[188].mxu1 }
 0x368   : > { %v7122_v25 = vpop.eup %7121  ;;  %7135 = vpow2.f32 %v5617_v11  ;;  %v3506_v18 = vmul.f32 %v7120_v52, %v7116_v51  ;;  %v2324_v2 = vpop.f32.mrb[189].mxu1  ;;  %v2317_v11 = vadd.f32 %v2316_v47, %v8176_v49 }
 0x369   : > { %7137 = vtanh.f32 %v2303_v33  ;;  %v3125_v37 = vadd.f32 1.0, %v7122_v25  ;;  %v7124_v28 = vpop.eup %7123  ;;  %v2325_v55 = vadd.f32 %v2324_v2, %v8163_v14  ;;  %v2326_v26 = vpop.f32.mrb[190].mxu1  ;;  %v3813_v33 = vadd.f32 %v6136_v53, %v8490_v58 }
 0x36a   : > { %7139 = vtanh.f32 %v2307_v24  ;;  %v3594_v50 = vpack.c.bf16 %v3506_v18, %v3505_v61  ;;  %v7126_v45 = vpop.eup %7125  ;;  %4270 = vxpose.xlu0.b32.cont [7/16] (narrow) %v3810_v44, 8  ;;  %v3126_v4 = vadd.f32 1.0, %v7124_v28  ;;  %v2328_v9 = vpop.f32.mrb[191].mxu1  ;;  %v2313_v24 = vadd.f32 %v2312_v62, %v8176_v49 }
 0x36b   : > { %7141 = vrcp.f32 %v3125_v37  ;;  %v7128_v31 = vpop.eup %7127  ;;  %v5618_v17 = vmul.f32 -1.442695, %v2325_v55  ;;  %v2329_v51 = vadd.f32 %v2328_v9, %v8163_v14 }
 0x36c   : > { %6190 = vmatmul.mubr.bf16.gmra.mrb[188].mxu0 %v3594_v50  ;;  %7143 = vrcp.f32 %v3126_v4 }
 0x36d   : > { %v7130_v16 = vpop.eup %7129  ;;  %7145 = vpow2.f32 %v5618_v17  ;;  %v5619_v61 = vmul.f32 -1.442695, %v2329_v51 }
 0x36e   : > { %v3507_v52 = vmul.f32 %v7130_v16, %v7126_v45  ;;  %v6139_v18 = vpop.f32.mrb[136].mxu0  ;;  %4271 = vxpose.xlu0.b32.cont [8/16] (narrow) %v3813_v33, 8 }
 0x36f   : > { %v3817_v37 = vpop.f32.mrb[137].mxu0  ;;  %7147 = vpow2.f32 %v5619_v61  ;;  %v2332_v2 = vpop.f32.mrb[192].mxu1 }
 0x370   : > { %v7132_v25 = vpop.eup %7131  ;;  %v3818_v55 = vadd.f32 %v8490_v58, %v3817_v37  ;;  %v6140_v50 = vpop.f32.mrb[138].mxu0  ;;  %7149 = vtanh.f32 %v2313_v24  ;;  %v2327_v37 = vadd.f32 %v2326_v26, %v8176_v49 }
 0x371   : > { %v7134_v44 = vpop.eup %7133  ;;  %v3508_v28 = vmul.f32 %v7132_v25, %v7128_v31  ;;  %v2334_v4 = vpop.f32.mrb[193].mxu1  ;;  %7151 = vtanh.f32 %v2317_v11  ;;  %v2323_v11 = vadd.f32 %v2322_v15, %v8176_v49 }
 0x372   : > { %v3127_v53 = vadd.f32 1.0, %v7134_v44  ;;  %v7136_v62 = vpop.eup %7135  ;;  %v3820_v9 = vpop.f32.mrb[139].mxu0  ;;  %v2335_v47 = vadd.f32 %v2334_v4, %v8163_v14  ;;  %4272 = vxpose.xlu0.b32.cont [9/16] (narrow) %v3818_v55, 8 }
 0x373   : > { %v2336_v45 = vpop.f32.mrb[194].mxu1  ;;  %v3595_v17 = vpack.c.bf16 %v3508_v28, %v3507_v52  ;;  %v7138_v51 = vpop.eup %7137  ;;  %v3128_v16 = vadd.f32 1.0, %v7136_v62  ;;  %v3821_v44 = vadd.f32 %v8490_v58, %v3820_v9 }
 0x374   : > { %7153 = vrcp.f32 %v3127_v53  ;;  %v2338_v33 = vpop.f32.mrb[195].mxu1  ;;  %v7140_v61 = vpop.eup %7139  ;;  %v5620_v31 = vmul.f32 -1.442695, %v2335_v47  ;;  %v3826_v47 = vadd.f32 %v6139_v18, %v8490_v58 }
 0x375   : > { %v2339_v25 = vadd.f32 %v2338_v33, %v8163_v14  ;;  %6193 = vmatprep.mubr.bf16.mxu0 %v3595_v17  ;;  %v7142_v24 = vpop.eup %7141  ;;  %7155 = vrcp.f32 %v3128_v16 }
 0x376   : > { %7157 = vpow2.f32 %v5620_v31  ;;  %v3509_v28 = vmul.f32 %v7142_v24, %v7138_v51  ;;  %v7144_v55 = vpop.eup %7143  ;;  %4273 = vxpose.xlu0.b32.cont [10/16] (narrow) %v3821_v44, 8 }
 0x377   : > { %v5621_v52 = vmul.f32 -1.442695, %v2339_v25  ;;  %v7146_v53 = vpop.eup %7145  ;;  %v2342_v4 = vpop.f32.mrb[196].mxu1  ;;  %v3510_v62 = vmul.f32 %v7144_v55, %v7140_v61 }
 0x378   : > { %v3129_v17 = vadd.f32 1.0, %v7146_v53  ;;  %v2344_v33 = vpop.f32.mrb[197].mxu1 }
 0x379   : > { %7159 = vpow2.f32 %v5621_v52  ;;  %v7148_v9 = vpop.eup %7147  ;;  %v2345_v15 = vadd.f32 %v2344_v33, %v8163_v14  ;;  %v2346_v16 = vpop.f32.mrb[198].mxu1  ;;  %v3596_v26 = vpack.c.bf16 %v3510_v62, %v3509_v28  ;;  %v2337_v52 = vadd.f32 %v2336_v45, %v8176_v49 }
 0x37a   : > { %7161 = vtanh.f32 %v2323_v11  ;;  %v7150_v31 = vpop.eup %7149  ;;  %4274 = vxpose.xlu0.b32.cont [11/16] (narrow) %v3826_v47, 8  ;;  %v3130_v51 = vadd.f32 1.0, %v7148_v9  ;;  %v2348_v25 = vpop.f32.mrb[199].mxu1  ;;  %v3829_v11 = vadd.f32 %v6140_v50, %v8490_v58 }
 0x37b   : > { %7163 = vtanh.f32 %v2327_v37  ;;  %v7152_v24 = vpop.eup %7151  ;;  %v5622_v44 = vmul.f32 -1.442695, %v2345_v15  ;;  %v2349_v61 = vadd.f32 %v2348_v25, %v8163_v14  ;;  %6194 = vmatmul.mubr.bf16.gmra.mrb[192].mxu0 %v3596_v26  ;;  %v2333_v37 = vadd.f32 %v2332_v2, %v8176_v49 }
 0x37c   : > { %7165 = vrcp.f32 %v3129_v17 }
 0x37d   : > { %7167 = vrcp.f32 %v3130_v51  ;;  %v5623_v28 = vmul.f32 -1.442695, %v2349_v61 }
 0x37e   : > { %v7154_v18 = vpop.eup %7153  ;;  %7169 = vpow2.f32 %v5622_v44  ;;  %v6143_v62 = vpop.f32.mrb[140].mxu0  ;;  %4275 = vxpose.xlu0.b32.cont [12/16] (narrow) %v3829_v11, 8 }
 0x37f   : > { %v3511_v55 = vmul.f32 %v7154_v18, %v7150_v31  ;;  %v7156_v53 = vpop.eup %7155  ;;  %v3833_v17 = vpop.f32.mrb[141].mxu0  ;;  %7171 = vpow2.f32 %v5623_v28 }
 0x380   : > { %v7158_v47 = vpop.eup %7157  ;;  %v2352_v33 = vpop.f32.mrb[200].mxu1  ;;  %v3512_v9 = vmul.f32 %v7156_v53, %v7152_v24  ;;  %v3834_v15 = vadd.f32 %v8490_v58, %v3833_v17  ;;  %7173 = vtanh.f32 %v2333_v37  ;;  %v8623_v53 = vld [vmem:[%s9464_s8 + $0x2] ss:$0 sm:$0xff] }
 0x381   : > { %v6144_v26 = vpop.f32.mrb[142].mxu0  ;;  %v3131_v50 = vadd.f32 1.0, %v7158_v47  ;;  %v2354_v51 = vpop.f32.mrb[201].mxu1  ;;  %7175 = vtanh.f32 %v2337_v52  ;;  %v2347_v47 = vadd.f32 %v2346_v16, %v8176_v49 }
 0x382   : > { %v3836_v25 = vpop.f32.mrb[143].mxu0  ;;  %v2355_v45 = vadd.f32 %v2354_v51, %v8163_v14  ;;  %v2356_v31 = vpop.f32.mrb[202].mxu1  ;;  %v3597_v44 = vpack.c.bf16 %v3512_v9, %v3511_v55  ;;  %4276 = vxpose.xlu0.b32.cont [13/16] (narrow) %v3834_v15, 8  ;;  %v2343_v55 = vadd.f32 %v2342_v4, %v8176_v49 }
 0x383   : > { %v7160_v2 = vpop.eup %7159  ;;  %7177 = vrcp.f32 %v3131_v50  ;;  %v2358_v11 = vpop.f32.mrb[203].mxu1  ;;  %v3837_v52 = vadd.f32 %v8623_v53, %v3836_v25 }
 0x384   : > { %v7162_v61 = vpop.eup %7161  ;;  %v3132_v18 = vadd.f32 1.0, %v7160_v2  ;;  %v5624_v24 = vmul.f32 -1.442695, %v2355_v45  ;;  %v2359_v58 = vadd.f32 %v2358_v11, %v8163_v14  ;;  %6197 = vmatprep.mubr.bf16.mxu0 %v3597_v44  ;;  %v3842_v45 = vadd.f32 %v8623_v53, %v6143_v62 }
 0x385   : > { %v7164_v28 = vpop.eup %7163 }
 0x386   : > { %v7166_v37 = vpop.eup %7165  ;;  %7179 = vrcp.f32 %v3132_v18  ;;  %v5625_v17 = vmul.f32 -1.442695, %v2359_v58  ;;  %4277 = vxpose.xlu0.b32.cont [14/16] (narrow) %v3837_v52, 8 }
 0x387   : > { %7181 = vpow2.f32 %v5624_v24  ;;  %v3513_v9 = vmul.f32 %v7166_v37, %v7162_v61  ;;  %v7168_v15 = vpop.eup %7167  ;;  %v2362_v51 = vpop.f32.mrb[204].mxu1 }
 0x388   : > { %v7170_v50 = vpop.eup %7169  ;;  %7183 = vpow2.f32 %v5625_v17  ;;  %v3514_v2 = vmul.f32 %v7168_v15, %v7164_v28  ;;  %v2364_v11 = vpop.f32.mrb[205].mxu1  ;;  %v2357_v17 = vadd.f32 %v2356_v31, %v8176_v49 }
 0x389   : > { %7185 = vtanh.f32 %v2343_v55  ;;  %v3133_v44 = vadd.f32 1.0, %v7170_v50  ;;  %v7172_v25 = vpop.eup %7171  ;;  %v2365_v4 = vadd.f32 %v2364_v11, %v8163_v14  ;;  %v2366_v18 = vpop.f32.mrb[206].mxu1  ;;  %v3845_v55 = vadd.f32 %v8623_v53, %v6144_v26 }
 0x38a   : > { %7187 = vtanh.f32 %v2347_v47  ;;  %v3598_v16 = vpack.c.bf16 %v3514_v2, %v3513_v9  ;;  %v7174_v24 = vpop.eup %7173  ;;  %4278 = vxpose.xlu0.b32.cont [15/16] (narrow) %v3842_v45, 8  ;;  %v3134_v61 = vadd.f32 1.0, %v7172_v25  ;;  %v2368_v58 = vpop.f32.mrb[207].mxu1  ;;  %v2353_v47 = vadd.f32 %v2352_v33, %v8176_v49 }
 0x38b   : > { %7189 = vrcp.f32 %v3133_v44  ;;  %v7176_v37 = vpop.eup %7175  ;;  %v5626_v52 = vmul.f32 -1.442695, %v2365_v4  ;;  %v2369_v28 = vadd.f32 %v2368_v58, %v8163_v14 }
 0x38c   : > { %6198 = vmatmul.mubr.bf16.gmra.mrb[196].mxu0 %v3598_v16  ;;  %7191 = vrcp.f32 %v3134_v61 }
 0x38d   : > { %v7178_v62 = vpop.eup %7177  ;;  %7193 = vpow2.f32 %v5626_v52  ;;  %v5627_v9 = vmul.f32 -1.442695, %v2369_v28 }
 0x38e   : > { %v3515_v15 = vmul.f32 %v7178_v62, %v7174_v24  ;;  %4279 = vxpose.xlu0.b32.end [16/16] (narrow) %v3845_v55, 8  ;;  %v8634_v2 = vpop.f32.mrb[144].mxu0 }
 0x38f   : > { %v8636_v44 = vpop.f32.mrb[145].mxu0  ;;  %7195 = vpow2.f32 %v5627_v9  ;;  %v2372_v11 = vpop.f32.mrb[208].mxu1 }
 0x390   : > { %v7180_v50 = vpop.eup %7179  ;;  %v8638_v4 = vpop.f32.mrb[146].mxu0  ;;  %7197 = vtanh.f32 %v2353_v47 }
 0x391   : > { %v7182_v45 = vpop.eup %7181  ;;  %v3516_v25 = vmul.f32 %v7180_v50, %v7176_v37  ;;  %v2374_v33 = vpop.f32.mrb[209].mxu1  ;;  %7199 = vtanh.f32 %v2357_v17  ;;  %v2363_v50 = vadd.f32 %v2362_v51, %v8176_v49 }
 0x392   : > { %v3135_v26 = vadd.f32 1.0, %v7182_v45  ;;  %v7184_v16 = vpop.eup %7183  ;;  %v8640_v31 = vpop.f32.mrb[147].mxu0  ;;  %v2375_v24 = vadd.f32 %v2374_v33, %v8163_v14  ;;  %v2367_v45 = vadd.f32 %v2366_v18, %v8176_v49 }
 0x393   : > { %v2376_v61 = vpop.f32.mrb[210].mxu1  ;;  %v3599_v58 = vpack.c.bf16 %v3516_v25, %v3515_v15  ;;  %v7186_v52 = vpop.eup %7185  ;;  %v3136_v28 = vadd.f32 1.0, %v7184_v16 }
 0x394   : > { %7201 = vrcp.f32 %v3135_v26  ;;  %v2378_v62 = vpop.f32.mrb[211].mxu1  ;;  %v7188_v55 = vpop.eup %7187  ;;  %v5628_v9 = vmul.f32 -1.442695, %v2375_v24 }
 0x395   : > { %v2379_v37 = vadd.f32 %v2378_v62, %v8163_v14  ;;  %6201 = vmatprep.mubr.bf16.mxu0 %v3599_v58  ;;  %v7190_v47 = vpop.eup %7189  ;;  %7203 = vrcp.f32 %v3136_v28 }
 0x396   : > { %7205 = vpow2.f32 %v5628_v9  ;;  %v3517_v33 = vmul.f32 %v7190_v47, %v7186_v52  ;;  %v7192_v42 = vpop.eup %7191 }
 0x397   : > { %v5629_v17 = vmul.f32 -1.442695, %v2379_v37  ;;  %v7194_v15 = vpop.eup %7193  ;;  %v2382_v25 = vpop.f32.mrb[212].mxu1  ;;  %v3518_v26 = vmul.f32 %v7192_v42, %v7188_v55  ;;  %v2373_v42 = vadd.f32 %v2372_v11, %v8176_v49  ;;  %v2377_v55 = vadd.f32 %v2376_v61, %v8176_v49 }
 0x398   : > { %v3137_v16 = vadd.f32 1.0, %v7194_v15  ;;  %v2384_v24 = vpop.f32.mrb[213].mxu1 }
 0x399   : > { %7207 = vpow2.f32 %v5629_v17  ;;  %v7196_v63 = vpop.eup %7195  ;;  %v2385_v58 = vadd.f32 %v2384_v24, %v8163_v14  ;;  %v2386_v28 = vpop.f32.mrb[214].mxu1  ;;  %v3600_v62 = vpack.c.bf16 %v3518_v26, %v3517_v33 }
 0x39a   : > { %7209 = vtanh.f32 %v2363_v50  ;;  %v7198_v51 = vpop.eup %7197  ;;  %v3138_v18 = vadd.f32 1.0, %v7196_v63  ;;  %v2388_v9 = vpop.f32.mrb[215].mxu1 }
 0x39b   : > { %7211 = vtanh.f32 %v2367_v45  ;;  %v7200_v37 = vpop.eup %7199  ;;  %v5630_v52 = vmul.f32 -1.442695, %v2385_v58  ;;  %v2389_v47 = vadd.f32 %v2388_v9, %v8163_v14  ;;  %6202 = vmatmul.mubr.bf16.gmra.mrb[200].mxu0 %v3600_v62 }
 0x39c   : > { %7213 = vrcp.f32 %v3137_v16 }
 0x39d   : > { %7215 = vrcp.f32 %v3138_v18  ;;  %v5631_v50 = vmul.f32 -1.442695, %v2389_v47 }
 0x39e   : > { %v7202_v17 = vpop.eup %7201  ;;  %7217 = vpow2.f32 %v5630_v52  ;;  %v8650_v33 = vpop.f32.mrb[148].mxu0 }
 0x39f   : > { %v3519_v45 = vmul.f32 %v7202_v17, %v7198_v51  ;;  %v7204_v15 = vpop.eup %7203  ;;  %v8652_v63 = vpop.f32.mrb[149].mxu0  ;;  %7219 = vpow2.f32 %v5631_v50 }
 0x3a0   : > { %v7206_v26 = vpop.eup %7205  ;;  %v2392_v16 = vpop.f32.mrb[216].mxu1  ;;  %v3520_v24 = vmul.f32 %v7204_v15, %v7200_v37  ;;  %7221 = vtanh.f32 %v2373_v42  ;;  %v2383_v15 = vadd.f32 %v2382_v25, %v8176_v49 }
 0x3a1   : > { %v3139_v58 = vadd.f32 1.0, %v7206_v26  ;;  %v8654_v62 = vpop.f32.mrb[150].mxu0  ;;  %v2394_v18 = vpop.f32.mrb[217].mxu1  ;;  %7223 = vtanh.f32 %v2377_v55  ;;  %v2387_v55 = vadd.f32 %v2386_v28, %v8176_v49 }
 0x3a2   : > { %v8656_v61 = vpop.f32.mrb[151].mxu0  ;;  %v2395_v51 = vadd.f32 %v2394_v18, %v8163_v14  ;;  %v2396_v9 = vpop.f32.mrb[218].mxu1  ;;  %v3601_v52 = vpack.c.bf16 %v3520_v24, %v3519_v45 }
 0x3a3   : > { %v7208_v11 = vpop.eup %7207  ;;  %7225 = vrcp.f32 %v3139_v58  ;;  %v2398_v1 = vpop.f32.mrb[219].mxu1 }
 0x3a4   : > { %v7210_v47 = vpop.eup %7209  ;;  %v3140_v17 = vadd.f32 1.0, %v7208_v11  ;;  %v5632_v36 = vmul.f32 -1.442695, %v2395_v51  ;;  %v2399_v37 = vadd.f32 %v2398_v1, %v8163_v14  ;;  %6205 = vmatprep.mubr.bf16.mxu0 %v3601_v52 }
 0x3a5   : > { %v7212_v50 = vpop.eup %7211 }
 0x3a6   : > { %v7214_v42 = vpop.eup %7213  ;;  %7227 = vrcp.f32 %v3140_v17  ;;  %v5633_v26 = vmul.f32 -1.442695, %v2399_v37 }
 0x3a7   : > { %7229 = vpow2.f32 %v5632_v36  ;;  %v3521_v18 = vmul.f32 %v7214_v42, %v7210_v47  ;;  %v7216_v35 = vpop.eup %7215  ;;  %v2402_v24 = vpop.f32.mrb[220].mxu1 }
 0x3a8   : > { %v7218_v45 = vpop.eup %7217  ;;  %7231 = vpow2.f32 %v5633_v26  ;;  %v3522_v58 = vmul.f32 %v7216_v35, %v7212_v50  ;;  %v2404_v51 = vpop.f32.mrb[221].mxu1  ;;  %v2393_v35 = vadd.f32 %v2392_v16, %v8176_v49  ;;  %v2397_v50 = vadd.f32 %v2396_v9, %v8176_v49 }
 0x3a9   : > { %7233 = vtanh.f32 %v2383_v15  ;;  %v3141_v11 = vadd.f32 1.0, %v7218_v45  ;;  %v7220_v6 = vpop.eup %7219  ;;  %v2405_v1 = vadd.f32 %v2404_v51, %v8163_v14  ;;  %v2406_v52 = vpop.f32.mrb[222].mxu1 }
 0x3aa   : > { %7235 = vtanh.f32 %v2387_v55  ;;  %v3602_v17 = vpack.c.bf16 %v3522_v58, %v3521_v18  ;;  %v7222_v25 = vpop.eup %7221  ;;  %v3142_v28 = vadd.f32 1.0, %v7220_v6  ;;  %v2408_v36 = vpop.f32.mrb[223].mxu1 }
 0x3ab   : > { %7237 = vrcp.f32 %v3141_v11  ;;  %v7224_v37 = vpop.eup %7223  ;;  %v5634_v47 = vmul.f32 -1.442695, %v2405_v1  ;;  %v2409_v42 = vadd.f32 %v2408_v36, %v8163_v14  ;;  %v8666_v18 = vpop.permute.xlu1 %4549 }
 0x3ac   : > { %6206 = vmatmul.mubr.bf16.gmra.mrb[204].mxu0 %v3602_v17  ;;  %7239 = vrcp.f32 %v3142_v28  ;;  %vm4560_vm8 = vcmp.lt.s32.totalorder %v8495_v5, %v8666_v18 }
 0x3ad   : > { %v7226_v26 = vpop.eup %7225  ;;  %7241 = vpow2.f32 %v5634_v47  ;;  %v5635_v15 = vmul.f32 -1.442695, %v2409_v42 }
 0x3ae   : > { %v3523_v55 = vmul.f32 %v7226_v26, %v7222_v25  ;;  %v8668_v58 = vpop.f32.mrb[152].mxu0 }
 0x3af   : > { %7243 = vpow2.f32 %v5635_v15  ;;  %v2412_v11 = vpop.f32.mrb[224].mxu1  ;;  %v8670_v51 = vpop.f32.mrb[153].mxu0 }
 0x3b0   : > { %v7228_v45 = vpop.eup %7227  ;;  %7245 = vtanh.f32 %v2393_v35  ;;  %v2414_v28 = vpop.f32.mrb[225].mxu1 }
 0x3b1   : > { %v7230_v6 = vpop.eup %7229  ;;  %v3524_v1 = vmul.f32 %v7228_v45, %v7224_v37  ;;  %v8672_v16 = vpop.f32.mrb[154].mxu0  ;;  %7247 = vtanh.f32 %v2397_v50  ;;  %v2415_v25 = vadd.f32 %v2414_v28, %v8163_v14  ;;  %v2403_v45 = vadd.f32 %v2402_v24, %v8176_v49 }
 0x3b2   : > { %v3143_v17 = vadd.f32 1.0, %v7230_v6  ;;  %v7232_v9 = vpop.eup %7231  ;;  %v2416_v36 = vpop.f32.mrb[226].mxu1  ;;  %v2407_v6 = vadd.f32 %v2406_v52, %v8176_v49 }
 0x3b3   : > { %v8675_v47 = vpop.f32.mrb[155].mxu0  ;;  %v3603_v42 = vpack.c.bf16 %v3524_v1, %v3523_v55  ;;  %v7234_v26 = vpop.eup %7233  ;;  %v3144_v15 = vadd.f32 1.0, %v7232_v9  ;;  %v5636_v27 = vmul.f32 -1.442695, %v2415_v25 }
 0x3b4   : > { %7249 = vrcp.f32 %v3143_v17  ;;  %v2418_v10 = vpop.f32.mrb[227].mxu1  ;;  %v7236_v32 = vpop.eup %7235 }
 0x3b5   : > { %v2419_v37 = vadd.f32 %v2418_v10, %v8163_v14  ;;  %6209 = vmatprep.mubr.bf16.mxu0 %v3603_v42  ;;  %v7238_v35 = vpop.eup %7237  ;;  %v4248_v50 = vpop.trf.xlu1  ;;  %7251 = vrcp.f32 %v3144_v15 }
 0x3b6   : > { %7253 = vpow2.f32 %v5636_v27  ;;  %v3525_v1 = vmul.f32 %v7238_v35, %v7234_v26  ;;  %v7240_v17 = vpop.eup %7239  ;;  %v8682_v9 = vsel %vm4554_vm4, %v4248_v50, -1e+30 }
 0x3b7   : > { %v5637_v55 = vmul.f32 -1.442695, %v2419_v37  ;;  %v7242_v28 = vpop.eup %7241  ;;  %v2422_v10 = vpop.f32.mrb[228].mxu1  ;;  %v3526_v25 = vmul.f32 %v7240_v17, %v7236_v32  ;;  %v4571_v26 = vsel %vm4570_vm5, %v8682_v9, -inf  ;;  %v2417_v17 = vadd.f32 %v2416_v36, %v8176_v49 }
 0x3b8   : > { %v3145_v42 = vadd.f32 1.0, %v7242_v28  ;;  %v2424_v48 = vpop.f32.mrb[229].mxu1 }
 0x3b9   : > { %7255 = vpow2.f32 %v5637_v55  ;;  %v7244_v46 = vpop.eup %7243  ;;  %v2425_v24 = vadd.f32 %v2424_v48, %v8163_v14  ;;  %v2426_v15 = vpop.f32.mrb[230].mxu1  ;;  %v3604_v52 = vpack.c.bf16 %v3526_v25, %v3525_v1 }
 0x3ba   : > { %7257 = vtanh.f32 %v2403_v45  ;;  %v7246_v27 = vpop.eup %7245  ;;  %v3146_v37 = vadd.f32 1.0, %v7244_v46  ;;  %v2428_v35 = vpop.f32.mrb[231].mxu1 }
 0x3bb   : > { %7259 = vtanh.f32 %v2407_v6  ;;  %v7248_v50 = vpop.eup %7247  ;;  %4572 = vmax.xlane.f32.xlu0 %v4571_v26  ;;  %v5638_v55 = vmul.f32 -1.442695, %v2425_v24  ;;  %v2429_v32 = vadd.f32 %v2428_v35, %v8163_v14  ;;  %6210 = vmatmul.mubr.bf16.gmra.mrb[208].mxu0 %v3604_v52  ;;  %v2413_v6 = vadd.f32 %v2412_v11, %v8176_v49 }
 0x3bc   : > { %7261 = vrcp.f32 %v3145_v42 }
 0x3bd   : > { %7263 = vrcp.f32 %v3146_v37  ;;  %v5639_v1 = vmul.f32 -1.442695, %v2429_v32 }
 0x3be   : > { %v7250_v45 = vpop.eup %7249  ;;  %7265 = vpow2.f32 %v5638_v55  ;;  %v8690_v48 = vpop.f32.mrb[156].mxu0 }
 0x3bf   : > { %v3527_v28 = vmul.f32 %v7250_v45, %v7246_v27  ;;  %v7252_v25 = vpop.eup %7251  ;;  %7267 = vpow2.f32 %v5639_v1  ;;  %v2432_v42 = vpop.f32.mrb[232].mxu1 }
 0x3c0   : > { %v7254_v46 = vpop.eup %7253  ;;  %v8692_v26 = vpop.f32.mrb[157].mxu0  ;;  %v3528_v24 = vmul.f32 %v7252_v25, %v7248_v50  ;;  %7269 = vtanh.f32 %v2413_v6  ;;  %v2423_v25 = vadd.f32 %v2422_v10, %v8176_v49 }
 0x3c1   : > { %v3147_v52 = vadd.f32 1.0, %v7254_v46  ;;  %v2434_v35 = vpop.f32.mrb[233].mxu1  ;;  %v8694_v37 = vpop.f32.mrb[158].mxu0  ;;  %7271 = vtanh.f32 %v2417_v17  ;;  %v2427_v17 = vadd.f32 %v2426_v15, %v8176_v49 }
 0x3c2   : > { %v2435_v36 = vadd.f32 %v2434_v35, %v8163_v14  ;;  %v2436_v55 = vpop.f32.mrb[234].mxu1  ;;  %v8697_v27 = vpop.f32.mrb[159].mxu0  ;;  %v3605_v32 = vpack.c.bf16 %v3528_v24, %v3527_v28 }
 0x3c3   : > { %v7256_v11 = vpop.eup %7255  ;;  %7273 = vrcp.f32 %v3147_v52  ;;  %v2438_v7 = vpop.f32.mrb[235].mxu1 }
 0x3c4   : > { %v7258_v45 = vpop.eup %7257  ;;  %v3148_v1 = vadd.f32 1.0, %v7256_v11  ;;  %v5640_v12 = vmul.f32 -1.442695, %v2435_v36  ;;  %v2439_v50 = vadd.f32 %v2438_v7, %v8163_v14  ;;  %6213 = vmatprep.mubr.bf16.mxu0 %v3605_v32 }
 0x3c5   : > { %v7260_v59 = vpop.eup %7259 }
 0x3c6   : > { %v7262_v6 = vpop.eup %7261  ;;  %7275 = vrcp.f32 %v3148_v1  ;;  %v5641_v46 = vmul.f32 -1.442695, %v2439_v50 }
 0x3c7   : > { %7277 = vpow2.f32 %v5640_v12  ;;  %v3529_v35 = vmul.f32 %v7262_v6, %v7258_v45  ;;  %v7264_v56 = vpop.eup %7263  ;;  %v2442_v24 = vpop.f32.mrb[236].mxu1 }
 0x3c8   : > { %v7266_v28 = vpop.eup %7265  ;;  %7279 = vpow2.f32 %v5641_v46  ;;  %v3530_v52 = vmul.f32 %v7264_v56, %v7260_v59  ;;  %v2444_v36 = vpop.f32.mrb[237].mxu1  ;;  %v2433_v56 = vadd.f32 %v2432_v42, %v8176_v49  ;;  %v2437_v59 = vadd.f32 %v2436_v55, %v8176_v49 }
 0x3c9   : > { %7281 = vtanh.f32 %v2423_v25  ;;  %v3149_v11 = vadd.f32 1.0, %v7266_v28  ;;  %v7268_v29 = vpop.eup %7267  ;;  %v2445_v7 = vadd.f32 %v2444_v36, %v8163_v14  ;;  %v2446_v32 = vpop.f32.mrb[238].mxu1 }
 0x3ca   : > { %7283 = vtanh.f32 %v2427_v17  ;;  %v3606_v1 = vpack.c.bf16 %v3530_v52, %v3529_v35  ;;  %v7270_v10 = vpop.eup %7269  ;;  %v3150_v15 = vadd.f32 1.0, %v7268_v29  ;;  %v2448_v12 = vpop.f32.mrb[239].mxu1  ;;  %v2447_v60 = vadd.f32 %v2446_v32, %v8176_v49 }
 0x3cb   : > { %7285 = vrcp.f32 %v3149_v11  ;;  %v7272_v50 = vpop.eup %7271  ;;  %v5642_v45 = vmul.f32 -1.442695, %v2445_v7  ;;  %v2449_v6 = vadd.f32 %v2448_v12, %v8163_v14  ;;  %v8706_v35 = vpop.permute.xlu0 %4552 }
 0x3cc   : > { %6214 = vmatmul.mubr.bf16.gmra.mrb[212].mxu0 %v3606_v1  ;;  %7287 = vrcp.f32 %v3150_v15  ;;  %vm4561_vm9 = vcmp.lt.s32.totalorder %v8495_v5, %v8706_v35 }
 0x3cd   : > { %v7274_v46 = vpop.eup %7273  ;;  %7289 = vpow2.f32 %v5642_v45  ;;  %v5643_v25 = vmul.f32 -1.442695, %v2449_v6 }
 0x3ce   : > { %v3531_v17 = vmul.f32 %v7274_v46, %v7270_v10  ;;  %v8708_v52 = vpop.f32.mrb[160].mxu0 }
 0x3cf   : > { %7291 = vpow2.f32 %v5643_v25  ;;  %v2452_v11 = vpop.f32.mrb[240].mxu1  ;;  %v8710_v36 = vpop.f32.mrb[161].mxu0 }
 0x3d0   : > { %v7276_v28 = vpop.eup %7275  ;;  %7293 = vtanh.f32 %v2433_v56  ;;  %v2454_v15 = vpop.f32.mrb[241].mxu1 }
 0x3d1   : > { %v7278_v29 = vpop.eup %7277  ;;  %v3532_v7 = vmul.f32 %v7276_v28, %v7272_v50  ;;  %v8712_v42 = vpop.f32.mrb[162].mxu0  ;;  %7295 = vtanh.f32 %v2437_v59  ;;  %v2455_v10 = vadd.f32 %v2454_v15, %v8163_v14  ;;  %v2443_v15 = vadd.f32 %v2442_v24, %v8176_v49 }
 0x3d2   : > { %v3151_v1 = vadd.f32 1.0, %v7278_v29  ;;  %v7280_v55 = vpop.eup %7279  ;;  %v2456_v12 = vpop.f32.mrb[242].mxu1 }
 0x3d3   : > { %v8715_v45 = vpop.f32.mrb[163].mxu0  ;;  %v3607_v6 = vpack.c.bf16 %v3532_v7, %v3531_v17  ;;  %v7282_v46 = vpop.eup %7281  ;;  %v3152_v25 = vadd.f32 1.0, %v7280_v55  ;;  %v5644_v29 = vmul.f32 -1.442695, %v2455_v10 }
 0x3d4   : > { %7297 = vrcp.f32 %v3151_v1  ;;  %v2458_v50 = vpop.f32.mrb[243].mxu1  ;;  %v4280_v56 = vpop.trf.xlu0 }
 0x3d5   : > { %v7284_v28 = vpop.eup %7283  ;;  %v2459_v23 = vadd.f32 %v2458_v50, %v8163_v14  ;;  %v8720_v19 = vsel %vm4555_vm6, %v4280_v56, -1e+30  ;;  %6217 = vmatprep.mubr.bf16.mxu0 %v3607_v6  ;;  %7299 = vrcp.f32 %v3152_v25 }
 0x3d6   : > { %v7286_v59 = vpop.eup %7285  ;;  %v4574_v17 = vsel %vm4570_vm5, %v8720_v19, -inf  ;;  %7301 = vpow2.f32 %v5644_v29 }
 0x3d7   : > { %v5645_v7 = vmul.f32 -1.442695, %v2459_v23  ;;  %4575 = vmax.xlane.f32.xlu1 %v4574_v17  ;;  %v3533_v1 = vmul.f32 %v7286_v59, %v7282_v46  ;;  %v7288_v55 = vpop.eup %7287  ;;  %v2462_v50 = vpop.f32.mrb[244].mxu1 }
 0x3d8   : > { %v7290_v10 = vpop.eup %7289  ;;  %v3534_v56 = vmul.f32 %v7288_v55, %v7284_v28  ;;  %v2464_v41 = vpop.f32.mrb[245].mxu1  ;;  %v2453_v28 = vadd.f32 %v2452_v11, %v8176_v49  ;;  %v2457_v55 = vadd.f32 %v2456_v12, %v8176_v49 }
 0x3d9   : > { %7303 = vpow2.f32 %v5645_v7  ;;  %v3153_v6 = vadd.f32 1.0, %v7290_v10  ;;  %v7292_v25 = vpop.eup %7291  ;;  %v2465_v24 = vadd.f32 %v2464_v41, %v8163_v14  ;;  %v2466_v0 = vpop.f32.mrb[246].mxu1 }
 0x3da   : > { %7305 = vtanh.f32 %v2443_v15  ;;  %v3608_v54 = vpack.c.bf16 %v3534_v56, %v3533_v1  ;;  %v7294_v39 = vpop.eup %7293  ;;  %v3154_v32 = vadd.f32 1.0, %v7292_v25  ;;  %v2468_v23 = vpop.f32.mrb[247].mxu1 }
 0x3db   : > { %7307 = vtanh.f32 %v2447_v60  ;;  %v7296_v29 = vpop.eup %7295  ;;  %v5646_v46 = vmul.f32 -1.442695, %v2465_v24  ;;  %v2469_v59 = vadd.f32 %v2468_v23, %v8163_v14 }
 0x3dc   : > { %7309 = vrcp.f32 %v3153_v6  ;;  %6218 = vmatmul.mubr.bf16.gmra.mrb[216].mxu0 %v3608_v54 }
 0x3dd   : > { %7311 = vrcp.f32 %v3154_v32  ;;  %v5647_v15 = vmul.f32 -1.442695, %v2469_v59 }
 0x3de   : > { %v7298_v17 = vpop.eup %7297  ;;  %7313 = vpow2.f32 %v5646_v46  ;;  %v8729_v41 = vpop.f32.mrb[164].mxu0 }
 0x3df   : > { %v3535_v60 = vmul.f32 %v7298_v17, %v7294_v39  ;;  %v7300_v7 = vpop.eup %7299  ;;  %7315 = vpow2.f32 %v5647_v15  ;;  %v2472_v10 = vpop.f32.mrb[248].mxu1 }
 0x3e0   : > { %v7302_v1 = vpop.eup %7301  ;;  %v3536_v56 = vmul.f32 %v7300_v7, %v7296_v29  ;;  %v8732_v6 = vpop.f32.mrb[165].mxu0  ;;  %7317 = vtanh.f32 %v2453_v28  ;;  %v2463_v28 = vadd.f32 %v2462_v50, %v8176_v49 }
 0x3e1   : > { %v3155_v25 = vadd.f32 1.0, %v7302_v1  ;;  %v2474_v54 = vpop.f32.mrb[249].mxu1  ;;  %v8734_v24 = vpop.f32.mrb[166].mxu0 }
 0x3e2   : > { %v2475_v11 = vadd.f32 %v2474_v54, %v8163_v14  ;;  %v2476_v39 = vpop.f32.mrb[250].mxu1  ;;  %v3609_v23 = vpack.c.bf16 %v3536_v56, %v3535_v60  ;;  %v8737_v46 = vpop.f32.mrb[167].mxu0  ;;  %v3850_v56 = vadd.f32 %v8623_v53, %v8636_v44 }
 0x3e3   : > { %v7304_v32 = vpop.eup %7303  ;;  %7319 = vrcp.f32 %v3155_v25  ;;  %v2478_v17 = vpop.f32.mrb[251].mxu1 }
 0x3e4   : > { %v7306_v59 = vpop.eup %7305  ;;  %v3156_v12 = vadd.f32 1.0, %v7304_v32  ;;  %7321 = vtanh.f32 %v2457_v55  ;;  %v5648_v29 = vmul.f32 -1.442695, %v2475_v11  ;;  %v2479_v7 = vadd.f32 %v2478_v17, %v8163_v14  ;;  %6221 = vmatprep.mubr.bf16.mxu0 %v3609_v23 }
 0x3e5   : > { %v7308_v15 = vpop.eup %7307  ;;  %v2467_v32 = vadd.f32 %v2466_v0, %v8176_v49 }
 0x3e6   : > { %v7310_v1 = vpop.eup %7309  ;;  %7323 = vrcp.f32 %v3156_v12  ;;  %v5649_v54 = vmul.f32 -1.442695, %v2479_v7 }
 0x3e7   : > { %7325 = vpow2.f32 %v5648_v29  ;;  %v3537_v21 = vmul.f32 %v7310_v1, %v7306_v59  ;;  %v7312_v60 = vpop.eup %7311  ;;  %v2482_v55 = vpop.f32.mrb[252].mxu1  ;;  %v3853_v59 = vadd.f32 %v8623_v53, %v8640_v31 }
 0x3e8   : > { %v7314_v25 = vpop.eup %7313  ;;  %7327 = vpow2.f32 %v5649_v54  ;;  %v3538_v11 = vmul.f32 %v7312_v60, %v7308_v15  ;;  %v2484_v17 = vpop.f32.mrb[253].mxu1  ;;  %4296 = vxpose.xlu0.b32.start [1/16] (narrow) %v3850_v56, 8  ;;  %v2473_v60 = vadd.f32 %v2472_v10, %v8176_v49 }
 0x3e9   : > { %v3157_v3 = vadd.f32 1.0, %v7314_v25  ;;  %v7316_v23 = vpop.eup %7315  ;;  %7329 = vtanh.f32 %v2463_v28  ;;  %v2485_v50 = vadd.f32 %v2484_v17, %v8163_v14  ;;  %v2486_v12 = vpop.f32.mrb[254].mxu1 }
 0x3ea   : > { %v3610_v29 = vpack.c.bf16 %v3538_v11, %v3537_v21  ;;  %v3158_v44 = vadd.f32 1.0, %v7316_v23  ;;  %v2488_v7 = vpop.f32.mrb[255].mxu1  ;;  %v7318_v1 = vpop.eup %7317  ;;  %v2477_v11 = vadd.f32 %v2476_v39, %v8176_v49  ;;  %v3861_v39 = vadd.f32 %v8623_v53, %v8638_v4 }
 0x3eb   : > { %7331 = vrcp.f32 %v3157_v3  ;;  %v5650_v0 = vmul.f32 -1.442695, %v2485_v50  ;;  %v2489_v15 = vadd.f32 %v2488_v7, %v8163_v14  ;;  %v3858_v3 = vadd.f32 %v8623_v53, %v8634_v2 }
 0x3ec   : > { %7333 = vtanh.f32 %v2467_v32  ;;  %6222 = vmatmul.mubr.bf16.gmra.mrb[220].mxu0 %v3610_v29  ;;  %4297 = vxpose.xlu0.b32.cont [2/16] (narrow) %v3853_v59, 8  ;;  %v3866_v4 = vadd.f32 %v8623_v53, %v8652_v63 }
 0x3ed   : > { %v7320_v54 = vpop.eup %7319  ;;  %7335 = vrcp.f32 %v3158_v44  ;;  %v5651_v21 = vmul.f32 -1.442695, %v2489_v15 }
 0x3ee   : > { %v7322_v28 = vpop.eup %7321  ;;  %7337 = vpow2.f32 %v5650_v0  ;;  %v3539_v56 = vmul.f32 %v7320_v54, %v7318_v1  ;;  %v8751_v31 = vpop.f32.mrb[168].mxu0 }
 0x3ef   : > { %7339 = vpow2.f32 %v5651_v21  ;;  %v2492_v17 = vpop.f32.mrb[0].mxu1  ;;  %v8754_v50 = vpop.f32.mrb[169].mxu0 }
 0x3f0   : > { %v7324_v25 = vpop.eup %7323  ;;  %v2494_v59 = vpop.f32.mrb[1].mxu1  ;;  %4298 = vxpose.xlu0.b32.cont [3/16] (narrow) %v3858_v3, 8  ;;  %7341 = vtanh.f32 %v2473_v60 }
 0x3f1   : > { %v7326_v32 = vpop.eup %7325  ;;  %v3540_v23 = vmul.f32 %v7324_v25, %v7322_v28  ;;  %v8756_v10 = vpop.f32.mrb[170].mxu0  ;;  %v2495_v7 = vadd.f32 %v2494_v59, %v8163_v14 }
 0x3f2   : > { %v3159_v29 = vadd.f32 1.0, %v7326_v32  ;;  %v7328_v44 = vpop.eup %7327  ;;  %v2496_v2 = vpop.f32.mrb[2].mxu1 }
 0x3f3   : > { %v3611_v1 = vpack.c.bf16 %v3540_v23, %v3539_v56  ;;  %v8759_v0 = vpop.f32.mrb[171].mxu0  ;;  %v3160_v15 = vadd.f32 1.0, %v7328_v44  ;;  %v2498_v54 = vpop.f32.mrb[3].mxu1  ;;  %v5652_v21 = vmul.f32 -1.442695, %v2495_v7  ;;  %v2483_v56 = vadd.f32 %v2482_v55, %v8176_v49 }
 0x3f4   : > { %7343 = vrcp.f32 %v3159_v29  ;;  %v7330_v28 = vpop.eup %7329  ;;  %v2499_v25 = vadd.f32 %v2498_v54, %v8163_v14  ;;  %4299 = vxpose.xlu0.b32.cont [4/16] (narrow) %v3861_v39, 8 }
 0x3f5   : > { %7345 = vtanh.f32 %v2477_v11  ;;  %6225 = vmatprep.mubr.bf16.mxu0 %v3611_v1  ;;  %v7332_v3 = vpop.eup %7331  ;;  %v2487_v11 = vadd.f32 %v2486_v12, %v8176_v49 }
 0x3f6   : > { %7347 = vrcp.f32 %v3160_v15  ;;  %v7334_v60 = vpop.eup %7333  ;;  %v5653_v32 = vmul.f32 -1.442695, %v2499_v25  ;;  %v3541_v23 = vmul.f32 %v7332_v3, %v7330_v28  ;;  %v3869_v28 = vadd.f32 %v8623_v53, %v8656_v61 }
 0x3f7   : > { %7349 = vpow2.f32 %v5652_v21  ;;  %v7336_v59 = vpop.eup %7335  ;;  %v2502_v44 = vpop.f32.mrb[4].mxu1  ;;  %v3874_v61 = vadd.f32 %v8623_v53, %v8650_v33 }
 0x3f8   : > { %v7338_v29 = vpop.eup %7337  ;;  %7351 = vpow2.f32 %v5653_v32  ;;  %v3542_v7 = vmul.f32 %v7336_v59, %v7334_v60  ;;  %v2504_v54 = vpop.f32.mrb[5].mxu1  ;;  %4300 = vxpose.xlu0.b32.cont [5/16] (narrow) %v3866_v4, 8  ;;  %v2493_v59 = vadd.f32 %v2492_v17, %v8176_v49 }
 0x3f9   : > { %v3161_v1 = vadd.f32 1.0, %v7338_v29  ;;  %v7340_v39 = vpop.eup %7339  ;;  %7353 = vtanh.f32 %v2483_v56  ;;  %v2505_v55 = vadd.f32 %v2504_v54, %v8163_v14  ;;  %v2506_v15 = vpop.f32.mrb[6].mxu1 }
 0x3fa   : > { %v3612_v21 = vpack.c.bf16 %v3542_v7, %v3541_v23  ;;  %v3162_v63 = vadd.f32 1.0, %v7340_v39  ;;  %v2508_v25 = vpop.f32.mrb[7].mxu1  ;;  %v7342_v3 = vpop.eup %7341 }
 0x3fb   : > { %7355 = vrcp.f32 %v3161_v1  ;;  %v5654_v12 = vmul.f32 -1.442695, %v2505_v55  ;;  %v2509_v60 = vadd.f32 %v2508_v25, %v8163_v14  ;;  %v2497_v1 = vadd.f32 %v2496_v2, %v8176_v49 }
 0x3fc   : > { %7357 = vtanh.f32 %v2487_v11  ;;  %6226 = vmatmul.mubr.bf16.gmra.mrb[224].mxu0 %v3612_v21  ;;  %4301 = vxpose.xlu0.b32.cont [6/16] (narrow) %v3869_v28, 8  ;;  %v3877_v2 = vadd.f32 %v8623_v53, %v8654_v62  ;;  %v8794_v53 = vld [vmem:[%s9464_s8 + $0x2] ss:$0 sm:$0xff] }
 0x3fd   : > { %7359 = vrcp.f32 %v3162_v63  ;;  %v5655_v23 = vmul.f32 -1.442695, %v2509_v60  ;;  %v3882_v62 = vadd.f32 %v8794_v53, %v8670_v51  ;;  %v3885_v51 = vadd.f32 %v8794_v53, %v8675_v47 }
 0x3fe   : > { %v7344_v32 = vpop.eup %7343  ;;  %7361 = vpow2.f32 %v5654_v12  ;;  %v8775_v7 = vpop.f32.mrb[172].mxu0 }
 0x3ff   : > { %v7346_v56 = vpop.eup %7345  ;;  %v3543_v4 = vmul.f32 %v7344_v32, %v7342_v3  ;;  %7363 = vpow2.f32 %v5655_v23  ;;  %v8778_v54 = vpop.f32.mrb[8].mxu1 }
 0x400   : > { %v7348_v29 = vpop.eup %7347  ;;  %v8780_v55 = vpop.f32.mrb[173].mxu0  ;;  %4302 = vxpose.xlu0.b32.cont [7/16] (narrow) %v3874_v61, 8  ;;  %7365 = vtanh.f32 %v2493_v59  ;;  %v2513_v47 = vadd.f32 %v8778_v54, %v8176_v49 }
 0x401   : > { %v7350_v11 = vpop.eup %7349  ;;  %v3544_v39 = vmul.f32 %v7348_v29, %v7346_v56  ;;  %v2514_v17 = vpop.f32.mrb[9].mxu1 }
 0x402   : > { %v3163_v21 = vadd.f32 1.0, %v7350_v11  ;;  %v8782_v28 = vpop.f32.mrb[174].mxu0  ;;  %v7352_v63 = vpop.eup %7351  ;;  %v2515_v33 = vadd.f32 %v2514_v17, %v8163_v14 }
 0x403   : > { %v2516_v25 = vpop.f32.mrb[10].mxu1  ;;  %v3613_v3 = vpack.c.bf16 %v3544_v39, %v3543_v4  ;;  %v8785_v12 = vpop.f32.mrb[175].mxu0  ;;  %v3164_v60 = vadd.f32 1.0, %v7352_v63  ;;  %v2503_v4 = vadd.f32 %v2502_v44, %v8176_v49  ;;  %v2507_v63 = vadd.f32 %v2506_v15, %v8176_v49 }
 0x404   : > { %7367 = vrcp.f32 %v3163_v21  ;;  %v2518_v32 = vpop.f32.mrb[11].mxu1  ;;  %v7354_v56 = vpop.eup %7353  ;;  %v5656_v23 = vmul.f32 -1.442695, %v2515_v33  ;;  %4303 = vxpose.xlu0.b32.cont [8/16] (narrow) %v3877_v2, 8 }
 0x405   : > { %7369 = vtanh.f32 %v2497_v1  ;;  %v2519_v29 = vadd.f32 %v2518_v32, %v8163_v14  ;;  %6229 = vmatprep.mubr.bf16.mxu0 %v3613_v3  ;;  %v7356_v61 = vpop.eup %7355  ;;  %v3914_v1 = vadd.f32 %v8794_v53, %v8710_v36  ;;  %v3917_v36 = vadd.f32 %v8794_v53, %v8715_v45 }
 0x406   : > { %7371 = vrcp.f32 %v3164_v60  ;;  %v7358_v59 = vpop.eup %7357  ;;  %v3545_v39 = vmul.f32 %v7356_v61, %v7354_v56 }
 0x407   : > { %7373 = vpow2.f32 %v5656_v23  ;;  %v5657_v11 = vmul.f32 -1.442695, %v2519_v29  ;;  %v7360_v17 = vpop.eup %7359  ;;  %v2522_v44 = vpop.f32.mrb[12].mxu1 }
 0x408   : > { %v7362_v21 = vpop.eup %7361  ;;  %v3546_v33 = vmul.f32 %v7360_v17, %v7358_v59  ;;  %v2524_v2 = vpop.f32.mrb[13].mxu1  ;;  %4304 = vxpose.xlu0.b32.cont [9/16] (narrow) %v3882_v62, 8 }
 0x409   : > { %7375 = vpow2.f32 %v5657_v11  ;;  %v3165_v3 = vadd.f32 1.0, %v7362_v21  ;;  %v7364_v60 = vpop.eup %7363  ;;  %v2525_v32 = vadd.f32 %v2524_v2, %v8163_v14  ;;  %v2526_v56 = vpop.f32.mrb[14].mxu1  ;;  %v3922_v21 = vadd.f32 %v8794_v53, %v8708_v52 }
 0x40a   : > { %4328 = vxpose.xlu1.b32.start [1/16] (narrow) %v3914_v1, 8  ;;  %7377 = vtanh.f32 %v2503_v4  ;;  %v3614_v23 = vpack.c.bf16 %v3546_v33, %v3545_v39  ;;  %v3166_v15 = vadd.f32 1.0, %v7364_v60  ;;  %v2528_v29 = vpop.f32.mrb[15].mxu1  ;;  %v7366_v61 = vpop.eup %7365  ;;  %v3890_v1 = vadd.f32 %v8794_v53, %v8668_v58 }
 0x40b   : > { %7379 = vrcp.f32 %v3165_v3  ;;  %v5658_v59 = vmul.f32 -1.442695, %v2525_v32  ;;  %v2529_v11 = vadd.f32 %v2528_v29, %v8163_v14  ;;  %v2517_v33 = vadd.f32 %v2516_v25, %v8176_v49 }
 0x40c   : > { %7381 = vtanh.f32 %v2507_v63  ;;  %6230 = vmatmul.mubr.bf16.gmra.mrb[228].mxu0 %v3614_v23  ;;  %4305 = vxpose.xlu0.b32.cont [10/16] (narrow) %v3885_v51, 8  ;;  %v3893_v52 = vadd.f32 %v8794_v53, %v8672_v16  ;;  %v3925_v25 = vadd.f32 %v8794_v53, %v8712_v42  ;;  %v3898_v16 = vadd.f32 %v8794_v53, %v8692_v26 }
 0x40d   : > { %7383 = vrcp.f32 %v3166_v15  ;;  %v5659_v17 = vmul.f32 -1.442695, %v2529_v11  ;;  %v3930_v42 = vadd.f32 %v8794_v53, %v8732_v6 }
 0x40e   : > { %v7368_v4 = vpop.eup %7367  ;;  %4329 = vxpose.xlu1.b32.cont [2/16] (narrow) %v3917_v36, 8  ;;  %7385 = vpow2.f32 %v5658_v59  ;;  %v8813_v14 = vpop.f32.mrb[176].mxu0 }
 0x40f   : > { %v7370_v39 = vpop.eup %7369  ;;  %v3547_v45 = vmul.f32 %v7368_v4, %v7366_v61  ;;  %7387 = vpow2.f32 %v5659_v17  ;;  %v8816_v2 = vpop.f32.mrb[177].mxu0  ;;  %v2523_v61 = vadd.f32 %v2522_v44, %v8176_v49  ;;  %v3901_v44 = vadd.f32 %v8794_v53, %v8697_v27 }
 0x410   : > { %v7372_v62 = vpop.eup %7371  ;;  %4306 = vxpose.xlu0.b32.cont [11/16] (narrow) %v3890_v1, 8  ;;  %v8818_v60 = vpop.f32.mrb[178].mxu0  ;;  %7389 = vtanh.f32 %v2513_v47  ;;  %v3933_v1 = vadd.f32 %v8794_v53, %v8737_v46  ;;  %v3938_v27 = vadd.f32 %v8794_v53, %v8729_v41 }
 0x411   : > { %v7374_v63 = vpop.eup %7373  ;;  %v3548_v3 = vmul.f32 %v7372_v62, %v7370_v39  ;;  %v8820_v23 = vpop.f32.mrb[179].mxu0  ;;  %v2527_v39 = vadd.f32 %v2526_v56, %v8176_v49 }
 0x412   : > { %v3167_v54 = vadd.f32 1.0, %v7374_v63  ;;  %4330 = vxpose.xlu1.b32.cont [3/16] (narrow) %v3922_v21, 8 }
 0x413   : > { %v7376_v32 = vpop.eup %7375  ;;  %v3615_v58 = vpack.c.bf16 %v3548_v3, %v3547_v45 }
 0x414   : > { %7391 = vrcp.f32 %v3167_v54  ;;  %v3168_v51 = vadd.f32 1.0, %v7376_v32  ;;  %v7378_v36 = vpop.eup %7377  ;;  %4307 = vxpose.xlu0.b32.cont [12/16] (narrow) %v3893_v52, 8 }
 0x415   : > { %7393 = vtanh.f32 %v2517_v33  ;;  %6233 = vmatprep.mubr.bf16.mxu0 %v3615_v58  ;;  %v7380_v15 = vpop.eup %7379  ;;  %v3906_v33 = vadd.f32 %v8794_v53, %v8690_v48  ;;  %v3941_v48 = vadd.f32 %v8794_v53, %v8734_v24  ;;  %v3954_v24 = vadd.f32 %v8794_v53, %v8751_v31 }
 0x416   : > { %7395 = vrcp.f32 %v3168_v51  ;;  %4331 = vxpose.xlu1.b32.cont [4/16] (narrow) %v3925_v25, 8  ;;  %v7382_v29 = vpop.eup %7381  ;;  %v3549_v59 = vmul.f32 %v7380_v15, %v7378_v36  ;;  %v3909_v25 = vadd.f32 %v8794_v53, %v8694_v37  ;;  %v3949_v37 = vadd.f32 %v8794_v53, %v8759_v0 }
 0x417   : > { %v7384_v11 = vpop.eup %7383  ;;  %7397 = vtanh.f32 %v2523_v61  ;;  %v3946_v61 = vadd.f32 %v8794_v53, %v8754_v50  ;;  %v3957_v50 = vadd.f32 %v8794_v53, %v8756_v10  ;;  %v3962_v0 = vadd.f32 %v8794_v53, %v8780_v55 }
 0x418   : > { %v7386_v4 = vpop.eup %7385  ;;  %v3550_v47 = vmul.f32 %v7384_v11, %v7382_v29  ;;  %4308 = vxpose.xlu0.b32.cont [13/16] (narrow) %v3898_v16, 8  ;;  %v3965_v31 = vadd.f32 %v8794_v53, %v8785_v12  ;;  %v3973_v55 = vadd.f32 %v8794_v53, %v8782_v28 }
 0x419   : > { %v3169_v17 = vadd.f32 1.0, %v7386_v4  ;;  %v7388_v45 = vpop.eup %7387 }
 0x41a   : > { %4332 = vxpose.xlu1.b32.cont [5/16] (narrow) %v3930_v42, 8  ;;  %v3616_v62 = vpack.c.bf16 %v3550_v47, %v3549_v59  ;;  %v3170_v26 = vadd.f32 1.0, %v7388_v45  ;;  %v7390_v21 = vpop.eup %7389  ;;  %v3970_v47 = vadd.f32 %v8794_v53, %v8775_v7 }
 0x41b   : > { %7399 = vrcp.f32 %v3169_v17 }
 0x41c   : > { %7401 = vtanh.f32 %v2527_v39  ;;  %6234 = vmatmul.mubr.bf16.gmra.mrb[232].mxu0 %v3616_v62  ;;  %4309 = vxpose.xlu0.b32.cont [14/16] (narrow) %v3901_v44, 8 }
 0x41d   : > { %7403 = vrcp.f32 %v3170_v26 }
 0x41e   : > { %v7392_v6 = vpop.eup %7391  ;;  %4333 = vxpose.xlu1.b32.cont [6/16] (narrow) %v3933_v1, 8 }
 0x41f   : > { %v7394_v49 = vpop.eup %7393  ;;  %v3551_v56 = vmul.f32 %v7392_v6, %v7390_v21  ;;  %v8840_v3 = vpop.f32.mrb[180].mxu0 }
 0x420   : > { %v7396_v63 = vpop.eup %7395  ;;  %v8842_v54 = vpop.f32.mrb[181].mxu0  ;;  %4310 = vxpose.xlu0.b32.cont [15/16] (narrow) %v3906_v33, 8 }
 0x421   : > { %v3552_v46 = vmul.f32 %v7396_v63, %v7394_v49  ;;  %v8844_v32 = vpop.f32.mrb[182].mxu0  ;;  %v7398_v51 = vpop.eup %7397 }
 0x422   : > { %4334 = vxpose.xlu1.b32.cont [7/16] (narrow) %v3938_v27, 8  ;;  %v8846_v52 = vpop.f32.mrb[183].mxu0 }
 0x423   : > { %v3617_v58 = vpack.c.bf16 %v3552_v46, %v3551_v56 }
 0x424   : > { %4311 = vxpose.xlu0.b32.end [16/16] (narrow) %v3909_v25, 8 }
 0x425   : > { %6237 = vmatprep.mubr.bf16.mxu0 %v3617_v58  ;;  %v7400_v41 = vpop.eup %7399 }
 0x426   : > { %4335 = vxpose.xlu1.b32.cont [8/16] (narrow) %v3941_v48, 8  ;;  %v7402_v36 = vpop.eup %7401  ;;  %v3553_v15 = vmul.f32 %v7400_v41, %v7398_v51 }
 0x427   : > { %v7404_v29 = vpop.eup %7403 }
 0x428   : > { %v3554_v59 = vmul.f32 %v7404_v29, %v7402_v36 }
 0x42a   : > { %4336 = vxpose.xlu1.b32.cont [9/16] (narrow) %v3946_v61, 8  ;;  %v3618_v11 = vpack.c.bf16 %v3554_v59, %v3553_v15 }
 0x42c   : > { %6238 = vmatmul.mubr.bf16.gmra.mrb[236].mxu0 %v3618_v11 }
 0x42d   : > { %6257 = vmatprep.mubr.msk.bf16.mxu0 %vm7543_vm7, %v9563_v57 }
 0x42e   : > { %4337 = vxpose.xlu1.b32.cont [10/16] (narrow) %v3949_v37, 8  ;;  %v8858_v16 = vpop.f32.mrb[184].mxu0 }
 0x42f   : > { %v8860_v42 = vpop.f32.mrb[185].mxu0 }
 0x430   : > { %v8862_v4 = vpop.f32.mrb[186].mxu0 }
 0x431   : > { %v8864_v39 = vpop.f32.mrb[187].mxu0 }
 0x432   : > { %4338 = vxpose.xlu1.b32.cont [11/16] (narrow) %v3954_v24, 8 }
 0x436   : > { %4339 = vxpose.xlu1.b32.cont [12/16] (narrow) %v3957_v50, 8 }
 0x43a   : > { %4340 = vxpose.xlu1.b32.cont [13/16] (narrow) %v3962_v0, 8 }
 0x43e   : > { %4341 = vxpose.xlu1.b32.cont [14/16] (narrow) %v3965_v31, 8  ;;  %v3978_v31 = vadd.f32 %v8794_v53, %v8816_v2  ;;  %v3989_v2 = vadd.f32 %v8794_v53, %v8818_v60  ;;  %v4002_v60 = vadd.f32 %v8794_v53, %v8840_v3 }
 0x43f   : > { %v8874_v17 = vpop.f32.mrb[188].mxu0 }
 0x440   : > { %v8876_v45 = vpop.f32.mrb[189].mxu0 }
 0x441   : > { %v8878_v62 = vpop.f32.mrb[190].mxu0 }
 0x442   : > { %4342 = vxpose.xlu1.b32.cont [15/16] (narrow) %v3970_v47, 8  ;;  %v8880_v10 = vpop.f32.mrb[191].mxu0  ;;  %v3981_v47 = vadd.f32 %v8794_v53, %v8820_v23  ;;  %v3994_v23 = vadd.f32 %v8794_v53, %v8842_v54  ;;  %v4005_v54 = vadd.f32 %v8794_v53, %v8844_v32 }
 0x446   : > { %4343 = vxpose.xlu1.b32.end [16/16] (narrow) %v3973_v55, 8 }
 0x448   : > { %v4573_v26 = vpop.xlane.xlu0 %4572 }
 0x449   : > { %v4595_v21 = vsub.f32 %v8682_v9, %v4573_v26 }
 0x44b   : > { %v4603_v6 = vmul.f32 1.442695, %v4595_v21 }
 0x44d   : > { %7405 = vpow2.f32 %v4603_v6 }
 0x44e   : > { %v8884_v44 = vpop.f32.mrb[192].mxu0 }
 0x44f   : > { %v8886_v12 = vpop.f32.mrb[193].mxu0 }
 0x450   : > { %v8888_v1 = vpop.f32.mrb[194].mxu0 }
 0x451   : > { %v8890_v7 = vpop.f32.mrb[195].mxu0 }
 0x452   : > { %v4045_v3 = vadd.f32 %v8794_v53, %v8890_v7  ;;  %v4053_v7 = vadd.f32 %v8794_v53, %v8888_v1 }
 0x457   : > { %v8908_v9 = vpop.eup %7405 }
 0x458   : > { %v4619_v58 = vsel %vm4570_vm5, %v8908_v9, 0.0 }
 0x45f   : > { %v8893_v49 = vpop.f32.mrb[196].mxu0 }
 0x460   : > { %v8895_v56 = vpop.f32.mrb[197].mxu0 }
 0x461   : > { %v8897_v63 = vpop.f32.mrb[198].mxu0 }
 0x462   : > { %v8899_v28 = vpop.f32.mrb[199].mxu0 }
 0x463   : > { %v4061_v1 = vadd.f32 %v8794_v53, %v8899_v28  ;;  %v4069_v28 = vadd.f32 %v8794_v53, %v8897_v63 }
 0x464   : > { %v8928_v61 = vpop.xlane.xlu1 %4575 }
 0x468   : > { %v4312_v33 = vpop.trf.xlu0 }
 0x469   : > { %v8904_v27 = vsel %vm4556_vm0, %v4312_v33, -1e+30  ;;  %v3986_v33 = vadd.f32 %v8794_v53, %v8813_v14  ;;  %vm5073_vm0 = vcmask 1047559  }
 0x46a   : > { %v4577_v46 = vsel %vm4570_vm5, %v8904_v27, -inf }
 0x46b   : > { %4578 = vmax.xlane.f32.xlu0 %v4577_v46  ;;  %v3997_v46 = vadd.f32 %v8794_v53, %v8846_v52  ;;  %v4010_v52 = vadd.f32 %v8794_v53, %v8860_v42  ;;  %v4018_v42 = vadd.f32 %v8794_v53, %v8858_v16  ;;  %v4058_v16 = vadd.f32 %v8794_v53, %v8895_v56 }
 0x46c   : > { %v4034_v56 = vadd.f32 %v8794_v53, %v8874_v17 }
 0x46e   : > { %v8912_v25 = vpop.f32.mrb[200].mxu0 }
 0x46f   : > { %4620 = vadd.xlane.f32.xlu0 %v4619_v58  ;;  %v8914_v48 = vpop.f32.mrb[201].mxu0  ;;  %v4082_v63 = vadd.f32 %v8794_v53, %v8912_v25 }
 0x470   : > { %v8916_v51 = vpop.f32.mrb[202].mxu0 }
 0x471   : > { %v8918_v41 = vpop.f32.mrb[203].mxu0 }
 0x47f   : > { %v8920_v43 = vpop.f32.mrb[204].mxu0 }
 0x480   : > { %v8922_v36 = vpop.f32.mrb[205].mxu0 }
 0x481   : > { %v8924_v15 = vpop.f32.mrb[206].mxu0 }
 0x482   : > { %v8926_v29 = vpop.f32.mrb[207].mxu0 }
 0x48a   : > { %v4344_v59 = vpop.trf.xlu1 }
 0x48b   : > { %v8933_v11 = vsel %vm4557_vm1, %v4344_v59, -1e+30 }
 0x48c   : > { %v4580_v37 = vsel %vm4570_vm5, %v8933_v11, -inf }
 0x48d   : > { %4581 = vmax.xlane.f32.xlu1 %v4580_v37 }
 0x48e   : > { %v8941_v24 = vpop.f32.mrb[208].mxu0 }
 0x48f   : > { %v8943_v50 = vpop.f32.mrb[209].mxu0 }
 0x490   : > { %v8945_v0 = vpop.f32.mrb[210].mxu0 }
 0x491   : > { %v8947_v40 = vpop.f32.mrb[211].mxu0  ;;  %v4117_v30 = vadd.f32 %v8794_v53, %v8945_v0 }
 0x49c   : > { %4360 = vxpose.xlu0.b32.start [1/16] (narrow) %v3978_v31, 8  ;;  %v4042_v31 = vadd.f32 %v8794_v53, %v8886_v12  ;;  %v4021_v12 = vadd.f32 %v8794_v53, %v8862_v4 }
 0x49f   : > { %v8953_v55 = vpop.f32.mrb[212].mxu0 }
 0x4a0   : > { %v8955_v26 = vpop.f32.mrb[213].mxu0  ;;  %4361 = vxpose.xlu0.b32.cont [2/16] (narrow) %v3981_v47, 8  ;;  %v4013_v47 = vadd.f32 %v8794_v53, %v8864_v39  ;;  %v4050_v39 = vadd.f32 %v8794_v53, %v8884_v44  ;;  %v4029_v44 = vadd.f32 %v8794_v53, %v8880_v10  ;;  %v4066_v10 = vadd.f32 %v8794_v53, %v8893_v49 }
 0x4a1   : > { %v8957_v21 = vpop.f32.mrb[214].mxu0  ;;  %v4077_v49 = vadd.f32 %v8794_v53, %v8918_v41  ;;  %v4596_v41 = vsub.f32 %v8720_v19, %v8928_v61  ;;  %v4101_v19 = vadd.f32 %v8794_v53, %v8924_v15 }
 0x4a2   : > { %v8959_v6 = vpop.f32.mrb[215].mxu0 }
 0x4a4   : > { %4362 = vxpose.xlu0.b32.cont [3/16] (narrow) %v3986_v33, 8 }
 0x4a8   : > { %4363 = vxpose.xlu0.b32.cont [4/16] (narrow) %v3989_v2, 8 }
 0x4ac   : > { %4364 = vxpose.xlu0.b32.cont [5/16] (narrow) %v3994_v23, 8 }
 0x4af   : > { %v8969_v58 = vpop.f32.mrb[216].mxu0 }
 0x4b0   : > { %v8971_v59 = vpop.f32.mrb[217].mxu0  ;;  %4365 = vxpose.xlu0.b32.cont [6/16] (narrow) %v3997_v46, 8  ;;  %v4026_v46 = vadd.f32 %v8794_v53, %v8876_v45 }
 0x4b1   : > { %v8973_v37 = vpop.f32.mrb[218].mxu0  ;;  %v4138_v0 = vadd.f32 %v8794_v53, %v8971_v59 }
 0x4b2   : > { %v8975_v14 = vpop.f32.mrb[219].mxu0 }
 0x4b4   : > { %4366 = vxpose.xlu0.b32.cont [7/16] (narrow) %v4002_v60, 8 }
 0x4b8   : > { %4367 = vxpose.xlu0.b32.cont [8/16] (narrow) %v4005_v54, 8 }
 0x4bc   : > { %4368 = vxpose.xlu0.b32.cont [9/16] (narrow) %v4010_v52, 8  ;;  %v4037_v52 = vadd.f32 %v8794_v53, %v8878_v62 }
 0x4bf   : > { %v8987_v33 = vpop.f32.mrb[220].mxu0 }
 0x4c0   : > { %4392 = vxpose.xlu1.b32.start [1/16] (narrow) %v4042_v31, 8  ;;  %v8989_v2 = vpop.f32.mrb[221].mxu0  ;;  %4369 = vxpose.xlu0.b32.cont [10/16] (narrow) %v4013_v47, 8  ;;  %v4074_v31 = vadd.f32 %v8794_v53, %v8914_v48  ;;  %v4085_v48 = vadd.f32 %v8794_v53, %v8916_v51  ;;  %v4605_v51 = vmul.f32 1.442695, %v4596_v41  ;;  %v9576_v41 = vld [vmem:[#allocation18_spill] sm:$0xff] }
 0x4c1   : > { %v8993_v32 = vpop.f32.mrb[222].mxu0  ;;  %v4154_v59 = vadd.f32 %v8794_v53, %v8989_v2 }
 0x4c2   : > { %v8995_v23 = vpop.f32.mrb[223].mxu0  ;;  %7407 = vpow2.f32 %v4605_v51  ;;  %v9578_v51 = vld [vmem:[#allocation22_spill] sm:$0xff]  ;;  %v4165_v2 = vadd.f32 %v8794_v53, %v8993_v32 }
 0x4c4   : > { %4393 = vxpose.xlu1.b32.cont [2/16] (narrow) %v4045_v3, 8  ;;  %4370 = vxpose.xlu0.b32.cont [11/16] (narrow) %v4018_v42, 8  ;;  %v4090_v42 = vadd.f32 %v8794_v53, %v8922_v36  ;;  %v4098_v36 = vadd.f32 %v8794_v53, %v8920_v43 }
 0x4c8   : > { %4394 = vxpose.xlu1.b32.cont [3/16] (narrow) %v4050_v39, 8  ;;  %4371 = vxpose.xlu0.b32.cont [12/16] (narrow) %v4021_v12, 8 }
 0x4cc   : > { %4395 = vxpose.xlu1.b32.cont [4/16] (narrow) %v4053_v7, 8  ;;  %4372 = vxpose.xlu0.b32.cont [13/16] (narrow) %v4026_v46, 8  ;;  %v4093_v7 = vadd.f32 %v8794_v53, %v8926_v29 }
 0x4cf   : > { %v9011_v60 = vpop.f32.mrb[224].mxu0 }
 0x4d0   : > { %4396 = vxpose.xlu1.b32.cont [5/16] (narrow) %v4058_v16, 8  ;;  %v9013_v4 = vpop.f32.mrb[225].mxu0  ;;  %4373 = vxpose.xlu0.b32.cont [14/16] (narrow) %v4029_v44, 8 }
 0x4d1   : > { %v9017_v54 = vpop.f32.mrb[226].mxu0 }
 0x4d2   : > { %v9019_v45 = vpop.f32.mrb[227].mxu0 }
 0x4d4   : > { %4397 = vxpose.xlu1.b32.cont [6/16] (narrow) %v4061_v1, 8  ;;  %4374 = vxpose.xlu0.b32.cont [15/16] (narrow) %v4034_v56, 8  ;;  %v9071_v56 = vpop.eup %7407 }
 0x4d5   : > { %v4622_v43 = vsel %vm4570_vm5, %v9071_v56, 0.0 }
 0x4d8   : > { %4398 = vxpose.xlu1.b32.cont [7/16] (narrow) %v4066_v10, 8  ;;  %4375 = vxpose.xlu0.b32.end [16/16] (narrow) %v4037_v52, 8 }
 0x4dc   : > { %4399 = vxpose.xlu1.b32.cont [8/16] (narrow) %v4069_v28, 8 }
 0x4df   : > { %v9031_v47 = vpop.f32.mrb[228].mxu0 }
 0x4e0   : > { %4400 = vxpose.xlu1.b32.cont [9/16] (narrow) %v4074_v31, 8  ;;  %v9033_v17 = vpop.f32.mrb[229].mxu0  ;;  %v9572_v31 = vld [vmem:[#allocation11_spill] sm:$0xff] }
 0x4e1   : > { %v9037_v3 = vpop.f32.mrb[230].mxu0 }
 0x4e2   : > { %v9039_v62 = vpop.f32.mrb[231].mxu0 }
 0x4e4   : > { %4401 = vxpose.xlu1.b32.cont [10/16] (narrow) %v4077_v49, 8  ;;  %v9573_v49 = vld [vmem:[#allocation15_spill] sm:$0xff] }
 0x4e8   : > { %4402 = vxpose.xlu1.b32.cont [11/16] (narrow) %v4082_v63, 8 }
 0x4ec   : > { %4403 = vxpose.xlu1.b32.cont [12/16] (narrow) %v4085_v48, 8  ;;  %v9575_v48 = vld [vmem:[#allocation19_spill] sm:$0xff] }
 0x4ef   : > { %v9047_v39 = vpop.f32.mrb[232].mxu0 }
 0x4f0   : > { %4404 = vxpose.xlu1.b32.cont [13/16] (narrow) %v4090_v42, 8  ;;  %v9051_v12 = vpop.f32.mrb[233].mxu0 }
 0x4f1   : > { %v9055_v25 = vpop.f32.mrb[234].mxu0 }
 0x4f2   : > { %v9057_v46 = vpop.f32.mrb[235].mxu0 }
 0x4f3   : > { %v4205_v32 = vadd.f32 %v8794_v53, %v9057_v46 }
 0x4f4   : > { %4405 = vxpose.xlu1.b32.cont [14/16] (narrow) %v4093_v7, 8  ;;  %v9577_v7 = vld [vmem:[#allocation23_spill] sm:$0xff] }
 0x4f8   : > { %4406 = vxpose.xlu1.b32.cont [15/16] (narrow) %v4098_v36, 8  ;;  %v9063_v61 = vpop.xlane.xlu0 %4578 }
 0x4fc   : > { %4407 = vxpose.xlu1.b32.end [16/16] (narrow) %v4101_v19, 8  ;;  %v4621_v16 = vpop.xlane.xlu0 %4620 }
 0x4fd   : > { %7409 = vrcp.f32 %v4621_v16 }
 0x4ff   : > { %v9065_v29 = vpop.f32.mrb[236].mxu0 }
 0x500   : > { %v9067_v44 = vpop.f32.mrb[237].mxu0  ;;  %v4226_v46 = vadd.f32 %v8794_v53, %v9065_v29  ;;  %v9585_v29 = vld [vmem:[#allocation30_spill] sm:$0xff] }
 0x501   : > { %v9069_v1 = vpop.f32.mrb[238].mxu0 }
 0x502   : > { %v9073_v10 = vpop.f32.mrb[239].mxu0 }
 0x505   : > { %4623 = vadd.xlane.f32.xlu0 %v4622_v43  ;;  %v4106_v43 = vadd.f32 %v8794_v53, %v8943_v50  ;;  %v4125_v50 = vadd.f32 %v8794_v53, %v8959_v6  ;;  %v4146_v6 = vadd.f32 %v8794_v53, %v8969_v58  ;;  %v4157_v58 = vadd.f32 %v8794_v53, %v8995_v23 }
 0x506   : > { %v4194_v23 = vadd.f32 %v8794_v53, %v9031_v47 }
 0x507   : > { %v7410_v15 = vpop.eup %7409 }
 0x508   : > { %v4644_v52 = vmul.f32 %v7410_v15, %v8908_v9  ;;  %v9574_v9 = vld [vmem:[#allocation14_spill] sm:$0xff]  ;;  %v4109_v15 = vadd.f32 %v8794_v53, %v8947_v40  ;;  %v4130_v40 = vadd.f32 %v8794_v53, %v8953_v55  ;;  %v4149_v55 = vadd.f32 %v8794_v53, %v8973_v37 }
 0x509   : > { %v4162_v37 = vadd.f32 %v8794_v53, %v8987_v33  ;;  %v4197_v33 = vadd.f32 %v8794_v53, %v9037_v3 }
 0x50a   : > { %4659 = vst [vmem:[%s9079_s28] sm:$0x3] %v4644_v52  ;;  %v4667_v28 = vpack.c.bf16 %v4644_v52, %v4644_v52  ;;  %v4114_v52 = vadd.f32 %v8794_v53, %v8941_v24  ;;  %v4133_v24 = vadd.f32 %v8794_v53, %v8957_v21  ;;  %v4173_v21 = vadd.f32 %v8794_v53, %v9019_v45 }
 0x50b   : > { %v4186_v45 = vadd.f32 %v8794_v53, %v9033_v17 }
 0x50c   : > { %6258 = vmatmul.mubr.bf16.vlgmr.msra.gmra.mrb[240].mxu0 %v4667_v28  ;;  %v4122_v28 = vadd.f32 %v8794_v53, %v8955_v26  ;;  %v4141_v26 = vadd.f32 %v8794_v53, %v8975_v14  ;;  %v4178_v14 = vadd.f32 %v8794_v53, %v9011_v60  ;;  %v4189_v60 = vadd.f32 %v8794_v53, %v9039_v62 }
 0x50d   : > { %6282 = vmatpush3.bf16.msra.mxu0 %v7986_v13  ;;  %6297 = vmatprep.mubr.msk.bf16.mxu0 %vm7543_vm7, %v9563_v57  ;;  %v4210_v62 = vadd.f32 %v8794_v53, %v9047_v39  ;;  %v4221_v39 = vadd.f32 %v8794_v53, %v9073_v10  ;;  %v9583_v10 = vld [vmem:[#allocation29_spill] sm:$0xff] }
 0x50e   : > { %6283 = vmatprep.subr.bf16.mxu0 %v9563_v57 }
 0x511   : > { %6284 = vmatpush3.bf16.msra.mxu0 %v9572_v31  ;;  %v4170_v31 = vadd.f32 %v8794_v53, %v9013_v4  ;;  %v4181_v4 = vadd.f32 %v8794_v53, %v9017_v54  ;;  %v4202_v54 = vadd.f32 %v8794_v53, %v9051_v12  ;;  %v4218_v12 = vadd.f32 %v8794_v53, %v9067_v44  ;;  %v9581_v44 = vld [vmem:[#allocation27_spill] sm:$0xff] }
 0x512   : > { %6285 = vmatprep.subr.bf16.mxu0 %v9563_v57 }
 0x515   : > { %6286 = vmatpush3.bf16.msra.mxu0 %v9573_v49  ;;  %v4213_v49 = vadd.f32 %v8794_v53, %v9055_v25  ;;  %v9580_v25 = vld [vmem:[#allocation24_spill] sm:$0xff] }
 0x516   : > { %6287 = vmatprep.subr.bf16.mxu0 %v9563_v57 }
 0x519   : > { %6288 = vmatpush3.bf16.msra.mxu0 %v9574_v9 }
 0x51a   : > { %6289 = vmatprep.subr.bf16.mxu0 %v9563_v57  ;;  %v9107_v22 = vpop.xlane.xlu1 %4581 }
 0x51b   : > { %v4598_v18 = vsub.f32 %v8933_v11, %v9107_v22 }
 0x51c   : > { %v4376_v63 = vpop.trf.xlu0 }
 0x51d   : > { %v9095_v13 = vsel %vm4558_vm3, %v4376_v63, -1e+30  ;;  %6290 = vmatpush3.bf16.msra.mxu0 %v9575_v48  ;;  %v9579_v63 = vld [vmem:[#allocation25_spill] sm:$0xff]  ;;  %v9582_v48 = vld [vmem:[#allocation26_spill] sm:$0xff] }
 0x51e   : > { %v4583_v42 = vsel %vm4570_vm5, %v9095_v13, -inf  ;;  %6291 = vmatprep.subr.bf16.mxu0 %v9563_v57 }
 0x51f   : > { %4584 = vmax.xlane.f32.xlu0 %v4583_v42  ;;  %v9584_v42 = vld [vmem:[#allocation28_spill] sm:$0xff] }
 0x521   : > { %6292 = vmatpush3.bf16.msra.mxu0 %v9576_v41  ;;  %v9586_v41 = vld [vmem:[#allocation31_spill] sm:$0xff] }
 0x522   : > { %6293 = vmatprep.subr.bf16.mxu0 %v9563_v57 }
 0x525   : > { %6294 = vmatpush3.bf16.msra.mxu0 %v9577_v7 }
 0x526   : > { %6295 = vmatprep.subr.bf16.mxu0 %v9563_v57 }
 0x529   : > { %6296 = vmatpush3.bf16.msra.mxu0 %v9578_v51 }
 0x52a   : > { %6321 = vmatprep.subr.bf16.mxu0 %v9563_v57 }
 0x540   : > { %v4408_v36 = vpop.trf.xlu1 }
 0x541   : > { %v9112_v19 = vsel %vm4559_vm2, %v4408_v36, -1e+30 }
 0x542   : > { %v4586_v16 = vsel %vm4570_vm5, %v9112_v19, -inf }
 0x543   : > { %4587 = vmax.xlane.f32.xlu1 %v4586_v16 }
 0x54c   : > { %4424 = vxpose.xlu0.b32.start [1/16] (narrow) %v4106_v43, 8 }
 0x550   : > { %4425 = vxpose.xlu0.b32.cont [2/16] (narrow) %v4109_v15, 8 }
 0x554   : > { %4426 = vxpose.xlu0.b32.cont [3/16] (narrow) %v4114_v52, 8 }
 0x558   : > { %4427 = vxpose.xlu0.b32.cont [4/16] (narrow) %v4117_v30, 8 }
 0x55c   : > { %4428 = vxpose.xlu0.b32.cont [5/16] (narrow) %v4122_v28, 8 }
 0x560   : > { %4429 = vxpose.xlu0.b32.cont [6/16] (narrow) %v4125_v50, 8 }
 0x564   : > { %4430 = vxpose.xlu0.b32.cont [7/16] (narrow) %v4130_v40, 8 }
 0x568   : > { %4431 = vxpose.xlu0.b32.cont [8/16] (narrow) %v4133_v24, 8 }
 0x56c   : > { %4432 = vxpose.xlu0.b32.cont [9/16] (narrow) %v4138_v0, 8  ;;  %v4609_v0 = vmul.f32 1.442695, %v4598_v18  ;;  %v9601_v18 = vld [vmem:[#allocation48_spill] sm:$0xff] }
 0x570   : > { %4433 = vxpose.xlu0.b32.cont [10/16] (narrow) %v4141_v26, 8 }
 0x574   : > { %4434 = vxpose.xlu0.b32.cont [11/16] (narrow) %v4146_v6, 8 }
 0x576   : > { %4456 = vxpose.xlu1.b32.start [1/16] (narrow) %v4170_v31, 8 }
 0x578   : > { %4435 = vxpose.xlu0.b32.cont [12/16] (narrow) %v4149_v55, 8 }
 0x57a   : > { %4457 = vxpose.xlu1.b32.cont [2/16] (narrow) %v4173_v21, 8 }
 0x57c   : > { %4436 = vxpose.xlu0.b32.cont [13/16] (narrow) %v4154_v59, 8 }
 0x57e   : > { %4458 = vxpose.xlu1.b32.cont [3/16] (narrow) %v4178_v14, 8 }
 0x580   : > { %4437 = vxpose.xlu0.b32.cont [14/16] (narrow) %v4157_v58, 8 }
 0x582   : > { %4459 = vxpose.xlu1.b32.cont [4/16] (narrow) %v4181_v4, 8 }
 0x584   : > { %4438 = vxpose.xlu0.b32.cont [15/16] (narrow) %v4162_v37, 8 }
 0x586   : > { %4460 = vxpose.xlu1.b32.cont [5/16] (narrow) %v4186_v45, 8 }
 0x588   : > { %4439 = vxpose.xlu0.b32.end [16/16] (narrow) %v4165_v2, 8 }
 0x58a   : > { %4461 = vxpose.xlu1.b32.cont [6/16] (narrow) %v4189_v60, 8 }
 0x58e   : > { %4462 = vxpose.xlu1.b32.cont [7/16] (narrow) %v4194_v23, 8 }
 0x592   : > { %4463 = vxpose.xlu1.b32.cont [8/16] (narrow) %v4197_v33, 8  ;;  %v4624_v17 = vpop.xlane.xlu0 %4623 }
 0x593   : > { %7411 = vrcp.f32 %v4624_v17 }
 0x596   : > { %4464 = vxpose.xlu1.b32.cont [9/16] (narrow) %v4202_v54, 8 }
 0x59a   : > { %4465 = vxpose.xlu1.b32.cont [10/16] (narrow) %v4205_v32, 8 }
 0x59d   : > { %v7412_v47 = vpop.eup %7411 }
 0x59e   : > { %4466 = vxpose.xlu1.b32.cont [11/16] (narrow) %v4210_v62, 8  ;;  %v4646_v3 = vmul.f32 %v7412_v47, %v9071_v56  ;;  %v4229_v56 = vadd.f32 %v8794_v53, %v9069_v1  ;;  %v4597_v53 = vsub.f32 %v8904_v27, %v9063_v61 }
 0x5a0   : > { %4660 = vst [vmem:[%s9079_s28 + $0x2] sm:$0x3] %v4646_v3  ;;  %v4668_v9 = vpack.c.bf16 %v4646_v3, %v4646_v3  ;;  %v4607_v7 = vmul.f32 1.442695, %v4597_v53 }
 0x5a2   : > { %4467 = vxpose.xlu1.b32.cont [12/16] (narrow) %v4213_v49, 8  ;;  %6278 = vmatmul.mubr.bf16.vlgmr.msra.gmra.mrb[16].mxu1 %v4668_v9  ;;  %7413 = vpow2.f32 %v4607_v7 }
 0x5a3   : > { %6302 = vmatpush3.bf16.msra.mxu1 %v9579_v63  ;;  %6317 = vmatprep.mubr.msk.bf16.mxu1 %vm7543_vm7, %v9563_v57 }
 0x5a4   : > { %6303 = vmatprep.subr.bf16.mxu1 %v9563_v57 }
 0x5a6   : > { %4468 = vxpose.xlu1.b32.cont [13/16] (narrow) %v4218_v12, 8 }
 0x5a7   : > { %6304 = vmatpush3.bf16.msra.mxu1 %v9580_v25  ;;  %v4995_v25 = vld [vmem:[%s421_s21] sm:$0xff]  ;;  %s7544_s21 = smov [#allocation5]  }
 0x5a8   : > { %6305 = vmatprep.subr.bf16.mxu1 %v9563_v57  ;;  %s7474_s12 = sshll.u32 %s7544_s21, 4  ;;  %s7475_s12 = int_to_ptr.vmem [resolvable:$false] %s7474_s12 }
 0x5a9   : > { %s7476_s17 = scalar_lea.vmem %s7475_s12, 512  ;;  %p7477_p0 = scmp.lt.s32.totalorder %s9401_s30, %s7475_s12 }
 0x5aa   : > { %4469 = vxpose.xlu1.b32.cont [14/16] (narrow) %v4221_v39, 8  ;;  %p7478_p2 = scmp.lt.s32.totalorder %s7476_s17, %s7470_s20 }
 0x5ab   : > { %6306 = vmatpush3.bf16.msra.mxu1 %v9581_v44 }
 0x5ac   : > { %6307 = vmatprep.subr.bf16.mxu1 %v9563_v57  ;;  %v4585_v1 = vpop.xlane.xlu0 %4584  ;;  %v7414_v52 = vpop.eup %7413  ;;  %p7479_p4 = por %p7478_p2, %p7477_p0 }
 0x5ad   : > { %v4599_v51 = vsub.f32 %v9095_v13, %v4585_v1  ;;  %v4625_v27 = vsel %vm4570_vm5, %v7414_v52, 0.0  ;;  %v9592_v1 = vld [vmem:[#allocation45_spill] sm:$0xff] }
 0x5ae   : > { %4470 = vxpose.xlu1.b32.cont [15/16] (narrow) %v4226_v46, 8  ;;  %v9588_v46 = vld [vmem:[#allocation32_spill] sm:$0xff]  ;;  %p7480_p5 = pnand %p7479_p4, %p7473_p10 }
 0x5af   : > { %6308 = vmatpush3.bf16.msra.mxu1 %v9582_v48  ;;  %v4611_v36 = vmul.f32 1.442695, %v4599_v51 }
 0x5b0   : > { %6309 = vmatprep.subr.bf16.mxu1 %v9563_v57 }
 0x5b1   : > { %7415 = vpow2.f32 %v4611_v36 }
 0x5b2   : > { %4471 = vxpose.xlu1.b32.end [16/16] (narrow) %v4229_v56, 8  ;;  %7417 = vpow2.f32 %v4609_v0  ;;  %v9589_v56 = vld [vmem:[#allocation33_spill] sm:$0xff]  ;;  %v9603_v0 = vld [vmem:[#allocation51_spill] sm:$0xff] }
 0x5b3   : > { %6310 = vmatpush3.bf16.msra.mxu1 %v9583_v10 }
 0x5b4   : > { %6311 = vmatprep.subr.bf16.mxu1 %v9563_v57 }
 0x5b7   : > { %6312 = vmatpush3.bf16.msra.mxu1 %v9584_v42  ;;  %v9590_v42 = vld [vmem:[#allocation34_spill] sm:$0xff] }
 0x5b8   : > { %6313 = vmatprep.subr.bf16.mxu1 %v9563_v57 }
 0x5bb   : > { %6314 = vmatpush3.bf16.msra.mxu1 %v9585_v29  ;;  %v7416_v61 = vpop.eup %7415  ;;  %v9591_v29 = vld [vmem:[#allocation35_spill] sm:$0xff] }
 0x5bc   : > { %6315 = vmatprep.subr.bf16.mxu1 %v9563_v57  ;;  %v4631_v30 = vsel %vm4570_vm5, %v7416_v61, 0.0  ;;  %v9214_v59 = vpop.eup %7417 }
 0x5bd   : > { %v4628_v11 = vsel %vm4570_vm5, %v9214_v59, 0.0 }
 0x5bf   : > { %6316 = vmatpush3.bf16.msra.mxu1 %v9586_v41 }
 0x5c0   : > { %6341 = vmatprep.subr.bf16.mxu1 %v9563_v57 }
 0x5cc   : > { %v4440_v16 = vpop.trf.xlu0 }
 0x5cd   : > { %v4568_v43 = vsel %vm4560_vm8, %v4440_v16, -1e+30  ;;  %v9593_v16 = vld [vmem:[#allocation44_spill] sm:$0xff] }
 0x5ce   : > { %v4589_v15 = vsel %vm4570_vm5, %v4568_v43, -inf }
 0x5cf   : > { %4590 = vmax.xlane.f32.xlu0 %v4589_v15 }
 0x5d0   : > { %v4588_v24 = vpop.xlane.xlu1 %4587 }
 0x5d1   : > { %v4600_v26 = vsub.f32 %v9112_v19, %v4588_v24  ;;  %v9602_v24 = vld [vmem:[#allocation40_spill] sm:$0xff] }
 0x5d3   : > { %4626 = vadd.xlane.f32.xlu0 %v4625_v27  ;;  %v4613_v6 = vmul.f32 1.442695, %v4600_v26  ;;  %v9594_v27 = vld [vmem:[#allocation36_spill] sm:$0xff]  ;;  %v9604_v26 = vld [vmem:[#allocation41_spill] sm:$0xff] }
 0x5d5   : > { %7419 = vpow2.f32 %v4613_v6  ;;  %v9605_v6 = vld [vmem:[#allocation50_spill] sm:$0xff] }
 0x5d7   : > { %4632 = vadd.xlane.f32.xlu0 %v4631_v30  ;;  %v9596_v30 = vld [vmem:[#allocation37_spill] sm:$0xff] }
 0x5df   : > { %v4709_v13 = vpop.f32.mrb[240].mxu0  ;;  %v9218_v22 = vpop.eup %7419 }
 0x5e0   : > { %v6259_v28 = vpop.f32.mrb[241].mxu0  ;;  %v4634_v19 = vsel %vm4570_vm5, %v9218_v22, 0.0  ;;  %v5014_v54 = vpack.c.bf16 %v4709_v13, %v4709_v13  ;;  %v9597_v13 = vld [vmem:[#allocation46_spill] sm:$0xff] }
 0x5e1   : > { %v4712_v50 = vpop.f32.mrb[242].mxu0  ;;  %v9598_v28 = vld [vmem:[#allocation38_spill] sm:$0xff] }
 0x5e2   : > { %v6260_v40 = vpop.f32.mrb[243].mxu0  ;;  %v5046_v32 = vunpack.c.l.b16 %v5014_v54  ;;  %v9599_v50 = vld [vmem:[#allocation49_spill] sm:$0xff] }
 0x5e3   : > { %v9600_v40 = vld [vmem:[#allocation39_spill] sm:$0xff] }
 0x5f6   : > { %v4472_v31 = vpop.trf.xlu1 }
 0x5f7   : > { %v4569_v55 = vsel %vm4561_vm9, %v4472_v31, -1e+30  ;;  %v9606_v31 = vld [vmem:[#allocation43_spill] sm:$0xff] }
 0x5f8   : > { %v4592_v21 = vsel %vm4570_vm5, %v4569_v55, -inf }
 0x5f9   : > { %4593 = vmax.xlane.f32.xlu1 %v4592_v21 }
 0x5fd   : > { %4629 = vadd.xlane.f32.xlu1 %v4628_v11  ;;  %v9609_v11 = vld [vmem:[#allocation10_spill] sm:$0xff] }
 0x601   : > { %4635 = vadd.xlane.f32.xlu1 %v4634_v19  ;;  %v9611_v19 = vld [vmem:[#allocation13_spill] sm:$0xff] }
 0x65c   : > { %v4591_v14 = vpop.xlane.xlu0 %4590 }
 0x65d   : > { %v4601_v5 = vsub.f32 %v4568_v43, %v4591_v14  ;;  %v9612_v14 = vld [vmem:[#allocation17_spill] sm:$0xff] }
 0x65f   : > { %v4615_v35 = vmul.f32 1.442695, %v4601_v5  ;;  %v9613_v5 = vld [vmem:[#allocation16_spill] sm:$0xff] }
 0x660   : > { %v4627_v58 = vpop.xlane.xlu0 %4626 }
 0x661   : > { %7421 = vpow2.f32 %v4615_v35  ;;  %v9614_v35 = vld [vmem:[#allocation21_spill] sm:$0xff] }
 0x662   : > { %7423 = vrcp.f32 %v4627_v58  ;;  %v9615_v58 = vld [vmem:[#allocation20_spill] sm:$0xff] }
 0x664   : > { %v4633_v4 = vpop.xlane.xlu0 %4632 }
 0x665   : > { %7425 = vrcp.f32 %v4633_v4 }
 0x66b   : > { %v9222_v37 = vpop.eup %7421 }
 0x66c   : > { %v7424_v45 = vpop.eup %7423  ;;  %v4637_v2 = vsel %vm4570_vm5, %v9222_v37, 0.0 }
 0x66d   : > { %4638 = vadd.xlane.f32.xlu0 %v4637_v2  ;;  %v4648_v60 = vmul.f32 %v7424_v45, %v7414_v52 }
 0x66f   : > { %v7426_v23 = vpop.eup %7425  ;;  %4661 = vst [vmem:[%s9079_s28 + $0x4] sm:$0x3] %v4648_v60  ;;  %v4669_v33 = vpack.c.bf16 %v4648_v60, %v4648_v60 }
 0x670   : > { %v4652_v17 = vmul.f32 %v7426_v23, %v7416_v61  ;;  %v9595_v61 = vld [vmem:[#allocation47_spill] sm:$0xff] }
 0x671   : > { %6298 = vmatmul.mubr.bf16.vlgmr.msra.gmra.mrb[244].mxu0 %v4669_v33 }
 0x672   : > { %6322 = vmatpush3.bf16.msra.mxu0 %v8097_v8  ;;  %6337 = vmatprep.mubr.msk.bf16.mxu0 %vm7543_vm7, %v9563_v57  ;;  %4663 = vst [vmem:[%s9079_s28 + $0x8] sm:$0x3] %v4652_v17  ;;  %v5183_v8 = vrot.slane %v5046_v32, 1  ;;  %v4671_v53 = vpack.c.bf16 %v4652_v17, %v4652_v17 }
 0x673   : > { %6323 = vmatprep.subr.bf16.mxu0 %v9563_v57 }
 0x675   : > { %v4749_v62 = vpop.f32.mrb[16].mxu1 }
 0x676   : > { %6324 = vmatpush3.bf16.msra.mxu0 %v8103_v20  ;;  %v5015_v47 = vpack.c.bf16 %v4749_v62, %v4749_v62  ;;  %v6279_v49 = vpop.f32.mrb[17].mxu1 }
 0x677   : > { %v4752_v3 = vpop.f32.mrb[18].mxu1  ;;  %6325 = vmatprep.subr.bf16.mxu0 %v9563_v57 }
 0x678   : > { %v5047_v9 = vunpack.c.l.b16 %v5015_v47  ;;  %v6280_v12 = vpop.f32.mrb[19].mxu1 }
 0x67a   : > { %v5054_v63 = vrot.slane %v5047_v9, 7  ;;  %v9238_v39 = vsel %vm5055_vm10, %v5047_v9, %v5183_v8  ;;  %6326 = vmatpush3.bf16.msra.mxu0 %v8109_v34 }
 0x67b   : > { %6327 = vmatprep.subr.bf16.mxu0 %v9563_v57 }
 0x67c   : > { %v9243_v20 = vsel %vm5055_vm10, %v5054_v63, %v5046_v32 }
 0x67e   : > { %6328 = vmatpush3.bf16.msra.mxu0 %v8115_v38 }
 0x67f   : > { %6329 = vmatprep.subr.bf16.mxu0 %v9563_v57 }
 0x682   : > { %6330 = vmatpush3.bf16.msra.mxu0 %v9588_v46  ;;  %v6621_v46 = vld [vmem:[%s9462_s6] sm:$0xff]  }
 0x683   : > { %4999 = vperm.xlu0 %6515, %v4995_v25   ;;  %6331 = vmatprep.subr.bf16.mxu0 %v9563_v57 }
 0x686   : > { %v4594_v34 = vpop.xlane.xlu1 %4593  ;;  %6332 = vmatpush3.bf16.msra.mxu0 %v9589_v56  ;;  %v6622_v56 = vld [vmem:[%s9462_s6 + $0x8] sm:$0xff]  }
 0x687   : > { %v4602_v44 = vsub.f32 %v4569_v55, %v4594_v34  ;;  %6333 = vmatprep.subr.bf16.mxu0 %v9563_v57  ;;  %v9607_v55 = vld [vmem:[#allocation42_spill] sm:$0xff] }
 0x689   : > { %v4617_v48 = vmul.f32 1.442695, %v4602_v44 }
 0x68a   : > { %v4630_v10 = vpop.xlane.xlu1 %4629  ;;  %6334 = vmatpush3.bf16.msra.mxu0 %v9590_v42 }
 0x68b   : > { %7427 = vpow2.f32 %v4617_v48  ;;  %6335 = vmatprep.subr.bf16.mxu0 %v9563_v57 }
 0x68c   : > { %7429 = vrcp.f32 %v4630_v10 }
 0x68e   : > { %v4636_v38 = vpop.xlane.xlu1 %4635  ;;  %6336 = vmatpush3.bf16.msra.mxu0 %v9591_v29 }
 0x68f   : > { %7431 = vrcp.f32 %v4636_v38  ;;  %6361 = vmatprep.subr.bf16.mxu0 %v9563_v57 }
 0x691   : > { %6338 = vmatmul.mubr.bf16.vlgmr.msra.gmra.mrb[248].mxu0 %v4671_v53 }
 0x692   : > { %6362 = vmatpush3.bf16.msra.mxu0 %v9592_v1  ;;  %6377 = vmatprep.mubr.msk.bf16.mxu0 %vm7543_vm7, %v9563_v57  ;;  %v6624_v1 = vld [vmem:[%s9462_s6 + $0x18] sm:$0xff]  }
 0x693   : > { %6363 = vmatprep.subr.bf16.mxu0 %v9563_v57 }
 0x695   : > { %v9263_v41 = vpop.eup %7427 }
 0x696   : > { %v7430_v7 = vpop.eup %7429  ;;  %v4640_v51 = vsel %vm4570_vm5, %v9263_v41, 0.0  ;;  %6364 = vmatpush3.bf16.msra.mxu0 %v9593_v16 }
 0x697   : > { %v4650_v36 = vmul.f32 %v7430_v7, %v9214_v59  ;;  %4641 = vadd.xlane.f32.xlu1 %v4640_v51  ;;  %6365 = vmatprep.subr.bf16.mxu0 %v9563_v57  ;;  %v9608_v59 = vld [vmem:[#allocation9_spill] sm:$0xff] }
 0x699   : > { %v7432_v43 = vpop.eup %7431  ;;  %4662 = vst [vmem:[%s9079_s28 + $0x6] sm:$0x3] %v4650_v36  ;;  %v4670_v15 = vpack.c.bf16 %v4650_v36, %v4650_v36 }
 0x69a   : > { %v4654_v52 = vmul.f32 %v7432_v43, %v9218_v22  ;;  %6366 = vmatpush3.bf16.msra.mxu0 %v9595_v61  ;;  %v9610_v22 = vld [vmem:[#allocation12_spill] sm:$0xff] }
 0x69b   : > { %6318 = vmatmul.mubr.bf16.vlgmr.msra.gmra.mrb[20].mxu1 %v4670_v15  ;;  %6367 = vmatprep.subr.bf16.mxu0 %v9563_v57  ;;  %v6625_v15 = vld [vmem:[%s9462_s6 + $0x20] sm:$0xff]  }
 0x69c   : > { %4664 = vst [vmem:[%s9079_s28 + $0xa] sm:$0x3] %v4654_v52  ;;  %6342 = vmatpush3.bf16.msra.mxu1 %v9594_v27  ;;  %6357 = vmatprep.mubr.msk.bf16.mxu1 %vm7543_vm7, %v9563_v57  ;;  %v4672_v21 = vpack.c.bf16 %v4654_v52, %v4654_v52 }
 0x69d   : > { %6343 = vmatprep.subr.bf16.mxu1 %v9563_v57 }
 0x69e   : > { %6368 = vmatpush3.bf16.msra.mxu0 %v9597_v13  ;;  %v6626_v13 = vld [vmem:[%s9462_s6 + $0x28] sm:$0xff]  }
 0x69f   : > { %6369 = vmatprep.subr.bf16.mxu0 %v9563_v57 }
 0x6a0   : > { %6344 = vmatpush3.bf16.msra.mxu1 %v9596_v30 }
 0x6a1   : > { %6345 = vmatprep.subr.bf16.mxu1 %v9563_v57 }
 0x6a2   : > { %6370 = vmatpush3.bf16.msra.mxu0 %v9599_v50  ;;  %v6628_v50 = vld [vmem:[%s9462_s6 + $0x38] sm:$0xff]  }
 0x6a3   : > { %6371 = vmatprep.subr.bf16.mxu0 %v9563_v57 }
 0x6a4   : > { %6346 = vmatpush3.bf16.msra.mxu1 %v9598_v28  ;;  %v6627_v28 = vld [vmem:[%s9462_s6 + $0x30] sm:$0xff]  }
 0x6a5   : > { %6347 = vmatprep.subr.bf16.mxu1 %v9563_v57 }
 0x6a6   : > { %6372 = vmatpush3.bf16.msra.mxu0 %v9601_v18 }
 0x6a7   : > { %6373 = vmatprep.subr.bf16.mxu0 %v9563_v57 }
 0x6a8   : > { %6348 = vmatpush3.bf16.msra.mxu1 %v9600_v40 }
 0x6a9   : > { %6349 = vmatprep.subr.bf16.mxu1 %v9563_v57 }
 0x6aa   : > { %6374 = vmatpush3.bf16.msra.mxu0 %v9603_v0 }
 0x6ab   : > { %6375 = vmatprep.subr.bf16.mxu0 %v9563_v57 }
 0x6ac   : > { %6350 = vmatpush3.bf16.msra.mxu1 %v9602_v24 }
 0x6ad   : > { %6351 = vmatprep.subr.bf16.mxu1 %v9563_v57 }
 0x6ae   : > { %6376 = vmatpush3.bf16.msra.mxu0 %v9605_v6 }
 0x6af   : > { %6401 = vmatprep.subr.bf16.mxu0 %v9563_v57 }
 0x6b0   : > { %6352 = vmatpush3.bf16.msra.mxu1 %v9604_v26 }
 0x6b1   : > { %6353 = vmatprep.subr.bf16.mxu1 %v9563_v57 }
 0x6b4   : > { %6354 = vmatpush3.bf16.msra.mxu1 %v9606_v31 }
 0x6b5   : > { %6355 = vmatprep.subr.bf16.mxu1 %v9563_v57 }
 0x6b8   : > { %6356 = vmatpush3.bf16.msra.mxu1 %v9607_v55 }
 0x6b9   : > { %6381 = vmatprep.subr.bf16.mxu1 %v9563_v57 }
 0x6bb   : > { %6358 = vmatmul.mubr.bf16.vlgmr.msra.gmra.mrb[24].mxu1 %v4672_v21 }
 0x6bc   : > { %6382 = vmatpush3.bf16.msra.mxu1 %v9608_v59  ;;  %6397 = vmatprep.mubr.msk.bf16.mxu1 %vm7543_vm7, %v9563_v57 }
 0x6bd   : > { %6383 = vmatprep.subr.bf16.mxu1 %v9563_v57 }
 0x6c0   : > { %6384 = vmatpush3.bf16.msra.mxu1 %v9609_v11 }
 0x6c1   : > { %6385 = vmatprep.subr.bf16.mxu1 %v9563_v57 }
 0x6c4   : > { %6386 = vmatpush3.bf16.msra.mxu1 %v9610_v22 }
 0x6c5   : > { %6387 = vmatprep.subr.bf16.mxu1 %v9563_v57 }
 0x6c8   : > { %6388 = vmatpush3.bf16.msra.mxu1 %v9611_v19 }
 0x6c9   : > { %6389 = vmatprep.subr.bf16.mxu1 %v9563_v57 }
 0x6cc   : > { %6390 = vmatpush3.bf16.msra.mxu1 %v9612_v14 }
 0x6cd   : > { %6391 = vmatprep.subr.bf16.mxu1 %v9563_v57 }
 0x6d0   : > { %6392 = vmatpush3.bf16.msra.mxu1 %v9613_v5 }
 0x6d1   : > { %6393 = vmatprep.subr.bf16.mxu1 %v9563_v57 }
 0x6d4   : > { %6394 = vmatpush3.bf16.msra.mxu1 %v9614_v35 }
 0x6d5   : > { %6395 = vmatprep.subr.bf16.mxu1 %v9563_v57 }
 0x6d8   : > { %6396 = vmatpush3.bf16.msra.mxu1 %v9615_v58 }
 0x6fa   : > { %v4639_v4 = vpop.xlane.xlu0 %4638 }
 0x6fb   : > { %7433 = vrcp.f32 %v4639_v4 }
 0x705   : > { %v7434_v45 = vpop.eup %7433 }
 0x706   : > { %v4656_v2 = vmul.f32 %v7434_v45, %v9222_v37 }
 0x708   : > { %4665 = vst [vmem:[%s9079_s28 + $0xc] sm:$0x3] %v4656_v2  ;;  %v4673_v60 = vpack.c.bf16 %v4656_v2, %v4656_v2 }
 0x70a   : > { %6378 = vmatmul.mubr.bf16.vlgmr.msra.gmra.mrb[252].mxu0 %v4673_v60 }
 0x70b   : > { %6417 = vmatprep.mubr.msk.bf16.mxu0 %vm7543_vm7, %v9563_v57  ;;  %6402 = vmatpush3.bf16.msra.mxu0 %v6621_v46  ;;  %v6634_v46 = vld [vmem:[%s9462_s6 + $0x68] sm:$0xff]  }
 0x70c   : > { %6403 = vmatprep.subr.bf16.mxu0 %v9563_v57 }
 0x70f   : > { %6404 = vmatpush3.bf16.msra.mxu0 %v6622_v56 }
 0x710   : > { %6405 = vmatprep.subr.bf16.mxu0 %v9563_v57 }
 0x724   : > { %v4642_v23 = vpop.xlane.xlu1 %4641 }
 0x725   : > { %7435 = vrcp.f32 %v4642_v23 }
 0x72f   : > { %v7436_v33 = vpop.eup %7435 }
 0x730   : > { %v4658_v54 = vmul.f32 %v7436_v33, %v9263_v41 }
 0x732   : > { %4666 = vst [vmem:[%s9079_s28 + $0xe] sm:$0x3] %v4658_v54  ;;  %v4674_v17 = vpack.c.bf16 %v4658_v54, %v4658_v54 }
 0x734   : > { %6398 = vmatmul.mubr.bf16.vlgmr.msra.gmra.mrb[28].mxu1 %v4674_v17 }
 0x744   : > { %v4789_v32 = vpop.f32.mrb[244].mxu0 }
 0x745   : > { %v5016_v62 = vpack.c.bf16 %v4789_v32, %v4789_v32  ;;  %v6299_v47 = vpop.f32.mrb[245].mxu0 }
 0x746   : > { %v4792_v49 = vpop.f32.mrb[246].mxu0 }
 0x747   : > { %v5048_v3 = vunpack.c.l.b16 %v5016_v62  ;;  %v6300_v37 = vpop.f32.mrb[247].mxu0 }
 0x748   : > { %v6629_v37 = vld [vmem:[%s9462_s6 + $0x40] sm:$0xff]  }
 0x749   : > { %v5057_v8 = vrot.slane %v5048_v3, 6  ;;  %v5185_v9 = vrot.slane %v5048_v3, 7 }
 0x74b   : > { %v5059_v12 = vsel %vm5058_vm11, %v5057_v8, %v9243_v20  ;;  %v5186_v63 = vsel %vm5058_vm11, %v5185_v9, %v9238_v39  ;;  %v6623_v39 = vld [vmem:[%s9462_s6 + $0x10] sm:$0xff]   ;;  %v6630_v9 = vld [vmem:[%s9462_s6 + $0x48] sm:$0xff]  }
 0x74c   : > { %6406 = vmatpush3.bf16.msra.mxu0 %v6623_v39 }
 0x74d   : > { %6407 = vmatprep.subr.bf16.mxu0 %v9563_v57 }
 0x750   : > { %6408 = vmatpush3.bf16.msra.mxu0 %v6624_v1 }
 0x751   : > { %6409 = vmatprep.subr.bf16.mxu0 %v9563_v57 }
 0x754   : > { %6410 = vmatpush3.bf16.msra.mxu0 %v6625_v15 }
 0x755   : > { %6411 = vmatprep.subr.bf16.mxu0 %v9563_v57 }
 0x758   : > { %6412 = vmatpush3.bf16.msra.mxu0 %v6626_v13 }
 0x759   : > { %6413 = vmatprep.subr.bf16.mxu0 %v9563_v57 }
 0x75c   : > { %6414 = vmatpush3.bf16.msra.mxu0 %v6627_v28 }
 0x75d   : > { %6415 = vmatprep.subr.bf16.mxu0 %v9563_v57 }
 0x760   : > { %6416 = vmatpush3.bf16.msra.mxu0 %v6628_v50 }
 0x761   : > { %6421 = vmatprep.subr.bf16.mxu0 %v9563_v57 }
 0x764   : > { %v4869_v25 = vpop.f32.mrb[248].mxu0 }
 0x765   : > { %v6339_v34 = vpop.f32.mrb[249].mxu0  ;;  %v5018_v10 = vpack.c.bf16 %v4869_v25, %v4869_v25  ;;  %v6633_v25 = vld [vmem:[%s9462_s6 + $0x60] sm:$0xff]  }
 0x766   : > { %v4872_v44 = vpop.f32.mrb[250].mxu0  ;;  %v6635_v34 = vld [vmem:[%s9462_s6 + $0x70] sm:$0xff]  }
 0x767   : > { %v6340_v48 = vpop.f32.mrb[251].mxu0  ;;  %v5050_v29 = vunpack.c.l.b16 %v5018_v10  ;;  %v6636_v44 = vld [vmem:[%s9462_s6 + $0x78] sm:$0xff]  }
 0x769   : > { %v5063_v16 = vrot.slane %v5050_v29, 4  ;;  %v5189_v43 = vrot.slane %v5050_v29, 5 }
 0x76e   : > { %v4829_v20 = vpop.f32.mrb[20].mxu1 }
 0x76f   : > { %v5017_v42 = vpack.c.bf16 %v4829_v20, %v4829_v20  ;;  %v6319_v38 = vpop.f32.mrb[21].mxu1 }
 0x770   : > { %v4832_v53 = vpop.f32.mrb[22].mxu1 }
 0x771   : > { %v5049_v41 = vunpack.c.l.b16 %v5017_v42  ;;  %v6320_v7 = vpop.f32.mrb[23].mxu1 }
 0x773   : > { %v5060_v51 = vrot.slane %v5049_v41, 5  ;;  %v5187_v36 = vrot.slane %v5049_v41, 6 }
 0x775   : > { %v5062_v52 = vsel %vm5061_vm12, %v5060_v51, %v5059_v12  ;;  %v5188_v27 = vsel %vm5061_vm12, %v5187_v36, %v5186_v63  ;;  %v6631_v12 = vld [vmem:[%s9462_s6 + $0x50] sm:$0xff]   ;;  %v6632_v63 = vld [vmem:[%s9462_s6 + $0x58] sm:$0xff]  }
 0x776   : > { %v5065_v61 = vsel %vm5064_vm13, %v5063_v16, %v5062_v52  ;;  %v5190_v30 = vsel %vm5064_vm13, %v5189_v43, %v5188_v27 }
 0x78e   : > { %v4909_v40 = vpop.f32.mrb[24].mxu1 }
 0x78f   : > { %v5019_v18 = vpack.c.bf16 %v4909_v40, %v4909_v40  ;;  %v6359_v24 = vpop.f32.mrb[25].mxu1 }
 0x790   : > { %v4912_v0 = vpop.f32.mrb[26].mxu1 }
 0x791   : > { %v5051_v26 = vunpack.c.l.b16 %v5019_v18  ;;  %v6360_v6 = vpop.f32.mrb[27].mxu1 }
 0x793   : > { %v5066_v31 = vrot.slane %v5051_v26, 3  ;;  %v5191_v55 = vrot.slane %v5051_v26, 4 }
 0x795   : > { %v5068_v21 = vsel %vm5067_vm14, %v5066_v31, %v5065_v61  ;;  %v5192_v59 = vsel %vm5067_vm14, %v5191_v55, %v5190_v30 }
 0x7dd   : > { %v4949_v11 = vpop.f32.mrb[252].mxu0 }
 0x7de   : > { %v5020_v22 = vpack.c.bf16 %v4949_v11, %v4949_v11  ;;  %v6379_v19 = vpop.f32.mrb[253].mxu0 }
 0x7df   : > { %v4952_v14 = vpop.f32.mrb[254].mxu0 }
 0x7e0   : > { %v5052_v5 = vunpack.c.l.b16 %v5020_v22  ;;  %v6380_v35 = vpop.f32.mrb[255].mxu0 }
 0x7e2   : > { %v5069_v58 = vrot.slane %v5052_v5, 2  ;;  %v5193_v4 = vrot.slane %v5052_v5, 3 }
 0x7e4   : > { %v5071_v45 = vsel %vm5070_vm15, %v5069_v58, %v5068_v21  ;;  %v5194_v2 = vsel %vm5070_vm15, %v5193_v4, %v5192_v59 }
 0x807   : > { %v4989_v60 = vpop.f32.mrb[28].mxu1 }
 0x808   : > { %v5021_v23 = vpack.c.bf16 %v4989_v60, %v4989_v60  ;;  %v6399_v33 = vpop.f32.mrb[29].mxu1 }
 0x809   : > { %v4992_v54 = vpop.f32.mrb[30].mxu1 }
 0x80a   : > { %v5053_v17 = vunpack.c.l.b16 %v5021_v23  ;;  %v6400_v32 = vpop.f32.mrb[31].mxu1 }
 0x80c   : > { %v5072_v62 = vrot.slane %v5053_v17, 1  ;;  %v5195_v47 = vrot.slane %v5053_v17, 2 }
 0x80e   : > { %v5074_v49 = vsel %vm5073_vm0, %v5072_v62, %v5071_v45  ;;  %v5196_v3 = vsel %vm5073_vm0, %v5195_v47, %v5194_v2 }
 0x80f   : > { %v5075_v8 = vpack.c.b16 %v5074_v49, %v5074_v49  ;;  %v5197_v56 = vpack.c.b16 %v5196_v3, %v5196_v3 }
 0x811   : > { %6418 = vmatmul.mubr.bf16.vlgmr.msra.gmra.mrb[0].mxu0 %v5075_v8 }
 0x812   : > { %6422 = vmatpush3.bf16.msra.mxu0 %v6629_v37  ;;  %6437 = vmatprep.mubr.msk.bf16.mxu0 %vm7543_vm7, %v9563_v57 }
 0x813   : > { %6423 = vmatprep.subr.bf16.mxu0 %v9563_v57 }
 0x816   : > { %6424 = vmatpush3.bf16.msra.mxu0 %v6630_v9 }
 0x817   : > { %6425 = vmatprep.subr.bf16.mxu0 %v9563_v57 }
 0x81a   : > { %6426 = vmatpush3.bf16.msra.mxu0 %v6631_v12 }
 0x81b   : > { %6427 = vmatprep.subr.bf16.mxu0 %v9563_v57 }
 0x81e   : > { %6428 = vmatpush3.bf16.msra.mxu0 %v6632_v63 }
 0x81f   : > { %6429 = vmatprep.subr.bf16.mxu0 %v9563_v57 }
 0x822   : > { %6430 = vmatpush3.bf16.msra.mxu0 %v6633_v25 }
 0x823   : > { %6431 = vmatprep.subr.bf16.mxu0 %v9563_v57 }
 0x826   : > { %6432 = vmatpush3.bf16.msra.mxu0 %v6634_v46 }
 0x827   : > { %6433 = vmatprep.subr.bf16.mxu0 %v9563_v57 }
 0x82a   : > { %6434 = vmatpush3.bf16.msra.mxu0 %v6635_v34 }
 0x82b   : > { %6435 = vmatprep.subr.bf16.mxu0 %v9563_v57 }
 0x82e   : > { %6436 = vmatpush3.bf16.msra.mxu0 %v6636_v44 }
 0x831   : > { %6438 = vmatmul.mubr.bf16.vlgmr.msra.gmra.mrb[0].mxu0 %v5197_v56 }
 0x832   : > { %7483 = shalt.err (!%p7480_p5)
}
 0x833   : > { %s7484_s28 = scalar_lea.hbm %s9399_s27, 256  ;;  %s7488_s29 = scalar_lea.hbm %s9466_s10, 512 }
 0x834   : > { %p7485_p7 = scmp.ne.s32.totalorder %s9399_s27, %s7484_s28  ;;  %p7489_p3 = scmp.lt.u32.totalorder %s9399_s27, %s9466_s10 }
 0x835   : > { %p7490_p6 = scmp.lt.u32.totalorder %s7488_s29, %s7484_s28  ;;  %p7492_p12 = scmp.lt.u32.totalorder %s7484_s28, %s9399_s27 }
 0x836   : > { %p7486_p9 = pnand %p7485_p7, %p9616_p13 }
 0x837   : > { %p7491_p11 = por %p7490_p6, %p7489_p3 }
 0x838   : > { %p7487_p1 = pneg %p7486_p9 }
 0x839   : > { %p7493_p8 = por %p7492_p12, %p7491_p11 }
 0x83b   : > { %p7494_p10 = pnand %p7493_p8, %p7487_p1 }
 0x83d   : > { %7497 = shalt.err (!%p7494_p10)
}
 0x83e   : > { %s7545_s20 = smov 32   ;;  %s7546_s17 = smov 2   ;;  %v5677_v57 = vld [vmem:[%s9463_s7] ss:$0 sm:$0xff]  ;;  %v5000_v48 = vpop.permute.xlu0 %4999  ;;  %v5678_v39 = vld [vmem:[%s9464_s8 + $0x3] ss:$0 sm:$0xff] }
 0x83f   : > { %6464 = dma.vmem_to_hbm [thread:$0]  (%p9616_p13), %s9401_s30, 256, %s9399_s27, %s5295_s23, %s7545_s20, %s7545_s20, %s7546_s17   ;;  %v5008_v10 = vmul.f32 %v5677_v57, %v5000_v48  ;;  %vm5288_vm1 = vcmask 23552  }
 0x840   : > { %s9617_s21 = sshll.u32 %s9235_s22, 3 }
 0x841   : > { %v5013_v20 = vadd.f32 %v5678_v39, %v5008_v10  ;;  %s426_s1 = scalar_lea.vmem %s9465_s9, %s9617_s21 }
 0x904   : > { %v5281_v42 = vpop.f32.mrb[0].mxu0 }
 0x905   : > { %v6457_v38 = vadd.f32 %v5281_v42, %v5013_v20  ;;  %v6439_v29 = vpop.f32.mrb[1].mxu0 }
 0x906   : > { %v5284_v53 = vpop.f32.mrb[2].mxu0 }
 0x907   : > { %5289 = vst.msk [vmem:[%s426_s1] sm:$0xff] %vm5288_vm1, %v6457_v38  ;;  %v6440_v1 = vpop.f32.mrb[3].mxu0 }
 0x908 PF: > { %s5333_s25 = sand.u32 1, %s7524_s13   ;;  %p9618_p13 = scmp.ne.s32.totalorder %s9523_s26, 0 }
 0x909   : > { %p9619_p0 = scmp.ge.s32.totalorder %s7536_s16, 2  ;;  %s5334_s18 = scalar_lea.sflag [#allocation4], %s5333_s25 }
 0x90b   : > { %p6471_p2 = pnand %p9619_p0, %p9618_p13 }
 0x90d   : > { %7519 = dma.done.wait (!%p6471_p2), %s5334_s18, 256  }
 0x90e   : > { %7521 = vsyncadd (!%p6471_p2), %s5334_s18, 4294967040  ;;  %s9620_s0 = sld [smem:[#allocation8_spill]]  ;;  %p24_p4 = scmp.ge.s32.totalorder %s7627_s19, 4  }
 0x90f   : > { %s9621_s13 = smov %s7528_s14  ;;  %s9622_s14 = smov %s7532_s15 }
 0x910   : > { %s9624_s16 = smov %s7627_s19  ;;  %26 = sbr.rel (!%p24_p4) target bundleno = 8 (0x8), region = 121 }
 0x914   : > { %s9623_s15 = smov %s9620_s0 }
 0x917   :  { %5339 = vsyncpa [#allocation3], 1 }
 0x918   :  { %5341 = vsyncpa [#allocation3 + $0x1], 1 }
 0x919   :  { %5342 = vsyncpa [#allocation4], 1 }
 0x91a   :  { %5344 = vsyncpa [#allocation4 + $0x1], 1 }

</bundles_post_ra>
